<compile_context>
chip_gen: v7x
topology: tpu7x:2x2x1
jax: 0.10.0
libtpu: 0.0.40
codegen_flags: <defaults>
</compile_context>

<pallas_src>
import functools

import jax
import jax.numpy as jnp
from jax.experimental import pallas as pl
from jax.experimental.pallas import tpu as pltpu


def _round_up(x, m):
    return ((x + m - 1) // m) * m


def _pad_to(x, shape):
    pads = [(0, s - d) for d, s in zip(x.shape, shape)]
    if all(p == (0, 0) for p in pads):
        return x
    return jnp.pad(x, pads)


# --------------------------------------------------------------------------
# Kernel
# --------------------------------------------------------------------------
def _tggann_compute(loop_num, Dp, bb,
                    a_med_ref, a_inp_ref, a_lab_ref,
                    at_med_ref, at_inp_ref, at_lab_ref,
                    w_eh_ref, w_nh_ref, w_x_ref, w_sm_ref,
                    carry0, he_out, hm_out, hl_out, hi_out):
    f32 = jnp.float32
    bf16 = jnp.bfloat16

    # Adjacencies (bf16; A and A^T together == one f32 copy in bytes).
    A_med = a_med_ref[...]     # (bb, Tp, Mp)
    A_inp = a_inp_ref[...]     # (bb, Tp, Ip)
    A_lab = a_lab_ref[...]     # (bb, Tp, Lp)
    AT_med = at_med_ref[...]   # (bb, Mp, Tp)
    AT_inp = at_inp_ref[...]   # (bb, Ip, Tp)
    AT_lab = at_lab_ref[...]   # (bb, Lp, Tp)
    Tp, Mp = A_med.shape[1], A_med.shape[2]
    Ip = A_inp.shape[2]
    Lp = A_lab.shape[2]

    # Fused bf16 weights; every column block is Dp (a multiple of 128) wide,
    # so all in-kernel column slices are lane-aligned.
    W_eh = w_eh_ref[...]       # (Dp, 4Dp) = [W_out_enc | Wr_top | Wz_hr | Wz_hz]
    W_lab_h = w_nh_ref[0]      # (Dp, 3Dp) = [W_out_lab | Wz_hr | Wz_hz]
    W_inp_h = w_nh_ref[1]
    W_med_h = w_nh_ref[2]
    Wx_enc = w_x_ref[0]        # (Dp, 3Dp) = [Wz_xr | Wz_xz | Wx]
    Wx_lab = w_x_ref[1]
    Wx_inp = w_x_ref[2]
    Wx_med = w_x_ref[3]
    Wh_enc = w_sm_ref[0]       # (Dp, Dp)
    Wh_lab = w_sm_ref[1]
    Wh_inp = w_sm_ref[2]
    Wh_med = w_sm_ref[3]
    Wr_bot = w_sm_ref[4]

    def mxdot(a, b):
        # bf16 MXU operands, f32 accumulation; elementwise math stays f32.
        return jnp.dot(a.astype(bf16), b, preferred_element_type=f32)

    def bmm3(adj, x3, n):
        # adj: (bb, n, k) bf16, x3: (bb, k, Dp) bf16 -> (bb*n, Dp) f32
        y = jnp.einsum("bnk,bkd->bnd", adj, x3, preferred_element_type=f32)
        return y.reshape(bb * n, Dp)

    def lrelu(x):
        # F.leaky_relu default negative_slope = 0.01
        return jnp.where(x >= 0, x, 0.01 * x)

    def as3(x, n):
        # f32 (bb*n, Dp) -> bf16 (bb, n, Dp); reshape first (free: n % 8 == 0).
        return x.reshape(bb, n, Dp).astype(bf16)

    def gru(h, x, g_h, Wx3, Wh):
        # h, x: (rows, Dp) f32; g_h: (rows, 2Dp) precomputed h-side gate pre-acts.
        x3 = mxdot(x, Wx3)                               # [r_x | z_x | x @ Wx]
        r = jax.nn.sigmoid(g_h[:, :Dp] + x3[:, :Dp])
        z = jax.nn.sigmoid(g_h[:, Dp:] + x3[:, Dp:2 * Dp])
        x_new = jnp.tanh(mxdot(r * h, Wh) + x3[:, 2 * Dp:])
        return (1.0 - z) * h + z * jnp.tanh(x_new)       # double tanh: matches torch

    R = bb * Tp

    def step(carry):
        h_e, h_l, h_i, h_m = carry   # f32 (bb*Tp,Dp), (bb*Lp,Dp), (bb*Ip,Dp), (bb*Mp,Dp)

        # One wide fused matmul per node type for everything multiplying h.
        e_h = mxdot(h_e, W_eh)       # (bb*Tp, 4Dp)
        l_h = mxdot(h_l, W_lab_h)    # (bb*Lp, 3Dp)
        i_h = mxdot(h_i, W_inp_h)    # (bb*Ip, 3Dp)
        m_h = mxdot(h_m, W_med_h)    # (bb*Mp, 3Dp)

        heW3 = as3(e_h[:, :Dp], Tp)  # shared h_e @ W_out_enc (associativity)
        lW3 = as3(l_h[:, :Dp], Lp)
        iW3 = as3(i_h[:, :Dp], Ip)
        mW3 = as3(m_h[:, :Dp], Mp)

        # node -> enc messages: lrelu(A @ (h @ W))
        h_lab2enc = lrelu(bmm3(A_lab, lW3, Tp))          # (bb*Tp, Dp)
        h_inp2enc = lrelu(bmm3(A_inp, iW3, Tp))
        h_med2enc = lrelu(bmm3(A_med, mW3, Tp))
        # enc -> node messages share h_e @ W_out_enc.
        h_enc2lab = lrelu(bmm3(AT_lab, heW3, Lp))        # (bb*Lp, Dp)
        h_enc2inp = lrelu(bmm3(AT_inp, heW3, Ip))
        h_enc2med = lrelu(bmm3(AT_med, heW3, Mp))

        # Softmax attention over the K=3 candidate enc messages:
        # score_k = cat([h_e, msg_k]) @ Wr == h_e @ Wr_top + msg_k @ Wr_bot.
        # One stacked (3*bb*Tp, Dp) matmul -> single RHS push for Wr_bot.
        sc = mxdot(jnp.concatenate([h_lab2enc, h_inp2enc, h_med2enc], axis=0),
                   Wr_bot)
        s_h = e_h[:, Dp:2 * Dp]
        s0 = s_h + sc[:R]
        s1 = s_h + sc[R:2 * R]
        s2 = s_h + sc[2 * R:]
        m = jnp.maximum(jnp.maximum(s0, s1), s2)
        e0 = jnp.exp(s0 - m)
        e1 = jnp.exp(s1 - m)
        e2 = jnp.exp(s2 - m)
        inv = pl.reciprocal(e0 + e1 + e2, approx=True)   # EUP, keeps VALU free
        h_e_x = (e0 * h_lab2enc + e1 * h_inp2enc + e2 * h_med2enc) * inv
        # lab / inputs / med have a single candidate: softmax over a size-1
        # axis is exactly 1.0, so the weighted sum equals the candidate.

        h_e = gru(h_e, h_e_x, e_h[:, 2 * Dp:], Wx_enc, Wh_enc)
        h_l = gru(h_l, h_enc2lab, l_h[:, Dp:], Wx_lab, Wh_lab)
        h_i = gru(h_i, h_enc2inp, i_h[:, Dp:], Wx_inp, Wh_inp)
        h_m = gru(h_m, h_enc2med, m_h[:, Dp:], Wx_med, Wh_med)
        return (h_e, h_l, h_i, h_m)

    carry = jax.lax.fori_loop(0, loop_num, lambda _, c: step(c), carry0,
                              unroll=True if loop_num <= 6 else False)

    h_e, h_l, h_i, h_m = carry
    he_out[...] = h_e.reshape(bb, Tp, Dp)
    hm_out[...] = h_m.reshape(bb, Mp, Dp)
    hl_out[...] = h_l.reshape(bb, Lp, Dp)
    hi_out[...] = h_i.reshape(bb, Ip, Dp)


def _tggann_kernel(loop_num, Dp, bb,
                   a_med_ref, a_inp_ref, a_lab_ref,
                   at_med_ref, at_inp_ref, at_lab_ref,
                   he0_ref, hl0_ref, hi0_ref, hm0_ref,
                   w_eh_ref, w_nh_ref, w_x_ref, w_sm_ref,
                   he_out, hm_out, hl_out, hi_out):
    Tp = he0_ref.shape[1]
    Lp = hl0_ref.shape[1]
    Ip = hi0_ref.shape[1]
    Mp = hm0_ref.shape[1]
    carry0 = (he0_ref[...].reshape(bb * Tp, Dp),
              hl0_ref[...].reshape(bb * Lp, Dp),
              hi0_ref[...].reshape(bb * Ip, Dp),
              hm0_ref[...].reshape(bb * Mp, Dp))
    _tggann_compute(loop_num, Dp, bb,
                    a_med_ref, a_inp_ref, a_lab_ref,
                    at_med_ref, at_inp_ref, at_lab_ref,
                    w_eh_ref, w_nh_ref, w_x_ref, w_sm_ref,
                    carry0, he_out, hm_out, hl_out, hi_out)


def _tggann_kernel_zero_init(loop_num, Dp, bb,
                             a_med_ref, a_inp_ref, a_lab_ref,
                             at_med_ref, at_inp_ref, at_lab_ref,
                             w_eh_ref, w_nh_ref, w_x_ref, w_sm_ref,
                             he_out, hm_out, hl_out, hi_out):
    # Zero initial hidden states built in-register / VMEM; no HBM zero DMAs.
    Tp = he_out.shape[1]
    Mp = hm_out.shape[1]
    Lp = hl_out.shape[1]
    Ip = hi_out.shape[1]
    z = lambda n: jnp.zeros((bb * n, Dp), jnp.float32)
    carry0 = (z(Tp), z(Lp), z(Ip), z(Mp))
    _tggann_compute(loop_num, Dp, bb,
                    a_med_ref, a_inp_ref, a_lab_ref,
                    at_med_ref, at_inp_ref, at_lab_ref,
                    w_eh_ref, w_nh_ref, w_x_ref, w_sm_ref,
                    carry0, he_out, hm_out, hl_out, hi_out)


# --------------------------------------------------------------------------
# Wrapper
# --------------------------------------------------------------------------
def _pick_batch_block(B, Tp, Mp, Ip, Lp, Dp, budget_bytes):
    """VMEM-budget-driven batch block.  Also guarantees >= 2 grid blocks when
    B > 1 so dimension_semantics=("parallel",) can shard across v7x's 2 TCs."""
    n_rows = Tp + Mp + Ip + Lp
    adj_b = 2 * Tp * (Mp + Ip + Lp) * 2            # A + A^T, bf16, per batch elem
    hid_b = n_rows * Dp * 4                        # one f32 set of hidden rows
    # double-buffered adjacencies + hidden inputs + outputs, plus ~8 live f32
    # row-sets of per-iteration intermediates inside the recurrence body.
    per_b = 2 * adj_b + 4 * hid_b + 8 * hid_b
    w_bytes = (4 + 9 + 12 + 5) * Dp * Dp * 2 * 2   # fused bf16 weights, 2 buffers
    avail = max(budget_bytes - w_bytes, per_b)
    cap = max(1, int(avail // per_b))
    best = 1
    for d in range(1, B + 1):
        if B % d == 0 and d <= cap and (B == 1 or B // d >= 2):
            best = d
    return best


def tggann_pallas(enc_med, enc_inputs, enc_lab, params, loop_num,
                  h_e=None, h_m=None, h_l=None, h_i=None,
                  batch_block=None, vmem_budget_bytes=20 * 1024 * 1024):
    """Forward pass of TGGANN(dim_embd, loop_num, basic=True).

    decay_mask_lower / time / lengths are unused on the basic path and omitted.
    Returns (h_e, h_m, h_l, h_i) matching the torch module's return order.
    """
    f32 = jnp.float32
    bf16 = jnp.bfloat16
    B, T, M = enc_med.shape
    I = enc_inputs.shape[-1]
    L = enc_lab.shape[-1]
    D = params["w_out"].shape[-1]

    # Pad D to the 128-lane width (full MXU lanes, unmasked output stores) and
    # node/time counts to 8-sublane multiples (free reshapes). Zero padding is
    # exact: padded rows/columns stay identically zero through the recurrence.
    Dp = _round_up(D, 128)
    Tp, Mp, Ip, Lp = (_round_up(x, 8) for x in (T, M, I, L))

    # Adjacencies: pad, transpose once in the wrapper (loop invariant), cast
    # both copies to bf16 so A + A^T together cost one f32 copy in HBM/VMEM.
    a_med = _pad_to(enc_med.astype(f32), (B, Tp, Mp))
    a_inp = _pad_to(enc_inputs.astype(f32), (B, Tp, Ip))
    a_lab = _pad_to(enc_lab.astype(f32), (B, Tp, Lp))
    at_med = jnp.swapaxes(a_med, -1, -2).astype(bf16)
    at_inp = jnp.swapaxes(a_inp, -1, -2).astype(bf16)
    at_lab = jnp.swapaxes(a_lab, -1, -2).astype(bf16)
    a_med, a_inp, a_lab = a_med.astype(bf16), a_inp.astype(bf16), a_lab.astype(bf16)

    # Initial hidden states (skip HBM zeros entirely when all are None).
    zero_init = (h_e is None) and (h_m is None) and (h_l is None) and (h_i is None)
    if not zero_init:
        def prep_h(h, npad):
            if h is None:
                return jnp.zeros((B, npad, Dp), f32)
            return _pad_to(h.astype(f32), (B, npad, Dp))
        h_e_p = prep_h(h_e, Tp)
        h_l_p = prep_h(h_l, Lp)
        h_i_p = prep_h(h_i, Ip)
        h_m_p = prep_h(h_m, Mp)

    # ---- fused, padded, bf16 weights (all column blocks Dp == 128k wide) ----
    def padW(w):
        return _pad_to(w.astype(f32), (Dp, Dp))

    Wout = params["w_out"]          # [lab, inputs, med, enc], each (D, D)
    Wrin_enc = params["w_rin"][3]   # (2D, D)
    Wzin = params["w_zin"]          # [lab, inputs, med, enc], each (2D, 2D)
    Whx = params["w_hx"]            # [h_enc,x_enc,h_lab,x_lab,h_inp,x_inp,h_med,x_med]

    Wr_top = padW(Wrin_enc[:D])
    Wr_bot = padW(Wrin_enc[D:])

    def zsplit(n):
        Wz = Wzin[n]
        return (padW(Wz[:D, :D]), padW(Wz[:D, D:]),
                padW(Wz[D:, :D]), padW(Wz[D:, D:]))  # (hr, hz, xr, xz)

    z_lab, z_inp, z_med, z_enc = zsplit(0), zsplit(1), zsplit(2), zsplit(3)

    w_eh = jnp.concatenate([padW(Wout[3]), Wr_top, z_enc[0], z_enc[1]], axis=1)
    w_nh = jnp.stack([
        jnp.concatenate([padW(Wout[0]), z_lab[0], z_lab[1]], axis=1),
        jnp.concatenate([padW(Wout[1]), z_inp[0], z_inp[1]], axis=1),
        jnp.concatenate([padW(Wout[2]), z_med[0], z_med[1]], axis=1)], axis=0)
    w_x = jnp.stack([
        jnp.concatenate([z_enc[2], z_enc[3], padW(Whx[1])], axis=1),
        jnp.concatenate([z_lab[2], z_lab[3], padW(Whx[3])], axis=1),
        jnp.concatenate([z_inp[2], z_inp[3], padW(Whx[5])], axis=1),
        jnp.concatenate([z_med[2], z_med[3], padW(Whx[7])], axis=1)], axis=0)
    w_sm = jnp.stack([padW(Whx[0]), padW(Whx[2]), padW(Whx[4]), padW(Whx[6]),
                      Wr_bot], axis=0)
    w_eh, w_nh, w_x, w_sm = (w_eh.astype(bf16), w_nh.astype(bf16),
                             w_x.astype(bf16), w_sm.astype(bf16))

    # ---- batch block (VMEM budget + megacore) and grid ----------------------
    if batch_block is None:
        bb = _pick_batch_block(B, Tp, Mp, Ip, Lp, Dp, vmem_budget_bytes)
    else:
        bb = batch_block
    assert B % bb == 0, (B, bb)
    nblocks = B // bb

    def batched(tail):
        nd = len(tail)
        return pl.BlockSpec((bb,) + tail, lambda b, nd=nd: (b,) + (0,) * nd)

    def shared(shape):
        nd = len(shape)
        return pl.BlockSpec(shape, lambda b, nd=nd: (0,) * nd)

    adj_specs = [batched((Tp, Mp)), batched((Tp, Ip)), batched((Tp, Lp)),
                 batched((Mp, Tp)), batched((Ip, Tp)), batched((Lp, Tp))]
    w_specs = [shared((Dp, 4 * Dp)), shared((3, Dp, 3 * Dp)),
               shared((4, Dp, 3 * Dp)), shared((5, Dp, Dp))]
    h_specs = [batched((Tp, Dp)), batched((Lp, Dp)),
               batched((Ip, Dp)), batched((Mp, Dp))]
    out_specs = [batched((Tp, Dp)), batched((Mp, Dp)),
                 batched((Lp, Dp)), batched((Ip, Dp))]
    out_shape = (jax.ShapeDtypeStruct((B, Tp, Dp), f32),   # h_e
                 jax.ShapeDtypeStruct((B, Mp, Dp), f32),   # h_m
                 jax.ShapeDtypeStruct((B, Lp, Dp), f32),   # h_l
                 jax.ShapeDtypeStruct((B, Ip, Dp), f32))   # h_i

    if zero_init:
        kernel = functools.partial(_tggann_kernel_zero_init, loop_num, Dp, bb)
        in_specs = adj_specs + w_specs
        operands = (a_med, a_inp, a_lab, at_med, at_inp, at_lab,
                    w_eh, w_nh, w_x, w_sm)
    else:
        kernel = functools.partial(_tggann_kernel, loop_num, Dp, bb)
        in_specs = adj_specs + h_specs + w_specs
        operands = (a_med, a_inp, a_lab, at_med, at_inp, at_lab,
                    h_e_p, h_l_p, h_i_p, h_m_p,
                    w_eh, w_nh, w_x, w_sm)

    grid_spec = pltpu.PrefetchScalarGridSpec(
        num_scalar_prefetch=0,
        grid=(nblocks,),
        in_specs=in_specs,
        out_specs=out_specs,
    )
    he_o, hm_o, hl_o, hi_o = pl.pallas_call(
        kernel,
        out_shape=out_shape,
        grid_spec=grid_spec,
        compiler_params=pltpu.CompilerParams(
            dimension_semantics=("parallel",),
            vmem_limit_bytes=48 * 1024 * 1024),
    )(*operands)

    return (he_o[:, :T, :D], hm_o[:, :M, :D], hl_o[:, :L, :D], hi_o[:, :I, :D])


# --------------------------------------------------------------------------
# Init + plain-JAX reference
# --------------------------------------------------------------------------
def init_params(key, dim_embd):
    """Deterministic kaiming-ish init for the shapes declared in __init__."""
    D = dim_embd
    ks = jax.random.split(key, 4)

    def kaiming(k, shape):
        fan_in = shape[-2]
        return (jax.random.normal(k, shape, jnp.float32)
                * jnp.sqrt(2.0 / fan_in)).astype(jnp.float32)

    return {
        # vars_out[0..3]  (lab, inputs, med, enc), each (D, D)
        "w_out": kaiming(ks[0], (4, D, D)),
        # vars_r_in[0..3] each (2D, D)
        "w_rin": kaiming(ks[1], (4, 2 * D, D)),
        # vars_z_in[0..3] each (2D, 2D)
        "w_zin": kaiming(ks[2], (4, 2 * D, 2 * D)),
        # out_h/out_x Linear(bias=False) weights, stored pre-transposed (x @ W)
        # in the order [h_enc, x_enc, h_lab, x_lab, h_input, x_input, h_med, x_med]
        "w_hx": kaiming(ks[3], (8, D, D)),
    }


def tggann_ref(enc_med, enc_inputs, enc_lab, params, loop_num, h_e, h_m, h_l, h_i):
    """Plain-JAX f32 reference of the same (basic=True) forward."""
    D = params["w_out"].shape[-1]
    Wout, Wrin, Wzin, Whx = (params["w_out"], params["w_rin"],
                             params["w_zin"], params["w_hx"])
    lrelu = lambda x: jnp.where(x >= 0, x, 0.01 * x)

    def gru(h, x, Wz, Wh, Wx):
        g = jax.nn.sigmoid(jnp.concatenate([h, x], axis=-1) @ Wz)
        r, z = g[..., :D], g[..., D:]
        x_new = jnp.tanh((r * h) @ Wh + x @ Wx)
        return (1.0 - z) * h + z * jnp.tanh(x_new)

    for _ in range(loop_num):
        h_lab2enc = lrelu(jnp.einsum("btl,bld->btd", enc_lab, h_l) @ Wout[0])
        h_inputs2enc = lrelu(jnp.einsum("bti,bid->btd", enc_inputs, h_i) @ Wout[1])
        h_med2enc = lrelu(jnp.einsum("btm,bmd->btd", enc_med, h_m) @ Wout[2])
        h_enc2lab = lrelu(jnp.einsum("btl,btd->bld", enc_lab, h_e) @ Wout[3])
        h_enc2med = lrelu(jnp.einsum("btm,btd->bmd", enc_med, h_e) @ Wout[3])
        h_enc2inp = lrelu(jnp.einsum("bti,btd->bid", enc_inputs, h_e) @ Wout[3])

        c_e = jnp.stack([h_lab2enc, h_inputs2enc, h_med2enc], axis=2)   # (B,T,3,D)
        he_b = jnp.broadcast_to(h_e[:, :, None, :], c_e.shape)
        scores = jnp.concatenate([he_b, c_e], axis=-1) @ Wrin[3]
        w = jax.nn.softmax(scores, axis=2)
        h_e_x = jnp.sum(w * c_e, axis=2)
        h_l_x, h_i_x, h_m_x = h_enc2lab, h_enc2inp, h_enc2med

        h_e = gru(h_e, h_e_x, Wzin[3], Whx[0], Whx[1])
        h_l = gru(h_l, h_l_x, Wzin[0], Whx[2], Whx[3])
        h_i = gru(h_i, h_i_x, Wzin[1], Whx[4], Whx[5])
        h_m = gru(h_m, h_m_x, Wzin[2], Whx[6], Whx[7])
    return h_e, h_m, h_l, h_i


if __name__ == "__main__":
    B, T, D = 2, 8, 32
    n_lab, n_inputs, n_med = 8, 8, 8
    loop_num = 2

    key = jax.random.PRNGKey(0)
    k_par, k_med, k_inp, k_lab, k_he, k_hm, k_hl, k_hi = jax.random.split(key, 8)
    params = init_params(k_par, D)

    enc_med = jax.random.uniform(k_med, (B, T, n_med), jnp.float32)
    enc_inputs = jax.random.uniform(k_inp, (B, T, n_inputs), jnp.float32)
    enc_lab = jax.random.uniform(k_lab, (B, T, n_lab), jnp.float32)

    # Nonzero initial hidden states (the all-zero init is a fixed point of the
    # basic-mode update, so this exercises the recurrence numerically).
    h_e0 = jax.random.normal(k_he, (B, T, D), jnp.float32) * 0.1
    h_m0 = jax.random.normal(k_hm, (B, n_med, D), jnp.float32) * 0.1
    h_l0 = jax.random.normal(k_hl, (B, n_lab, D), jnp.float32) * 0.1
    h_i0 = jax.random.normal(k_hi, (B, n_inputs, D), jnp.float32) * 0.1

    outs = tggann_pallas(enc_med, enc_inputs, enc_lab, params, loop_num,
                         h_e=h_e0, h_m=h_m0, h_l=h_l0, h_i=h_i0)
    outs = jax.block_until_ready(outs)

    refs = tggann_ref(enc_med, enc_inputs, enc_lab, params, loop_num,
                      h_e0, h_m0, h_l0, h_i0)
    for o, r in zip(outs, refs):
        assert o.shape == r.shape, (o.shape, r.shape)
        err = float(jnp.max(jnp.abs(o - r)))
        # Tolerance covers bf16 MXU operands + approx reciprocal + matmul
        # re-association vs the plain f32 reference.
        assert err < 6e-2, err

    # Zero-init path (all h_* = None): the all-zero state is a fixed point of
    # the basic-mode update, so outputs must be (exactly) zero.
    outs0 = tggann_pallas(enc_med, enc_inputs, enc_lab, params, loop_num)
    outs0 = jax.block_until_ready(outs0)
    for o in outs0:
        assert float(jnp.max(jnp.abs(o))) < 1e-6

    print("KERNEL_OK")
</pallas_src>

<mosaic_0001>
module attributes {stable_mosaic.version = 11 : i64} {
  func.func @_tggann_kernel(%arg0: i32, %arg1: memref<1x8x8xbf16, #tpu.memory_space<vmem>>, %arg2: memref<1x8x8xbf16, #tpu.memory_space<vmem>>, %arg3: memref<1x8x8xbf16, #tpu.memory_space<vmem>>, %arg4: memref<1x8x8xbf16, #tpu.memory_space<vmem>>, %arg5: memref<1x8x8xbf16, #tpu.memory_space<vmem>>, %arg6: memref<1x8x8xbf16, #tpu.memory_space<vmem>>, %arg7: memref<1x8x128xf32, #tpu.memory_space<vmem>>, %arg8: memref<1x8x128xf32, #tpu.memory_space<vmem>>, %arg9: memref<1x8x128xf32, #tpu.memory_space<vmem>>, %arg10: memref<1x8x128xf32, #tpu.memory_space<vmem>>, %arg11: memref<128x512xbf16, #tpu.memory_space<vmem>>, %arg12: memref<3x128x384xbf16, #tpu.memory_space<vmem>>, %arg13: memref<4x128x384xbf16, #tpu.memory_space<vmem>>, %arg14: memref<5x128x128xbf16, #tpu.memory_space<vmem>>, %arg15: memref<1x8x128xf32, #tpu.memory_space<vmem>>, %arg16: memref<1x8x128xf32, #tpu.memory_space<vmem>>, %arg17: memref<1x8x128xf32, #tpu.memory_space<vmem>>, %arg18: memref<1x8x128xf32, #tpu.memory_space<vmem>>) attributes {dimension_semantics = [#tpu.dimension_semantics<parallel>], iteration_bounds = array<i64: 2>, scalar_prefetch = 0 : i64, scratch_operands = 0 : i64, tpu.core_type = #tpu.core_type<tc>, window_params = [{transform_indices = @transform_0, window_bounds = array<i64: 1, 8, 8>}, {transform_indices = @transform_1, window_bounds = array<i64: 1, 8, 8>}, {transform_indices = @transform_2, window_bounds = array<i64: 1, 8, 8>}, {transform_indices = @transform_3, window_bounds = array<i64: 1, 8, 8>}, {transform_indices = @transform_4, window_bounds = array<i64: 1, 8, 8>}, {transform_indices = @transform_5, window_bounds = array<i64: 1, 8, 8>}, {transform_indices = @transform_6, window_bounds = array<i64: 1, 8, 128>}, {transform_indices = @transform_7, window_bounds = array<i64: 1, 8, 128>}, {transform_indices = @transform_8, window_bounds = array<i64: 1, 8, 128>}, {transform_indices = @transform_9, window_bounds = array<i64: 1, 8, 128>}, {pipeline_mode = #tpu.pipeline_mode<synchronous>, transform_indices = @transform_10, window_bounds = array<i64: 128, 512>}, {pipeline_mode = #tpu.pipeline_mode<synchronous>, transform_indices = @transform_11, window_bounds = array<i64: 3, 128, 384>}, {pipeline_mode = #tpu.pipeline_mode<synchronous>, transform_indices = @transform_12, window_bounds = array<i64: 4, 128, 384>}, {pipeline_mode = #tpu.pipeline_mode<synchronous>, transform_indices = @transform_13, window_bounds = array<i64: 5, 128, 128>}, {transform_indices = @transform_14, window_bounds = array<i64: 1, 8, 128>}, {transform_indices = @transform_15, window_bounds = array<i64: 1, 8, 128>}, {transform_indices = @transform_16, window_bounds = array<i64: 1, 8, 128>}, {transform_indices = @transform_17, window_bounds = array<i64: 1, 8, 128>}]} {
    %c0 = arith.constant 0 : index
    %c0_0 = arith.constant 0 : index
    %c0_1 = arith.constant 0 : index
    %0 = vector.load %arg7[%c0, %c0_0, %c0_1] : memref<1x8x128xf32, #tpu.memory_space<vmem>>, vector<1x8x128xf32>
    %1 = vector.shape_cast %0 : vector<1x8x128xf32> to vector<8x128xf32>
    %c0_2 = arith.constant 0 : index
    %c0_3 = arith.constant 0 : index
    %c0_4 = arith.constant 0 : index
    %2 = vector.load %arg8[%c0_2, %c0_3, %c0_4] : memref<1x8x128xf32, #tpu.memory_space<vmem>>, vector<1x8x128xf32>
    %3 = vector.shape_cast %2 : vector<1x8x128xf32> to vector<8x128xf32>
    %c0_5 = arith.constant 0 : index
    %c0_6 = arith.constant 0 : index
    %c0_7 = arith.constant 0 : index
    %4 = vector.load %arg9[%c0_5, %c0_6, %c0_7] : memref<1x8x128xf32, #tpu.memory_space<vmem>>, vector<1x8x128xf32>
    %5 = vector.shape_cast %4 : vector<1x8x128xf32> to vector<8x128xf32>
    %c0_8 = arith.constant 0 : index
    %c0_9 = arith.constant 0 : index
    %c0_10 = arith.constant 0 : index
    %6 = vector.load %arg10[%c0_8, %c0_9, %c0_10] : memref<1x8x128xf32, #tpu.memory_space<vmem>>, vector<1x8x128xf32>
    %7 = vector.shape_cast %6 : vector<1x8x128xf32> to vector<8x128xf32>
    %c0_11 = arith.constant 0 : index
    %c0_12 = arith.constant 0 : index
    %c0_13 = arith.constant 0 : index
    %8 = vector.load %arg1[%c0_11, %c0_12, %c0_13] : memref<1x8x8xbf16, #tpu.memory_space<vmem>>, vector<1x8x8xbf16>
    %c0_14 = arith.constant 0 : index
    %c0_15 = arith.constant 0 : index
    %c0_16 = arith.constant 0 : index
    %9 = vector.load %arg2[%c0_14, %c0_15, %c0_16] : memref<1x8x8xbf16, #tpu.memory_space<vmem>>, vector<1x8x8xbf16>
    %c0_17 = arith.constant 0 : index
    %c0_18 = arith.constant 0 : index
    %c0_19 = arith.constant 0 : index
    %10 = vector.load %arg3[%c0_17, %c0_18, %c0_19] : memref<1x8x8xbf16, #tpu.memory_space<vmem>>, vector<1x8x8xbf16>
    %c0_20 = arith.constant 0 : index
    %c0_21 = arith.constant 0 : index
    %c0_22 = arith.constant 0 : index
    %11 = vector.load %arg4[%c0_20, %c0_21, %c0_22] : memref<1x8x8xbf16, #tpu.memory_space<vmem>>, vector<1x8x8xbf16>
    %c0_23 = arith.constant 0 : index
    %c0_24 = arith.constant 0 : index
    %c0_25 = arith.constant 0 : index
    %12 = vector.load %arg5[%c0_23, %c0_24, %c0_25] : memref<1x8x8xbf16, #tpu.memory_space<vmem>>, vector<1x8x8xbf16>
    %c0_26 = arith.constant 0 : index
    %c0_27 = arith.constant 0 : index
    %c0_28 = arith.constant 0 : index
    %13 = vector.load %arg6[%c0_26, %c0_27, %c0_28] : memref<1x8x8xbf16, #tpu.memory_space<vmem>>, vector<1x8x8xbf16>
    %c0_29 = arith.constant 0 : index
    %c0_30 = arith.constant 0 : index
    %14 = vector.load %arg11[%c0_29, %c0_30] : memref<128x512xbf16, #tpu.memory_space<vmem>>, vector<128x512xbf16>
    %c0_31 = arith.constant 0 : index
    %c0_32 = arith.constant 0 : index
    %c0_33 = arith.constant 0 : index
    %15 = vector.load %arg12[%c0_31, %c0_32, %c0_33] : memref<3x128x384xbf16, #tpu.memory_space<vmem>>, vector<1x128x384xbf16>
    %16 = vector.shape_cast %15 : vector<1x128x384xbf16> to vector<128x384xbf16>
    %c1 = arith.constant 1 : index
    %c0_34 = arith.constant 0 : index
    %c0_35 = arith.constant 0 : index
    %17 = vector.load %arg12[%c1, %c0_34, %c0_35] : memref<3x128x384xbf16, #tpu.memory_space<vmem>>, vector<1x128x384xbf16>
    %18 = vector.shape_cast %17 : vector<1x128x384xbf16> to vector<128x384xbf16>
    %c2 = arith.constant 2 : index
    %c0_36 = arith.constant 0 : index
    %c0_37 = arith.constant 0 : index
    %19 = vector.load %arg12[%c2, %c0_36, %c0_37] : memref<3x128x384xbf16, #tpu.memory_space<vmem>>, vector<1x128x384xbf16>
    %20 = vector.shape_cast %19 : vector<1x128x384xbf16> to vector<128x384xbf16>
    %c0_38 = arith.constant 0 : index
    %c0_39 = arith.constant 0 : index
    %c0_40 = arith.constant 0 : index
    %21 = vector.load %arg13[%c0_38, %c0_39, %c0_40] : memref<4x128x384xbf16, #tpu.memory_space<vmem>>, vector<1x128x384xbf16>
    %22 = vector.shape_cast %21 : vector<1x128x384xbf16> to vector<128x384xbf16>
    %c1_41 = arith.constant 1 : index
    %c0_42 = arith.constant 0 : index
    %c0_43 = arith.constant 0 : index
    %23 = vector.load %arg13[%c1_41, %c0_42, %c0_43] : memref<4x128x384xbf16, #tpu.memory_space<vmem>>, vector<1x128x384xbf16>
    %24 = vector.shape_cast %23 : vector<1x128x384xbf16> to vector<128x384xbf16>
    %c2_44 = arith.constant 2 : index
    %c0_45 = arith.constant 0 : index
    %c0_46 = arith.constant 0 : index
    %25 = vector.load %arg13[%c2_44, %c0_45, %c0_46] : memref<4x128x384xbf16, #tpu.memory_space<vmem>>, vector<1x128x384xbf16>
    %26 = vector.shape_cast %25 : vector<1x128x384xbf16> to vector<128x384xbf16>
    %c3 = arith.constant 3 : index
    %c0_47 = arith.constant 0 : index
    %c0_48 = arith.constant 0 : index
    %27 = vector.load %arg13[%c3, %c0_47, %c0_48] : memref<4x128x384xbf16, #tpu.memory_space<vmem>>, vector<1x128x384xbf16>
    %28 = vector.shape_cast %27 : vector<1x128x384xbf16> to vector<128x384xbf16>
    %c0_49 = arith.constant 0 : index
    %c0_50 = arith.constant 0 : index
    %c0_51 = arith.constant 0 : index
    %29 = vector.load %arg14[%c0_49, %c0_50, %c0_51] : memref<5x128x128xbf16, #tpu.memory_space<vmem>>, vector<1x128x128xbf16>
    %30 = vector.shape_cast %29 : vector<1x128x128xbf16> to vector<128x128xbf16>
    %c1_52 = arith.constant 1 : index
    %c0_53 = arith.constant 0 : index
    %c0_54 = arith.constant 0 : index
    %31 = vector.load %arg14[%c1_52, %c0_53, %c0_54] : memref<5x128x128xbf16, #tpu.memory_space<vmem>>, vector<1x128x128xbf16>
    %32 = vector.shape_cast %31 : vector<1x128x128xbf16> to vector<128x128xbf16>
    %c2_55 = arith.constant 2 : index
    %c0_56 = arith.constant 0 : index
    %c0_57 = arith.constant 0 : index
    %33 = vector.load %arg14[%c2_55, %c0_56, %c0_57] : memref<5x128x128xbf16, #tpu.memory_space<vmem>>, vector<1x128x128xbf16>
    %34 = vector.shape_cast %33 : vector<1x128x128xbf16> to vector<128x128xbf16>
    %c3_58 = arith.constant 3 : index
    %c0_59 = arith.constant 0 : index
    %c0_60 = arith.constant 0 : index
    %35 = vector.load %arg14[%c3_58, %c0_59, %c0_60] : memref<5x128x128xbf16, #tpu.memory_space<vmem>>, vector<1x128x128xbf16>
    %36 = vector.shape_cast %35 : vector<1x128x128xbf16> to vector<128x128xbf16>
    %c4 = arith.constant 4 : index
    %c0_61 = arith.constant 0 : index
    %c0_62 = arith.constant 0 : index
    %37 = vector.load %arg14[%c4, %c0_61, %c0_62] : memref<5x128x128xbf16, #tpu.memory_space<vmem>>, vector<1x128x128xbf16>
    %38 = vector.shape_cast %37 : vector<1x128x128xbf16> to vector<128x128xbf16>
    %c0_i32 = arith.constant 0 : i32
    %39 = arith.truncf %1 : vector<8x128xf32> to vector<8x128xbf16>
    %cst = arith.constant dense<0.000000e+00> : vector<8x512xf32>
    %40 = tpu.matmul %39, %14, %cst {dimension_numbers = #tpu.dot_dimension_numbers<[1], [0], [0], [1], [0, 0, 1, 1], [], []>} : vector<8x128xbf16>, vector<128x512xbf16>, vector<8x512xf32> -> vector<8x512xf32>
    %41 = arith.truncf %3 : vector<8x128xf32> to vector<8x128xbf16>
    %cst_63 = arith.constant dense<0.000000e+00> : vector<8x384xf32>
    %42 = tpu.matmul %41, %16, %cst_63 {dimension_numbers = #tpu.dot_dimension_numbers<[1], [0], [0], [1], [0, 0, 1, 1], [], []>} : vector<8x128xbf16>, vector<128x384xbf16>, vector<8x384xf32> -> vector<8x384xf32>
    %43 = arith.truncf %5 : vector<8x128xf32> to vector<8x128xbf16>
    %cst_64 = arith.constant dense<0.000000e+00> : vector<8x384xf32>
    %44 = tpu.matmul %43, %18, %cst_64 {dimension_numbers = #tpu.dot_dimension_numbers<[1], [0], [0], [1], [0, 0, 1, 1], [], []>} : vector<8x128xbf16>, vector<128x384xbf16>, vector<8x384xf32> -> vector<8x384xf32>
    %45 = arith.truncf %7 : vector<8x128xf32> to vector<8x128xbf16>
    %cst_65 = arith.constant dense<0.000000e+00> : vector<8x384xf32>
    %46 = tpu.matmul %45, %20, %cst_65 {dimension_numbers = #tpu.dot_dimension_numbers<[1], [0], [0], [1], [0, 0, 1, 1], [], []>} : vector<8x128xbf16>, vector<128x384xbf16>, vector<8x384xf32> -> vector<8x384xf32>
    %47 = vector.extract_strided_slice %40 {offsets = [0, 0], sizes = [8, 128], strides = [1, 1]} : vector<8x512xf32> to vector<8x128xf32>
    %48 = vector.shape_cast %47 : vector<8x128xf32> to vector<1x8x128xf32>
    %49 = arith.truncf %48 : vector<1x8x128xf32> to vector<1x8x128xbf16>
    %50 = vector.extract_strided_slice %42 {offsets = [0, 0], sizes = [8, 128], strides = [1, 1]} : vector<8x384xf32> to vector<8x128xf32>
    %51 = vector.shape_cast %50 : vector<8x128xf32> to vector<1x8x128xf32>
    %52 = arith.truncf %51 : vector<1x8x128xf32> to vector<1x8x128xbf16>
    %53 = vector.extract_strided_slice %44 {offsets = [0, 0], sizes = [8, 128], strides = [1, 1]} : vector<8x384xf32> to vector<8x128xf32>
    %54 = vector.shape_cast %53 : vector<8x128xf32> to vector<1x8x128xf32>
    %55 = arith.truncf %54 : vector<1x8x128xf32> to vector<1x8x128xbf16>
    %56 = vector.extract_strided_slice %46 {offsets = [0, 0], sizes = [8, 128], strides = [1, 1]} : vector<8x384xf32> to vector<8x128xf32>
    %57 = vector.shape_cast %56 : vector<8x128xf32> to vector<1x8x128xf32>
    %58 = arith.truncf %57 : vector<1x8x128xf32> to vector<1x8x128xbf16>
    "tpu.trace_start"() <{level = 10 : i32, message = "bnk,bkd->bnd"}> : () -> ()
    %cst_66 = arith.constant dense<0.000000e+00> : vector<1x8x128xf32>
    %59 = tpu.matmul %10, %52, %cst_66 {dimension_numbers = #tpu.dot_dimension_numbers<[2], [1], [1], [2], [0, 0, 0, 1, 1, 2], [0], [0]>} : vector<1x8x8xbf16>, vector<1x8x128xbf16>, vector<1x8x128xf32> -> vector<1x8x128xf32>
    "tpu.trace_stop"() : () -> ()
    %60 = vector.shape_cast %59 : vector<1x8x128xf32> to vector<8x128xf32>
    %cst_67 = arith.constant 0.000000e+00 : f32
    %61 = vector.broadcast %cst_67 : f32 to vector<8x128xf32>
    %62 = arith.cmpf oge, %60, %61 : vector<8x128xf32>
    %cst_68 = arith.constant 0.00999999977 : f32
    %63 = vector.broadcast %cst_68 : f32 to vector<8x128xf32>
    %64 = arith.mulf %63, %60 : vector<8x128xf32>
    %65 = arith.select %62, %60, %64 : vector<8x128xi1>, vector<8x128xf32>
    "tpu.trace_start"() <{level = 10 : i32, message = "bnk,bkd->bnd"}> : () -> ()
    %cst_69 = arith.constant dense<0.000000e+00> : vector<1x8x128xf32>
    %66 = tpu.matmul %9, %55, %cst_69 {dimension_numbers = #tpu.dot_dimension_numbers<[2], [1], [1], [2], [0, 0, 0, 1, 1, 2], [0], [0]>} : vector<1x8x8xbf16>, vector<1x8x128xbf16>, vector<1x8x128xf32> -> vector<1x8x128xf32>
    "tpu.trace_stop"() : () -> ()
    %67 = vector.shape_cast %66 : vector<1x8x128xf32> to vector<8x128xf32>
    %cst_70 = arith.constant 0.000000e+00 : f32
    %68 = vector.broadcast %cst_70 : f32 to vector<8x128xf32>
    %69 = arith.cmpf oge, %67, %68 : vector<8x128xf32>
    %cst_71 = arith.constant 0.00999999977 : f32
    %70 = vector.broadcast %cst_71 : f32 to vector<8x128xf32>
    %71 = arith.mulf %70, %67 : vector<8x128xf32>
    %72 = arith.select %69, %67, %71 : vector<8x128xi1>, vector<8x128xf32>
    "tpu.trace_start"() <{level = 10 : i32, message = "bnk,bkd->bnd"}> : () -> ()
    %cst_72 = arith.constant dense<0.000000e+00> : vector<1x8x128xf32>
    %73 = tpu.matmul %8, %58, %cst_72 {dimension_numbers = #tpu.dot_dimension_numbers<[2], [1], [1], [2], [0, 0, 0, 1, 1, 2], [0], [0]>} : vector<1x8x8xbf16>, vector<1x8x128xbf16>, vector<1x8x128xf32> -> vector<1x8x128xf32>
    "tpu.trace_stop"() : () -> ()
    %74 = vector.shape_cast %73 : vector<1x8x128xf32> to vector<8x128xf32>
    %cst_73 = arith.constant 0.000000e+00 : f32
    %75 = vector.broadcast %cst_73 : f32 to vector<8x128xf32>
    %76 = arith.cmpf oge, %74, %75 : vector<8x128xf32>
    %cst_74 = arith.constant 0.00999999977 : f32
    %77 = vector.broadcast %cst_74 : f32 to vector<8x128xf32>
    %78 = arith.mulf %77, %74 : vector<8x128xf32>
    %79 = arith.select %76, %74, %78 : vector<8x128xi1>, vector<8x128xf32>
    "tpu.trace_start"() <{level = 10 : i32, message = "bnk,bkd->bnd"}> : () -> ()
    %cst_75 = arith.constant dense<0.000000e+00> : vector<1x8x128xf32>
    %80 = tpu.matmul %13, %49, %cst_75 {dimension_numbers = #tpu.dot_dimension_numbers<[2], [1], [1], [2], [0, 0, 0, 1, 1, 2], [0], [0]>} : vector<1x8x8xbf16>, vector<1x8x128xbf16>, vector<1x8x128xf32> -> vector<1x8x128xf32>
    "tpu.trace_stop"() : () -> ()
    %81 = vector.shape_cast %80 : vector<1x8x128xf32> to vector<8x128xf32>
    %cst_76 = arith.constant 0.000000e+00 : f32
    %82 = vector.broadcast %cst_76 : f32 to vector<8x128xf32>
    %83 = arith.cmpf oge, %81, %82 : vector<8x128xf32>
    %cst_77 = arith.constant 0.00999999977 : f32
    %84 = vector.broadcast %cst_77 : f32 to vector<8x128xf32>
    %85 = arith.mulf %84, %81 : vector<8x128xf32>
    %86 = arith.select %83, %81, %85 : vector<8x128xi1>, vector<8x128xf32>
    "tpu.trace_start"() <{level = 10 : i32, message = "bnk,bkd->bnd"}> : () -> ()
    %cst_78 = arith.constant dense<0.000000e+00> : vector<1x8x128xf32>
    %87 = tpu.matmul %12, %49, %cst_78 {dimension_numbers = #tpu.dot_dimension_numbers<[2], [1], [1], [2], [0, 0, 0, 1, 1, 2], [0], [0]>} : vector<1x8x8xbf16>, vector<1x8x128xbf16>, vector<1x8x128xf32> -> vector<1x8x128xf32>
    "tpu.trace_stop"() : () -> ()
    %88 = vector.shape_cast %87 : vector<1x8x128xf32> to vector<8x128xf32>
    %cst_79 = arith.constant 0.000000e+00 : f32
    %89 = vector.broadcast %cst_79 : f32 to vector<8x128xf32>
    %90 = arith.cmpf oge, %88, %89 : vector<8x128xf32>
    %cst_80 = arith.constant 0.00999999977 : f32
    %91 = vector.broadcast %cst_80 : f32 to vector<8x128xf32>
    %92 = arith.mulf %91, %88 : vector<8x128xf32>
    %93 = arith.select %90, %88, %92 : vector<8x128xi1>, vector<8x128xf32>
    "tpu.trace_start"() <{level = 10 : i32, message = "bnk,bkd->bnd"}> : () -> ()
    %cst_81 = arith.constant dense<0.000000e+00> : vector<1x8x128xf32>
    %94 = tpu.matmul %11, %49, %cst_81 {dimension_numbers = #tpu.dot_dimension_numbers<[2], [1], [1], [2], [0, 0, 0, 1, 1, 2], [0], [0]>} : vector<1x8x8xbf16>, vector<1x8x128xbf16>, vector<1x8x128xf32> -> vector<1x8x128xf32>
    "tpu.trace_stop"() : () -> ()
    %95 = vector.shape_cast %94 : vector<1x8x128xf32> to vector<8x128xf32>
    %cst_82 = arith.constant 0.000000e+00 : f32
    %96 = vector.broadcast %cst_82 : f32 to vector<8x128xf32>
    %97 = arith.cmpf oge, %95, %96 : vector<8x128xf32>
    %cst_83 = arith.constant 0.00999999977 : f32
    %98 = vector.broadcast %cst_83 : f32 to vector<8x128xf32>
    %99 = arith.mulf %98, %95 : vector<8x128xf32>
    %100 = arith.select %97, %95, %99 : vector<8x128xi1>, vector<8x128xf32>
    %101 = tpu.concatenate %65, %72, %79 in 0 : vector<8x128xf32>, vector<8x128xf32>, vector<8x128xf32> -> vector<24x128xf32>
    %102 = arith.truncf %101 : vector<24x128xf32> to vector<24x128xbf16>
    %cst_84 = arith.constant dense<0.000000e+00> : vector<24x128xf32>
    %103 = tpu.matmul %102, %38, %cst_84 {dimension_numbers = #tpu.dot_dimension_numbers<[1], [0], [0], [1], [0, 0, 1, 1], [], []>} : vector<24x128xbf16>, vector<128x128xbf16>, vector<24x128xf32> -> vector<24x128xf32>
    %104 = vector.extract_strided_slice %40 {offsets = [0, 128], sizes = [8, 128], strides = [1, 1]} : vector<8x512xf32> to vector<8x128xf32>
    %105 = vector.extract_strided_slice %103 {offsets = [0, 0], sizes = [8, 128], strides = [1, 1]} : vector<24x128xf32> to vector<8x128xf32>
    %106 = arith.addf %104, %105 : vector<8x128xf32>
    %107 = vector.extract_strided_slice %103 {offsets = [8, 0], sizes = [8, 128], strides = [1, 1]} : vector<24x128xf32> to vector<8x128xf32>
    %108 = arith.addf %104, %107 : vector<8x128xf32>
    %109 = vector.extract_strided_slice %103 {offsets = [16, 0], sizes = [8, 128], strides = [1, 1]} : vector<24x128xf32> to vector<8x128xf32>
    %110 = arith.addf %104, %109 : vector<8x128xf32>
    %111 = arith.maximumf %106, %108 : vector<8x128xf32>
    %112 = arith.maximumf %111, %110 : vector<8x128xf32>
    %113 = arith.subf %106, %112 : vector<8x128xf32>
    %114 = math.exp %113 : vector<8x128xf32>
    %115 = arith.subf %108, %112 : vector<8x128xf32>
    %116 = math.exp %115 : vector<8x128xf32>
    %117 = arith.subf %110, %112 : vector<8x128xf32>
    %118 = math.exp %117 : vector<8x128xf32>
    %119 = arith.addf %114, %116 : vector<8x128xf32>
    %120 = arith.addf %119, %118 : vector<8x128xf32>
    %121 = tpu.reciprocal %120 {approx = true} : vector<8x128xf32> -> vector<8x128xf32>
    %122 = arith.mulf %114, %65 : vector<8x128xf32>
    %123 = arith.mulf %116, %72 : vector<8x128xf32>
    %124 = arith.addf %122, %123 : vector<8x128xf32>
    %125 = arith.mulf %118, %79 : vector<8x128xf32>
    %126 = arith.addf %124, %125 : vector<8x128xf32>
    %127 = arith.mulf %126, %121 : vector<8x128xf32>
    %128 = vector.extract_strided_slice %40 {offsets = [0, 256], sizes = [8, 256], strides = [1, 1]} : vector<8x512xf32> to vector<8x256xf32>
    %129 = arith.truncf %127 : vector<8x128xf32> to vector<8x128xbf16>
    %cst_85 = arith.constant dense<0.000000e+00> : vector<8x384xf32>
    %130 = tpu.matmul %129, %22, %cst_85 {dimension_numbers = #tpu.dot_dimension_numbers<[1], [0], [0], [1], [0, 0, 1, 1], [], []>} : vector<8x128xbf16>, vector<128x384xbf16>, vector<8x384xf32> -> vector<8x384xf32>
    %131 = vector.extract_strided_slice %128 {offsets = [0, 0], sizes = [8, 128], strides = [1, 1]} : vector<8x256xf32> to vector<8x128xf32>
    %132 = vector.extract_strided_slice %130 {offsets = [0, 0], sizes = [8, 128], strides = [1, 1]} : vector<8x384xf32> to vector<8x128xf32>
    %133 = arith.addf %131, %132 : vector<8x128xf32>
    %134 = arith.negf %133 : vector<8x128xf32>
    %135 = math.exp %134 : vector<8x128xf32>
    %cst_86 = arith.constant 1.000000e+00 : f32
    %136 = vector.broadcast %cst_86 : f32 to vector<8x128xf32>
    %137 = arith.addf %136, %135 : vector<8x128xf32>
    %138 = arith.divf %136, %137 : vector<8x128xf32>
    %139 = vector.extract_strided_slice %128 {offsets = [0, 128], sizes = [8, 128], strides = [1, 1]} : vector<8x256xf32> to vector<8x128xf32>
    %140 = vector.extract_strided_slice %130 {offsets = [0, 128], sizes = [8, 128], strides = [1, 1]} : vector<8x384xf32> to vector<8x128xf32>
    %141 = arith.addf %139, %140 : vector<8x128xf32>
    %142 = arith.negf %141 : vector<8x128xf32>
    %143 = math.exp %142 : vector<8x128xf32>
    %cst_87 = arith.constant 1.000000e+00 : f32
    %144 = vector.broadcast %cst_87 : f32 to vector<8x128xf32>
    %145 = arith.addf %144, %143 : vector<8x128xf32>
    %146 = arith.divf %144, %145 : vector<8x128xf32>
    %147 = arith.mulf %138, %1 : vector<8x128xf32>
    %148 = arith.truncf %147 : vector<8x128xf32> to vector<8x128xbf16>
    %cst_88 = arith.constant dense<0.000000e+00> : vector<8x128xf32>
    %149 = tpu.matmul %148, %30, %cst_88 {dimension_numbers = #tpu.dot_dimension_numbers<[1], [0], [0], [1], [0, 0, 1, 1], [], []>} : vector<8x128xbf16>, vector<128x128xbf16>, vector<8x128xf32> -> vector<8x128xf32>
    %150 = vector.extract_strided_slice %130 {offsets = [0, 256], sizes = [8, 128], strides = [1, 1]} : vector<8x384xf32> to vector<8x128xf32>
    %151 = arith.addf %149, %150 : vector<8x128xf32>
    %152 = math.tanh %151 : vector<8x128xf32>
    %cst_89 = arith.constant 1.000000e+00 : f32
    %153 = vector.broadcast %cst_89 : f32 to vector<8x128xf32>
    %154 = arith.subf %153, %146 : vector<8x128xf32>
    %155 = arith.mulf %154, %1 : vector<8x128xf32>
    %156 = math.tanh %152 : vector<8x128xf32>
    %157 = arith.mulf %146, %156 : vector<8x128xf32>
    %158 = arith.addf %155, %157 : vector<8x128xf32>
    %159 = vector.extract_strided_slice %42 {offsets = [0, 128], sizes = [8, 256], strides = [1, 1]} : vector<8x384xf32> to vector<8x256xf32>
    %160 = arith.truncf %86 : vector<8x128xf32> to vector<8x128xbf16>
    %cst_90 = arith.constant dense<0.000000e+00> : vector<8x384xf32>
    %161 = tpu.matmul %160, %24, %cst_90 {dimension_numbers = #tpu.dot_dimension_numbers<[1], [0], [0], [1], [0, 0, 1, 1], [], []>} : vector<8x128xbf16>, vector<128x384xbf16>, vector<8x384xf32> -> vector<8x384xf32>
    %162 = vector.extract_strided_slice %159 {offsets = [0, 0], sizes = [8, 128], strides = [1, 1]} : vector<8x256xf32> to vector<8x128xf32>
    %163 = vector.extract_strided_slice %161 {offsets = [0, 0], sizes = [8, 128], strides = [1, 1]} : vector<8x384xf32> to vector<8x128xf32>
    %164 = arith.addf %162, %163 : vector<8x128xf32>
    %165 = arith.negf %164 : vector<8x128xf32>
    %166 = math.exp %165 : vector<8x128xf32>
    %cst_91 = arith.constant 1.000000e+00 : f32
    %167 = vector.broadcast %cst_91 : f32 to vector<8x128xf32>
    %168 = arith.addf %167, %166 : vector<8x128xf32>
    %169 = arith.divf %167, %168 : vector<8x128xf32>
    %170 = vector.extract_strided_slice %159 {offsets = [0, 128], sizes = [8, 128], strides = [1, 1]} : vector<8x256xf32> to vector<8x128xf32>
    %171 = vector.extract_strided_slice %161 {offsets = [0, 128], sizes = [8, 128], strides = [1, 1]} : vector<8x384xf32> to vector<8x128xf32>
    %172 = arith.addf %170, %171 : vector<8x128xf32>
    %173 = arith.negf %172 : vector<8x128xf32>
    %174 = math.exp %173 : vector<8x128xf32>
    %cst_92 = arith.constant 1.000000e+00 : f32
    %175 = vector.broadcast %cst_92 : f32 to vector<8x128xf32>
    %176 = arith.addf %175, %174 : vector<8x128xf32>
    %177 = arith.divf %175, %176 : vector<8x128xf32>
    %178 = arith.mulf %169, %3 : vector<8x128xf32>
    %179 = arith.truncf %178 : vector<8x128xf32> to vector<8x128xbf16>
    %cst_93 = arith.constant dense<0.000000e+00> : vector<8x128xf32>
    %180 = tpu.matmul %179, %32, %cst_93 {dimension_numbers = #tpu.dot_dimension_numbers<[1], [0], [0], [1], [0, 0, 1, 1], [], []>} : vector<8x128xbf16>, vector<128x128xbf16>, vector<8x128xf32> -> vector<8x128xf32>
    %181 = vector.extract_strided_slice %161 {offsets = [0, 256], sizes = [8, 128], strides = [1, 1]} : vector<8x384xf32> to vector<8x128xf32>
    %182 = arith.addf %180, %181 : vector<8x128xf32>
    %183 = math.tanh %182 : vector<8x128xf32>
    %cst_94 = arith.constant 1.000000e+00 : f32
    %184 = vector.broadcast %cst_94 : f32 to vector<8x128xf32>
    %185 = arith.subf %184, %177 : vector<8x128xf32>
    %186 = arith.mulf %185, %3 : vector<8x128xf32>
    %187 = math.tanh %183 : vector<8x128xf32>
    %188 = arith.mulf %177, %187 : vector<8x128xf32>
    %189 = arith.addf %186, %188 : vector<8x128xf32>
    %190 = vector.extract_strided_slice %44 {offsets = [0, 128], sizes = [8, 256], strides = [1, 1]} : vector<8x384xf32> to vector<8x256xf32>
    %191 = arith.truncf %93 : vector<8x128xf32> to vector<8x128xbf16>
    %cst_95 = arith.constant dense<0.000000e+00> : vector<8x384xf32>
    %192 = tpu.matmul %191, %26, %cst_95 {dimension_numbers = #tpu.dot_dimension_numbers<[1], [0], [0], [1], [0, 0, 1, 1], [], []>} : vector<8x128xbf16>, vector<128x384xbf16>, vector<8x384xf32> -> vector<8x384xf32>
    %193 = vector.extract_strided_slice %190 {offsets = [0, 0], sizes = [8, 128], strides = [1, 1]} : vector<8x256xf32> to vector<8x128xf32>
    %194 = vector.extract_strided_slice %192 {offsets = [0, 0], sizes = [8, 128], strides = [1, 1]} : vector<8x384xf32> to vector<8x128xf32>
    %195 = arith.addf %193, %194 : vector<8x128xf32>
    %196 = arith.negf %195 : vector<8x128xf32>
    %197 = math.exp %196 : vector<8x128xf32>
    %cst_96 = arith.constant 1.000000e+00 : f32
    %198 = vector.broadcast %cst_96 : f32 to vector<8x128xf32>
    %199 = arith.addf %198, %197 : vector<8x128xf32>
    %200 = arith.divf %198, %199 : vector<8x128xf32>
    %201 = vector.extract_strided_slice %190 {offsets = [0, 128], sizes = [8, 128], strides = [1, 1]} : vector<8x256xf32> to vector<8x128xf32>
    %202 = vector.extract_strided_slice %192 {offsets = [0, 128], sizes = [8, 128], strides = [1, 1]} : vector<8x384xf32> to vector<8x128xf32>
    %203 = arith.addf %201, %202 : vector<8x128xf32>
    %204 = arith.negf %203 : vector<8x128xf32>
    %205 = math.exp %204 : vector<8x128xf32>
    %cst_97 = arith.constant 1.000000e+00 : f32
    %206 = vector.broadcast %cst_97 : f32 to vector<8x128xf32>
    %207 = arith.addf %206, %205 : vector<8x128xf32>
    %208 = arith.divf %206, %207 : vector<8x128xf32>
    %209 = arith.mulf %200, %5 : vector<8x128xf32>
    %210 = arith.truncf %209 : vector<8x128xf32> to vector<8x128xbf16>
    %cst_98 = arith.constant dense<0.000000e+00> : vector<8x128xf32>
    %211 = tpu.matmul %210, %34, %cst_98 {dimension_numbers = #tpu.dot_dimension_numbers<[1], [0], [0], [1], [0, 0, 1, 1], [], []>} : vector<8x128xbf16>, vector<128x128xbf16>, vector<8x128xf32> -> vector<8x128xf32>
    %212 = vector.extract_strided_slice %192 {offsets = [0, 256], sizes = [8, 128], strides = [1, 1]} : vector<8x384xf32> to vector<8x128xf32>
    %213 = arith.addf %211, %212 : vector<8x128xf32>
    %214 = math.tanh %213 : vector<8x128xf32>
    %cst_99 = arith.constant 1.000000e+00 : f32
    %215 = vector.broadcast %cst_99 : f32 to vector<8x128xf32>
    %216 = arith.subf %215, %208 : vector<8x128xf32>
    %217 = arith.mulf %216, %5 : vector<8x128xf32>
    %218 = math.tanh %214 : vector<8x128xf32>
    %219 = arith.mulf %208, %218 : vector<8x128xf32>
    %220 = arith.addf %217, %219 : vector<8x128xf32>
    %221 = vector.extract_strided_slice %46 {offsets = [0, 128], sizes = [8, 256], strides = [1, 1]} : vector<8x384xf32> to vector<8x256xf32>
    %222 = arith.truncf %100 : vector<8x128xf32> to vector<8x128xbf16>
    %cst_100 = arith.constant dense<0.000000e+00> : vector<8x384xf32>
    %223 = tpu.matmul %222, %28, %cst_100 {dimension_numbers = #tpu.dot_dimension_numbers<[1], [0], [0], [1], [0, 0, 1, 1], [], []>} : vector<8x128xbf16>, vector<128x384xbf16>, vector<8x384xf32> -> vector<8x384xf32>
    %224 = vector.extract_strided_slice %221 {offsets = [0, 0], sizes = [8, 128], strides = [1, 1]} : vector<8x256xf32> to vector<8x128xf32>
    %225 = vector.extract_strided_slice %223 {offsets = [0, 0], sizes = [8, 128], strides = [1, 1]} : vector<8x384xf32> to vector<8x128xf32>
    %226 = arith.addf %224, %225 : vector<8x128xf32>
    %227 = arith.negf %226 : vector<8x128xf32>
    %228 = math.exp %227 : vector<8x128xf32>
    %cst_101 = arith.constant 1.000000e+00 : f32
    %229 = vector.broadcast %cst_101 : f32 to vector<8x128xf32>
    %230 = arith.addf %229, %228 : vector<8x128xf32>
    %231 = arith.divf %229, %230 : vector<8x128xf32>
    %232 = vector.extract_strided_slice %221 {offsets = [0, 128], sizes = [8, 128], strides = [1, 1]} : vector<8x256xf32> to vector<8x128xf32>
    %233 = vector.extract_strided_slice %223 {offsets = [0, 128], sizes = [8, 128], strides = [1, 1]} : vector<8x384xf32> to vector<8x128xf32>
    %234 = arith.addf %232, %233 : vector<8x128xf32>
    %235 = arith.negf %234 : vector<8x128xf32>
    %236 = math.exp %235 : vector<8x128xf32>
    %cst_102 = arith.constant 1.000000e+00 : f32
    %237 = vector.broadcast %cst_102 : f32 to vector<8x128xf32>
    %238 = arith.addf %237, %236 : vector<8x128xf32>
    %239 = arith.divf %237, %238 : vector<8x128xf32>
    %240 = arith.mulf %231, %7 : vector<8x128xf32>
    %241 = arith.truncf %240 : vector<8x128xf32> to vector<8x128xbf16>
    %cst_103 = arith.constant dense<0.000000e+00> : vector<8x128xf32>
    %242 = tpu.matmul %241, %36, %cst_103 {dimension_numbers = #tpu.dot_dimension_numbers<[1], [0], [0], [1], [0, 0, 1, 1], [], []>} : vector<8x128xbf16>, vector<128x128xbf16>, vector<8x128xf32> -> vector<8x128xf32>
    %243 = vector.extract_strided_slice %223 {offsets = [0, 256], sizes = [8, 128], strides = [1, 1]} : vector<8x384xf32> to vector<8x128xf32>
    %244 = arith.addf %242, %243 : vector<8x128xf32>
    %245 = math.tanh %244 : vector<8x128xf32>
    %cst_104 = arith.constant 1.000000e+00 : f32
    %246 = vector.broadcast %cst_104 : f32 to vector<8x128xf32>
    %247 = arith.subf %246, %239 : vector<8x128xf32>
    %248 = arith.mulf %247, %7 : vector<8x128xf32>
    %249 = math.tanh %245 : vector<8x128xf32>
    %250 = arith.mulf %239, %249 : vector<8x128xf32>
    %251 = arith.addf %248, %250 : vector<8x128xf32>
    %c1_i32 = arith.constant 1 : i32
    %252 = arith.truncf %158 : vector<8x128xf32> to vector<8x128xbf16>
    %cst_105 = arith.constant dense<0.000000e+00> : vector<8x512xf32>
    %253 = tpu.matmul %252, %14, %cst_105 {dimension_numbers = #tpu.dot_dimension_numbers<[1], [0], [0], [1], [0, 0, 1, 1], [], []>} : vector<8x128xbf16>, vector<128x512xbf16>, vector<8x512xf32> -> vector<8x512xf32>
    %254 = arith.truncf %189 : vector<8x128xf32> to vector<8x128xbf16>
    %cst_106 = arith.constant dense<0.000000e+00> : vector<8x384xf32>
    %255 = tpu.matmul %254, %16, %cst_106 {dimension_numbers = #tpu.dot_dimension_numbers<[1], [0], [0], [1], [0, 0, 1, 1], [], []>} : vector<8x128xbf16>, vector<128x384xbf16>, vector<8x384xf32> -> vector<8x384xf32>
    %256 = arith.truncf %220 : vector<8x128xf32> to vector<8x128xbf16>
    %cst_107 = arith.constant dense<0.000000e+00> : vector<8x384xf32>
    %257 = tpu.matmul %256, %18, %cst_107 {dimension_numbers = #tpu.dot_dimension_numbers<[1], [0], [0], [1], [0, 0, 1, 1], [], []>} : vector<8x128xbf16>, vector<128x384xbf16>, vector<8x384xf32> -> vector<8x384xf32>
    %258 = arith.truncf %251 : vector<8x128xf32> to vector<8x128xbf16>
    %cst_108 = arith.constant dense<0.000000e+00> : vector<8x384xf32>
    %259 = tpu.matmul %258, %20, %cst_108 {dimension_numbers = #tpu.dot_dimension_numbers<[1], [0], [0], [1], [0, 0, 1, 1], [], []>} : vector<8x128xbf16>, vector<128x384xbf16>, vector<8x384xf32> -> vector<8x384xf32>
    %260 = vector.extract_strided_slice %253 {offsets = [0, 0], sizes = [8, 128], strides = [1, 1]} : vector<8x512xf32> to vector<8x128xf32>
    %261 = vector.shape_cast %260 : vector<8x128xf32> to vector<1x8x128xf32>
    %262 = arith.truncf %261 : vector<1x8x128xf32> to vector<1x8x128xbf16>
    %263 = vector.extract_strided_slice %255 {offsets = [0, 0], sizes = [8, 128], strides = [1, 1]} : vector<8x384xf32> to vector<8x128xf32>
    %264 = vector.shape_cast %263 : vector<8x128xf32> to vector<1x8x128xf32>
    %265 = arith.truncf %264 : vector<1x8x128xf32> to vector<1x8x128xbf16>
    %266 = vector.extract_strided_slice %257 {offsets = [0, 0], sizes = [8, 128], strides = [1, 1]} : vector<8x384xf32> to vector<8x128xf32>
    %267 = vector.shape_cast %266 : vector<8x128xf32> to vector<1x8x128xf32>
    %268 = arith.truncf %267 : vector<1x8x128xf32> to vector<1x8x128xbf16>
    %269 = vector.extract_strided_slice %259 {offsets = [0, 0], sizes = [8, 128], strides = [1, 1]} : vector<8x384xf32> to vector<8x128xf32>
    %270 = vector.shape_cast %269 : vector<8x128xf32> to vector<1x8x128xf32>
    %271 = arith.truncf %270 : vector<1x8x128xf32> to vector<1x8x128xbf16>
    "tpu.trace_start"() <{level = 10 : i32, message = "bnk,bkd->bnd"}> : () -> ()
    %cst_109 = arith.constant dense<0.000000e+00> : vector<1x8x128xf32>
    %272 = tpu.matmul %10, %265, %cst_109 {dimension_numbers = #tpu.dot_dimension_numbers<[2], [1], [1], [2], [0, 0, 0, 1, 1, 2], [0], [0]>} : vector<1x8x8xbf16>, vector<1x8x128xbf16>, vector<1x8x128xf32> -> vector<1x8x128xf32>
    "tpu.trace_stop"() : () -> ()
    %273 = vector.shape_cast %272 : vector<1x8x128xf32> to vector<8x128xf32>
    %cst_110 = arith.constant 0.000000e+00 : f32
    %274 = vector.broadcast %cst_110 : f32 to vector<8x128xf32>
    %275 = arith.cmpf oge, %273, %274 : vector<8x128xf32>
    %cst_111 = arith.constant 0.00999999977 : f32
    %276 = vector.broadcast %cst_111 : f32 to vector<8x128xf32>
    %277 = arith.mulf %276, %273 : vector<8x128xf32>
    %278 = arith.select %275, %273, %277 : vector<8x128xi1>, vector<8x128xf32>
    "tpu.trace_start"() <{level = 10 : i32, message = "bnk,bkd->bnd"}> : () -> ()
    %cst_112 = arith.constant dense<0.000000e+00> : vector<1x8x128xf32>
    %279 = tpu.matmul %9, %268, %cst_112 {dimension_numbers = #tpu.dot_dimension_numbers<[2], [1], [1], [2], [0, 0, 0, 1, 1, 2], [0], [0]>} : vector<1x8x8xbf16>, vector<1x8x128xbf16>, vector<1x8x128xf32> -> vector<1x8x128xf32>
    "tpu.trace_stop"() : () -> ()
    %280 = vector.shape_cast %279 : vector<1x8x128xf32> to vector<8x128xf32>
    %cst_113 = arith.constant 0.000000e+00 : f32
    %281 = vector.broadcast %cst_113 : f32 to vector<8x128xf32>
    %282 = arith.cmpf oge, %280, %281 : vector<8x128xf32>
    %cst_114 = arith.constant 0.00999999977 : f32
    %283 = vector.broadcast %cst_114 : f32 to vector<8x128xf32>
    %284 = arith.mulf %283, %280 : vector<8x128xf32>
    %285 = arith.select %282, %280, %284 : vector<8x128xi1>, vector<8x128xf32>
    "tpu.trace_start"() <{level = 10 : i32, message = "bnk,bkd->bnd"}> : () -> ()
    %cst_115 = arith.constant dense<0.000000e+00> : vector<1x8x128xf32>
    %286 = tpu.matmul %8, %271, %cst_115 {dimension_numbers = #tpu.dot_dimension_numbers<[2], [1], [1], [2], [0, 0, 0, 1, 1, 2], [0], [0]>} : vector<1x8x8xbf16>, vector<1x8x128xbf16>, vector<1x8x128xf32> -> vector<1x8x128xf32>
    "tpu.trace_stop"() : () -> ()
    %287 = vector.shape_cast %286 : vector<1x8x128xf32> to vector<8x128xf32>
    %cst_116 = arith.constant 0.000000e+00 : f32
    %288 = vector.broadcast %cst_116 : f32 to vector<8x128xf32>
    %289 = arith.cmpf oge, %287, %288 : vector<8x128xf32>
    %cst_117 = arith.constant 0.00999999977 : f32
    %290 = vector.broadcast %cst_117 : f32 to vector<8x128xf32>
    %291 = arith.mulf %290, %287 : vector<8x128xf32>
    %292 = arith.select %289, %287, %291 : vector<8x128xi1>, vector<8x128xf32>
    "tpu.trace_start"() <{level = 10 : i32, message = "bnk,bkd->bnd"}> : () -> ()
    %cst_118 = arith.constant dense<0.000000e+00> : vector<1x8x128xf32>
    %293 = tpu.matmul %13, %262, %cst_118 {dimension_numbers = #tpu.dot_dimension_numbers<[2], [1], [1], [2], [0, 0, 0, 1, 1, 2], [0], [0]>} : vector<1x8x8xbf16>, vector<1x8x128xbf16>, vector<1x8x128xf32> -> vector<1x8x128xf32>
    "tpu.trace_stop"() : () -> ()
    %294 = vector.shape_cast %293 : vector<1x8x128xf32> to vector<8x128xf32>
    %cst_119 = arith.constant 0.000000e+00 : f32
    %295 = vector.broadcast %cst_119 : f32 to vector<8x128xf32>
    %296 = arith.cmpf oge, %294, %295 : vector<8x128xf32>
    %cst_120 = arith.constant 0.00999999977 : f32
    %297 = vector.broadcast %cst_120 : f32 to vector<8x128xf32>
    %298 = arith.mulf %297, %294 : vector<8x128xf32>
    %299 = arith.select %296, %294, %298 : vector<8x128xi1>, vector<8x128xf32>
    "tpu.trace_start"() <{level = 10 : i32, message = "bnk,bkd->bnd"}> : () -> ()
    %cst_121 = arith.constant dense<0.000000e+00> : vector<1x8x128xf32>
    %300 = tpu.matmul %12, %262, %cst_121 {dimension_numbers = #tpu.dot_dimension_numbers<[2], [1], [1], [2], [0, 0, 0, 1, 1, 2], [0], [0]>} : vector<1x8x8xbf16>, vector<1x8x128xbf16>, vector<1x8x128xf32> -> vector<1x8x128xf32>
    "tpu.trace_stop"() : () -> ()
    %301 = vector.shape_cast %300 : vector<1x8x128xf32> to vector<8x128xf32>
    %cst_122 = arith.constant 0.000000e+00 : f32
    %302 = vector.broadcast %cst_122 : f32 to vector<8x128xf32>
    %303 = arith.cmpf oge, %301, %302 : vector<8x128xf32>
    %cst_123 = arith.constant 0.00999999977 : f32
    %304 = vector.broadcast %cst_123 : f32 to vector<8x128xf32>
    %305 = arith.mulf %304, %301 : vector<8x128xf32>
    %306 = arith.select %303, %301, %305 : vector<8x128xi1>, vector<8x128xf32>
    "tpu.trace_start"() <{level = 10 : i32, message = "bnk,bkd->bnd"}> : () -> ()
    %cst_124 = arith.constant dense<0.000000e+00> : vector<1x8x128xf32>
    %307 = tpu.matmul %11, %262, %cst_124 {dimension_numbers = #tpu.dot_dimension_numbers<[2], [1], [1], [2], [0, 0, 0, 1, 1, 2], [0], [0]>} : vector<1x8x8xbf16>, vector<1x8x128xbf16>, vector<1x8x128xf32> -> vector<1x8x128xf32>
    "tpu.trace_stop"() : () -> ()
    %308 = vector.shape_cast %307 : vector<1x8x128xf32> to vector<8x128xf32>
    %cst_125 = arith.constant 0.000000e+00 : f32
    %309 = vector.broadcast %cst_125 : f32 to vector<8x128xf32>
    %310 = arith.cmpf oge, %308, %309 : vector<8x128xf32>
    %cst_126 = arith.constant 0.00999999977 : f32
    %311 = vector.broadcast %cst_126 : f32 to vector<8x128xf32>
    %312 = arith.mulf %311, %308 : vector<8x128xf32>
    %313 = arith.select %310, %308, %312 : vector<8x128xi1>, vector<8x128xf32>
    %314 = tpu.concatenate %278, %285, %292 in 0 : vector<8x128xf32>, vector<8x128xf32>, vector<8x128xf32> -> vector<24x128xf32>
    %315 = arith.truncf %314 : vector<24x128xf32> to vector<24x128xbf16>
    %cst_127 = arith.constant dense<0.000000e+00> : vector<24x128xf32>
    %316 = tpu.matmul %315, %38, %cst_127 {dimension_numbers = #tpu.dot_dimension_numbers<[1], [0], [0], [1], [0, 0, 1, 1], [], []>} : vector<24x128xbf16>, vector<128x128xbf16>, vector<24x128xf32> -> vector<24x128xf32>
    %317 = vector.extract_strided_slice %253 {offsets = [0, 128], sizes = [8, 128], strides = [1, 1]} : vector<8x512xf32> to vector<8x128xf32>
    %318 = vector.extract_strided_slice %316 {offsets = [0, 0], sizes = [8, 128], strides = [1, 1]} : vector<24x128xf32> to vector<8x128xf32>
    %319 = arith.addf %317, %318 : vector<8x128xf32>
    %320 = vector.extract_strided_slice %316 {offsets = [8, 0], sizes = [8, 128], strides = [1, 1]} : vector<24x128xf32> to vector<8x128xf32>
    %321 = arith.addf %317, %320 : vector<8x128xf32>
    %322 = vector.extract_strided_slice %316 {offsets = [16, 0], sizes = [8, 128], strides = [1, 1]} : vector<24x128xf32> to vector<8x128xf32>
    %323 = arith.addf %317, %322 : vector<8x128xf32>
    %324 = arith.maximumf %319, %321 : vector<8x128xf32>
    %325 = arith.maximumf %324, %323 : vector<8x128xf32>
    %326 = arith.subf %319, %325 : vector<8x128xf32>
    %327 = math.exp %326 : vector<8x128xf32>
    %328 = arith.subf %321, %325 : vector<8x128xf32>
    %329 = math.exp %328 : vector<8x128xf32>
    %330 = arith.subf %323, %325 : vector<8x128xf32>
    %331 = math.exp %330 : vector<8x128xf32>
    %332 = arith.addf %327, %329 : vector<8x128xf32>
    %333 = arith.addf %332, %331 : vector<8x128xf32>
    %334 = tpu.reciprocal %333 {approx = true} : vector<8x128xf32> -> vector<8x128xf32>
    %335 = arith.mulf %327, %278 : vector<8x128xf32>
    %336 = arith.mulf %329, %285 : vector<8x128xf32>
    %337 = arith.addf %335, %336 : vector<8x128xf32>
    %338 = arith.mulf %331, %292 : vector<8x128xf32>
    %339 = arith.addf %337, %338 : vector<8x128xf32>
    %340 = arith.mulf %339, %334 : vector<8x128xf32>
    %341 = vector.extract_strided_slice %253 {offsets = [0, 256], sizes = [8, 256], strides = [1, 1]} : vector<8x512xf32> to vector<8x256xf32>
    %342 = arith.truncf %340 : vector<8x128xf32> to vector<8x128xbf16>
    %cst_128 = arith.constant dense<0.000000e+00> : vector<8x384xf32>
    %343 = tpu.matmul %342, %22, %cst_128 {dimension_numbers = #tpu.dot_dimension_numbers<[1], [0], [0], [1], [0, 0, 1, 1], [], []>} : vector<8x128xbf16>, vector<128x384xbf16>, vector<8x384xf32> -> vector<8x384xf32>
    %344 = vector.extract_strided_slice %341 {offsets = [0, 0], sizes = [8, 128], strides = [1, 1]} : vector<8x256xf32> to vector<8x128xf32>
    %345 = vector.extract_strided_slice %343 {offsets = [0, 0], sizes = [8, 128], strides = [1, 1]} : vector<8x384xf32> to vector<8x128xf32>
    %346 = arith.addf %344, %345 : vector<8x128xf32>
    %347 = arith.negf %346 : vector<8x128xf32>
    %348 = math.exp %347 : vector<8x128xf32>
    %cst_129 = arith.constant 1.000000e+00 : f32
    %349 = vector.broadcast %cst_129 : f32 to vector<8x128xf32>
    %350 = arith.addf %349, %348 : vector<8x128xf32>
    %351 = arith.divf %349, %350 : vector<8x128xf32>
    %352 = vector.extract_strided_slice %341 {offsets = [0, 128], sizes = [8, 128], strides = [1, 1]} : vector<8x256xf32> to vector<8x128xf32>
    %353 = vector.extract_strided_slice %343 {offsets = [0, 128], sizes = [8, 128], strides = [1, 1]} : vector<8x384xf32> to vector<8x128xf32>
    %354 = arith.addf %352, %353 : vector<8x128xf32>
    %355 = arith.negf %354 : vector<8x128xf32>
    %356 = math.exp %355 : vector<8x128xf32>
    %cst_130 = arith.constant 1.000000e+00 : f32
    %357 = vector.broadcast %cst_130 : f32 to vector<8x128xf32>
    %358 = arith.addf %357, %356 : vector<8x128xf32>
    %359 = arith.divf %357, %358 : vector<8x128xf32>
    %360 = arith.mulf %351, %158 : vector<8x128xf32>
    %361 = arith.truncf %360 : vector<8x128xf32> to vector<8x128xbf16>
    %cst_131 = arith.constant dense<0.000000e+00> : vector<8x128xf32>
    %362 = tpu.matmul %361, %30, %cst_131 {dimension_numbers = #tpu.dot_dimension_numbers<[1], [0], [0], [1], [0, 0, 1, 1], [], []>} : vector<8x128xbf16>, vector<128x128xbf16>, vector<8x128xf32> -> vector<8x128xf32>
    %363 = vector.extract_strided_slice %343 {offsets = [0, 256], sizes = [8, 128], strides = [1, 1]} : vector<8x384xf32> to vector<8x128xf32>
    %364 = arith.addf %362, %363 : vector<8x128xf32>
    %365 = math.tanh %364 : vector<8x128xf32>
    %cst_132 = arith.constant 1.000000e+00 : f32
    %366 = vector.broadcast %cst_132 : f32 to vector<8x128xf32>
    %367 = arith.subf %366, %359 : vector<8x128xf32>
    %368 = arith.mulf %367, %158 : vector<8x128xf32>
    %369 = math.tanh %365 : vector<8x128xf32>
    %370 = arith.mulf %359, %369 : vector<8x128xf32>
    %371 = arith.addf %368, %370 : vector<8x128xf32>
    %372 = vector.extract_strided_slice %255 {offsets = [0, 128], sizes = [8, 256], strides = [1, 1]} : vector<8x384xf32> to vector<8x256xf32>
    %373 = arith.truncf %299 : vector<8x128xf32> to vector<8x128xbf16>
    %cst_133 = arith.constant dense<0.000000e+00> : vector<8x384xf32>
    %374 = tpu.matmul %373, %24, %cst_133 {dimension_numbers = #tpu.dot_dimension_numbers<[1], [0], [0], [1], [0, 0, 1, 1], [], []>} : vector<8x128xbf16>, vector<128x384xbf16>, vector<8x384xf32> -> vector<8x384xf32>
    %375 = vector.extract_strided_slice %372 {offsets = [0, 0], sizes = [8, 128], strides = [1, 1]} : vector<8x256xf32> to vector<8x128xf32>
    %376 = vector.extract_strided_slice %374 {offsets = [0, 0], sizes = [8, 128], strides = [1, 1]} : vector<8x384xf32> to vector<8x128xf32>
    %377 = arith.addf %375, %376 : vector<8x128xf32>
    %378 = arith.negf %377 : vector<8x128xf32>
    %379 = math.exp %378 : vector<8x128xf32>
    %cst_134 = arith.constant 1.000000e+00 : f32
    %380 = vector.broadcast %cst_134 : f32 to vector<8x128xf32>
    %381 = arith.addf %380, %379 : vector<8x128xf32>
    %382 = arith.divf %380, %381 : vector<8x128xf32>
    %383 = vector.extract_strided_slice %372 {offsets = [0, 128], sizes = [8, 128], strides = [1, 1]} : vector<8x256xf32> to vector<8x128xf32>
    %384 = vector.extract_strided_slice %374 {offsets = [0, 128], sizes = [8, 128], strides = [1, 1]} : vector<8x384xf32> to vector<8x128xf32>
    %385 = arith.addf %383, %384 : vector<8x128xf32>
    %386 = arith.negf %385 : vector<8x128xf32>
    %387 = math.exp %386 : vector<8x128xf32>
    %cst_135 = arith.constant 1.000000e+00 : f32
    %388 = vector.broadcast %cst_135 : f32 to vector<8x128xf32>
    %389 = arith.addf %388, %387 : vector<8x128xf32>
    %390 = arith.divf %388, %389 : vector<8x128xf32>
    %391 = arith.mulf %382, %189 : vector<8x128xf32>
    %392 = arith.truncf %391 : vector<8x128xf32> to vector<8x128xbf16>
    %cst_136 = arith.constant dense<0.000000e+00> : vector<8x128xf32>
    %393 = tpu.matmul %392, %32, %cst_136 {dimension_numbers = #tpu.dot_dimension_numbers<[1], [0], [0], [1], [0, 0, 1, 1], [], []>} : vector<8x128xbf16>, vector<128x128xbf16>, vector<8x128xf32> -> vector<8x128xf32>
    %394 = vector.extract_strided_slice %374 {offsets = [0, 256], sizes = [8, 128], strides = [1, 1]} : vector<8x384xf32> to vector<8x128xf32>
    %395 = arith.addf %393, %394 : vector<8x128xf32>
    %396 = math.tanh %395 : vector<8x128xf32>
    %cst_137 = arith.constant 1.000000e+00 : f32
    %397 = vector.broadcast %cst_137 : f32 to vector<8x128xf32>
    %398 = arith.subf %397, %390 : vector<8x128xf32>
    %399 = arith.mulf %398, %189 : vector<8x128xf32>
    %400 = math.tanh %396 : vector<8x128xf32>
    %401 = arith.mulf %390, %400 : vector<8x128xf32>
    %402 = arith.addf %399, %401 : vector<8x128xf32>
    %403 = vector.extract_strided_slice %257 {offsets = [0, 128], sizes = [8, 256], strides = [1, 1]} : vector<8x384xf32> to vector<8x256xf32>
    %404 = arith.truncf %306 : vector<8x128xf32> to vector<8x128xbf16>
    %cst_138 = arith.constant dense<0.000000e+00> : vector<8x384xf32>
    %405 = tpu.matmul %404, %26, %cst_138 {dimension_numbers = #tpu.dot_dimension_numbers<[1], [0], [0], [1], [0, 0, 1, 1], [], []>} : vector<8x128xbf16>, vector<128x384xbf16>, vector<8x384xf32> -> vector<8x384xf32>
    %406 = vector.extract_strided_slice %403 {offsets = [0, 0], sizes = [8, 128], strides = [1, 1]} : vector<8x256xf32> to vector<8x128xf32>
    %407 = vector.extract_strided_slice %405 {offsets = [0, 0], sizes = [8, 128], strides = [1, 1]} : vector<8x384xf32> to vector<8x128xf32>
    %408 = arith.addf %406, %407 : vector<8x128xf32>
    %409 = arith.negf %408 : vector<8x128xf32>
    %410 = math.exp %409 : vector<8x128xf32>
    %cst_139 = arith.constant 1.000000e+00 : f32
    %411 = vector.broadcast %cst_139 : f32 to vector<8x128xf32>
    %412 = arith.addf %411, %410 : vector<8x128xf32>
    %413 = arith.divf %411, %412 : vector<8x128xf32>
    %414 = vector.extract_strided_slice %403 {offsets = [0, 128], sizes = [8, 128], strides = [1, 1]} : vector<8x256xf32> to vector<8x128xf32>
    %415 = vector.extract_strided_slice %405 {offsets = [0, 128], sizes = [8, 128], strides = [1, 1]} : vector<8x384xf32> to vector<8x128xf32>
    %416 = arith.addf %414, %415 : vector<8x128xf32>
    %417 = arith.negf %416 : vector<8x128xf32>
    %418 = math.exp %417 : vector<8x128xf32>
    %cst_140 = arith.constant 1.000000e+00 : f32
    %419 = vector.broadcast %cst_140 : f32 to vector<8x128xf32>
    %420 = arith.addf %419, %418 : vector<8x128xf32>
    %421 = arith.divf %419, %420 : vector<8x128xf32>
    %422 = arith.mulf %413, %220 : vector<8x128xf32>
    %423 = arith.truncf %422 : vector<8x128xf32> to vector<8x128xbf16>
    %cst_141 = arith.constant dense<0.000000e+00> : vector<8x128xf32>
    %424 = tpu.matmul %423, %34, %cst_141 {dimension_numbers = #tpu.dot_dimension_numbers<[1], [0], [0], [1], [0, 0, 1, 1], [], []>} : vector<8x128xbf16>, vector<128x128xbf16>, vector<8x128xf32> -> vector<8x128xf32>
    %425 = vector.extract_strided_slice %405 {offsets = [0, 256], sizes = [8, 128], strides = [1, 1]} : vector<8x384xf32> to vector<8x128xf32>
    %426 = arith.addf %424, %425 : vector<8x128xf32>
    %427 = math.tanh %426 : vector<8x128xf32>
    %cst_142 = arith.constant 1.000000e+00 : f32
    %428 = vector.broadcast %cst_142 : f32 to vector<8x128xf32>
    %429 = arith.subf %428, %421 : vector<8x128xf32>
    %430 = arith.mulf %429, %220 : vector<8x128xf32>
    %431 = math.tanh %427 : vector<8x128xf32>
    %432 = arith.mulf %421, %431 : vector<8x128xf32>
    %433 = arith.addf %430, %432 : vector<8x128xf32>
    %434 = vector.extract_strided_slice %259 {offsets = [0, 128], sizes = [8, 256], strides = [1, 1]} : vector<8x384xf32> to vector<8x256xf32>
    %435 = arith.truncf %313 : vector<8x128xf32> to vector<8x128xbf16>
    %cst_143 = arith.constant dense<0.000000e+00> : vector<8x384xf32>
    %436 = tpu.matmul %435, %28, %cst_143 {dimension_numbers = #tpu.dot_dimension_numbers<[1], [0], [0], [1], [0, 0, 1, 1], [], []>} : vector<8x128xbf16>, vector<128x384xbf16>, vector<8x384xf32> -> vector<8x384xf32>
    %437 = vector.extract_strided_slice %434 {offsets = [0, 0], sizes = [8, 128], strides = [1, 1]} : vector<8x256xf32> to vector<8x128xf32>
    %438 = vector.extract_strided_slice %436 {offsets = [0, 0], sizes = [8, 128], strides = [1, 1]} : vector<8x384xf32> to vector<8x128xf32>
    %439 = arith.addf %437, %438 : vector<8x128xf32>
    %440 = arith.negf %439 : vector<8x128xf32>
    %441 = math.exp %440 : vector<8x128xf32>
    %cst_144 = arith.constant 1.000000e+00 : f32
    %442 = vector.broadcast %cst_144 : f32 to vector<8x128xf32>
    %443 = arith.addf %442, %441 : vector<8x128xf32>
    %444 = arith.divf %442, %443 : vector<8x128xf32>
    %445 = vector.extract_strided_slice %434 {offsets = [0, 128], sizes = [8, 128], strides = [1, 1]} : vector<8x256xf32> to vector<8x128xf32>
    %446 = vector.extract_strided_slice %436 {offsets = [0, 128], sizes = [8, 128], strides = [1, 1]} : vector<8x384xf32> to vector<8x128xf32>
    %447 = arith.addf %445, %446 : vector<8x128xf32>
    %448 = arith.negf %447 : vector<8x128xf32>
    %449 = math.exp %448 : vector<8x128xf32>
    %cst_145 = arith.constant 1.000000e+00 : f32
    %450 = vector.broadcast %cst_145 : f32 to vector<8x128xf32>
    %451 = arith.addf %450, %449 : vector<8x128xf32>
    %452 = arith.divf %450, %451 : vector<8x128xf32>
    %453 = arith.mulf %444, %251 : vector<8x128xf32>
    %454 = arith.truncf %453 : vector<8x128xf32> to vector<8x128xbf16>
    %cst_146 = arith.constant dense<0.000000e+00> : vector<8x128xf32>
    %455 = tpu.matmul %454, %36, %cst_146 {dimension_numbers = #tpu.dot_dimension_numbers<[1], [0], [0], [1], [0, 0, 1, 1], [], []>} : vector<8x128xbf16>, vector<128x128xbf16>, vector<8x128xf32> -> vector<8x128xf32>
    %456 = vector.extract_strided_slice %436 {offsets = [0, 256], sizes = [8, 128], strides = [1, 1]} : vector<8x384xf32> to vector<8x128xf32>
    %457 = arith.addf %455, %456 : vector<8x128xf32>
    %458 = math.tanh %457 : vector<8x128xf32>
    %cst_147 = arith.constant 1.000000e+00 : f32
    %459 = vector.broadcast %cst_147 : f32 to vector<8x128xf32>
    %460 = arith.subf %459, %452 : vector<8x128xf32>
    %461 = arith.mulf %460, %251 : vector<8x128xf32>
    %462 = math.tanh %458 : vector<8x128xf32>
    %463 = arith.mulf %452, %462 : vector<8x128xf32>
    %464 = arith.addf %461, %463 : vector<8x128xf32>
    %465 = vector.shape_cast %371 : vector<8x128xf32> to vector<1x8x128xf32>
    %c0_148 = arith.constant 0 : index
    %c0_149 = arith.constant 0 : index
    %c0_150 = arith.constant 0 : index
    %466 = vector.load %arg15[%c0_148, %c0_149, %c0_150] : memref<1x8x128xf32, #tpu.memory_space<vmem>>, vector<1x8x128xf32>
    tpu.vector_store %arg15[%c0_148, %c0_149, %c0_150], %465 {strides = array<i32>} : memref<1x8x128xf32, #tpu.memory_space<vmem>>, vector<1x8x128xf32>,
    %467 = vector.shape_cast %464 : vector<8x128xf32> to vector<1x8x128xf32>
    %c0_151 = arith.constant 0 : index
    %c0_152 = arith.constant 0 : index
    %c0_153 = arith.constant 0 : index
    %468 = vector.load %arg16[%c0_151, %c0_152, %c0_153] : memref<1x8x128xf32, #tpu.memory_space<vmem>>, vector<1x8x128xf32>
    tpu.vector_store %arg16[%c0_151, %c0_152, %c0_153], %467 {strides = array<i32>} : memref<1x8x128xf32, #tpu.memory_space<vmem>>, vector<1x8x128xf32>,
    %469 = vector.shape_cast %402 : vector<8x128xf32> to vector<1x8x128xf32>
    %c0_154 = arith.constant 0 : index
    %c0_155 = arith.constant 0 : index
    %c0_156 = arith.constant 0 : index
    %470 = vector.load %arg17[%c0_154, %c0_155, %c0_156] : memref<1x8x128xf32, #tpu.memory_space<vmem>>, vector<1x8x128xf32>
    tpu.vector_store %arg17[%c0_154, %c0_155, %c0_156], %469 {strides = array<i32>} : memref<1x8x128xf32, #tpu.memory_space<vmem>>, vector<1x8x128xf32>,
    %471 = vector.shape_cast %433 : vector<8x128xf32> to vector<1x8x128xf32>
    %c0_157 = arith.constant 0 : index
    %c0_158 = arith.constant 0 : index
    %c0_159 = arith.constant 0 : index
    %472 = vector.load %arg18[%c0_157, %c0_158, %c0_159] : memref<1x8x128xf32, #tpu.memory_space<vmem>>, vector<1x8x128xf32>
    tpu.vector_store %arg18[%c0_157, %c0_158, %c0_159], %471 {strides = array<i32>} : memref<1x8x128xf32, #tpu.memory_space<vmem>>, vector<1x8x128xf32>,
    return
  }
  func.func @transform_0(%arg0: i32) -> (i32, i32, i32) {
    %c0_i32 = arith.constant 0 : i32
    %c0_i32_0 = arith.constant 0 : i32
    %c0_i32_1 = arith.constant 0 : i32
    return %arg0, %c0_i32, %c0_i32_0 : i32, i32, i32
  }
  func.func @transform_1(%arg0: i32) -> (i32, i32, i32) {
    %c0_i32 = arith.constant 0 : i32
    %c0_i32_0 = arith.constant 0 : i32
    %c0_i32_1 = arith.constant 0 : i32
    return %arg0, %c0_i32, %c0_i32_0 : i32, i32, i32
  }
  func.func @transform_2(%arg0: i32) -> (i32, i32, i32) {
    %c0_i32 = arith.constant 0 : i32
    %c0_i32_0 = arith.constant 0 : i32
    %c0_i32_1 = arith.constant 0 : i32
    return %arg0, %c0_i32, %c0_i32_0 : i32, i32, i32
  }
  func.func @transform_3(%arg0: i32) -> (i32, i32, i32) {
    %c0_i32 = arith.constant 0 : i32
    %c0_i32_0 = arith.constant 0 : i32
    %c0_i32_1 = arith.constant 0 : i32
    return %arg0, %c0_i32, %c0_i32_0 : i32, i32, i32
  }
  func.func @transform_4(%arg0: i32) -> (i32, i32, i32) {
    %c0_i32 = arith.constant 0 : i32
    %c0_i32_0 = arith.constant 0 : i32
    %c0_i32_1 = arith.constant 0 : i32
    return %arg0, %c0_i32, %c0_i32_0 : i32, i32, i32
  }
  func.func @transform_5(%arg0: i32) -> (i32, i32, i32) {
    %c0_i32 = arith.constant 0 : i32
    %c0_i32_0 = arith.constant 0 : i32
    %c0_i32_1 = arith.constant 0 : i32
    return %arg0, %c0_i32, %c0_i32_0 : i32, i32, i32
  }
  func.func @transform_6(%arg0: i32) -> (i32, i32, i32) {
    %c0_i32 = arith.constant 0 : i32
    %c0_i32_0 = arith.constant 0 : i32
    %c0_i32_1 = arith.constant 0 : i32
    return %arg0, %c0_i32, %c0_i32_0 : i32, i32, i32
  }
  func.func @transform_7(%arg0: i32) -> (i32, i32, i32) {
    %c0_i32 = arith.constant 0 : i32
    %c0_i32_0 = arith.constant 0 : i32
    %c0_i32_1 = arith.constant 0 : i32
    return %arg0, %c0_i32, %c0_i32_0 : i32, i32, i32
  }
  func.func @transform_8(%arg0: i32) -> (i32, i32, i32) {
    %c0_i32 = arith.constant 0 : i32
    %c0_i32_0 = arith.constant 0 : i32
    %c0_i32_1 = arith.constant 0 : i32
    return %arg0, %c0_i32, %c0_i32_0 : i32, i32, i32
  }
  func.func @transform_9(%arg0: i32) -> (i32, i32, i32) {
    %c0_i32 = arith.constant 0 : i32
    %c0_i32_0 = arith.constant 0 : i32
    %c0_i32_1 = arith.constant 0 : i32
    return %arg0, %c0_i32, %c0_i32_0 : i32, i32, i32
  }
  func.func @transform_10(%arg0: i32) -> (i32, i32) {
    %c0_i32 = arith.constant 0 : i32
    %c0_i32_0 = arith.constant 0 : i32
    %c0_i32_1 = arith.constant 0 : i32
    return %c0_i32, %c0_i32_0 : i32, i32
  }
  func.func @transform_11(%arg0: i32) -> (i32, i32, i32) {
    %c0_i32 = arith.constant 0 : i32
    %c0_i32_0 = arith.constant 0 : i32
    %c0_i32_1 = arith.constant 0 : i32
    %c0_i32_2 = arith.constant 0 : i32
    return %c0_i32, %c0_i32_0, %c0_i32_1 : i32, i32, i32
  }
  func.func @transform_12(%arg0: i32) -> (i32, i32, i32) {
    %c0_i32 = arith.constant 0 : i32
    %c0_i32_0 = arith.constant 0 : i32
    %c0_i32_1 = arith.constant 0 : i32
    %c0_i32_2 = arith.constant 0 : i32
    return %c0_i32, %c0_i32_0, %c0_i32_1 : i32, i32, i32
  }
  func.func @transform_13(%arg0: i32) -> (i32, i32, i32) {
    %c0_i32 = arith.constant 0 : i32
    %c0_i32_0 = arith.constant 0 : i32
    %c0_i32_1 = arith.constant 0 : i32
    %c0_i32_2 = arith.constant 0 : i32
    return %c0_i32, %c0_i32_0, %c0_i32_1 : i32, i32, i32
  }
  func.func @transform_14(%arg0: i32) -> (i32, i32, i32) {
    %c0_i32 = arith.constant 0 : i32
    %c0_i32_0 = arith.constant 0 : i32
    %c0_i32_1 = arith.constant 0 : i32
    return %arg0, %c0_i32, %c0_i32_0 : i32, i32, i32
  }
  func.func @transform_15(%arg0: i32) -> (i32, i32, i32) {
    %c0_i32 = arith.constant 0 : i32
    %c0_i32_0 = arith.constant 0 : i32
    %c0_i32_1 = arith.constant 0 : i32
    return %arg0, %c0_i32, %c0_i32_0 : i32, i32, i32
  }
  func.func @transform_16(%arg0: i32) -> (i32, i32, i32) {
    %c0_i32 = arith.constant 0 : i32
    %c0_i32_0 = arith.constant 0 : i32
    %c0_i32_1 = arith.constant 0 : i32
    return %arg0, %c0_i32, %c0_i32_0 : i32, i32, i32
  }
  func.func @transform_17(%arg0: i32) -> (i32, i32, i32) {
    %c0_i32 = arith.constant 0 : i32
    %c0_i32_0 = arith.constant 0 : i32
    %c0_i32_1 = arith.constant 0 : i32
    return %arg0, %c0_i32, %c0_i32_0 : i32, i32, i32
  }
}

</mosaic_0001>

<bundles_post_ra>
// kernel: tpu_custom_call.1
= control target key start
LH: loop header
LB: loop body
LE: loop exit
PB: predicated region body
PF: predicated region fallthrough
CT: control target
= control target key end

     0   :  { %s9369_s0 = inlined_call_operand.hbm [shape: bf16[2,8,8], index: 0, kind: input, shape index: {}]   ;;  %s9370_s1 = inlined_call_operand.hbm [shape: bf16[2,8,8], index: 1, kind: input, shape index: {}]   ;;  %s9371_s2 = inlined_call_operand.hbm [shape: bf16[2,8,8], index: 2, kind: input, shape index: {}]   ;;  %s9372_s3 = inlined_call_operand.hbm [shape: bf16[2,8,8], index: 3, kind: input, shape index: {}]   ;;  %s9373_s4 = inlined_call_operand.hbm [shape: bf16[2,8,8], index: 4, kind: input, shape index: {}]   ;;  %s9374_s5 = inlined_call_operand.hbm [shape: bf16[2,8,8], index: 5, kind: input, shape index: {}]   ;;  %s9375_s6 = inlined_call_operand.vmem [shape: f32[2,8,128], index: 6, kind: input, shape index: {}]   ;;  %s9376_s7 = inlined_call_operand.hbm [shape: f32[2,8,128], index: 7, kind: input, shape index: {}]   ;;  %s9377_s8 = inlined_call_operand.hbm [shape: f32[2,8,128], index: 8, kind: input, shape index: {}]   ;;  %s9378_s9 = inlined_call_operand.vmem [shape: f32[2,8,128], index: 9, kind: input, shape index: {}]   ;;  %s9379_s10 = inlined_call_operand.hbm [shape: bf16[128,512], index: 10, kind: input, shape index: {}]   ;;  %s9380_s11 = inlined_call_operand.hbm [shape: bf16[3,128,384], index: 11, kind: input, shape index: {}]   ;;  %s9381_s12 = inlined_call_operand.hbm [shape: bf16[4,128,384], index: 12, kind: input, shape index: {}]   ;;  %s9382_s13 = inlined_call_operand.hbm [shape: bf16[5,128,128], index: 13, kind: input, shape index: {}]   ;;  %s9383_s14 = inlined_call_operand.hbm [shape: f32[2,8,128], index: 14, kind: output, shape index: {0}]   ;;  %s9384_s15 = inlined_call_operand.hbm [shape: f32[2,8,128], index: 15, kind: output, shape index: {1}]   ;;  %s9385_s16 = inlined_call_operand.hbm [shape: f32[2,8,128], index: 16, kind: output, shape index: {2}]   ;;  %s9386_s17 = inlined_call_operand.hbm [shape: f32[2,8,128], index: 17, kind: output, shape index: {3}]  }
   0x1   :  { %9422 = sst [smem:[#allocation47_spill]] %s9369_s0 }
   0x2   :  { %9423 = sst [smem:[#allocation48_spill]] %s9370_s1 }
   0x3   :  { %9424 = sst [smem:[#allocation49_spill]] %s9372_s3 }
   0x4   :  { %9425 = sst [smem:[#allocation50_spill]] %s9374_s5 }
   0x5   :  { %9426 = sst [smem:[#allocation51_spill]] %s9375_s6 }
   0x6   :  { %9427 = sst [smem:[#allocation52_spill]] %s9378_s9 }
   0x7   :  { %9428 = sst [smem:[#allocation53_spill]] %s9379_s10 }
   0x8   :  { %9429 = sst [smem:[#allocation54_spill]] %s9380_s11 }
   0x9   :  { %9430 = sst [smem:[#allocation55_spill]] %s9383_s14 }
   0xa   :  { %9431 = sst [smem:[#allocation56_spill]] %s9384_s15 }
   0xb   :  { %9432 = sst [smem:[#allocation57_spill]] %s9385_s16 }
   0xc   :  { %9433 = sst [smem:[#allocation58_spill]] %s9386_s17 }
   0xd   :  { %23 = vsyncpa [#allocation3], 0 }
   0xe   :  { %25 = vsyncpa [#allocation3 + $0x1], 0 }
   0xf   :  { %26 = vsyncpa [#allocation6], 0 }
  0x10   :  { %28 = vsyncpa [#allocation6 + $0x1], 0 }
  0x11   :  { %29 = vsyncpa [#allocation9], 0 }
  0x12   :  { %31 = vsyncpa [#allocation9 + $0x1], 0 }
  0x13   :  { %32 = vsyncpa [#allocation12], 0 }
  0x14   :  { %34 = vsyncpa [#allocation12 + $0x1], 0 }
  0x15   :  { %35 = vsyncpa [#allocation15], 0 }
  0x16   :  { %37 = vsyncpa [#allocation15 + $0x1], 0 }
  0x17   :  { %38 = vsyncpa [#allocation18], 0 }
  0x18   :  { %39 = vsyncpa [#allocation21], 0 }
  0x19   :  { %40 = vsyncpa [#allocation4], 0 }
  0x1a   :  { %42 = vsyncpa [#allocation4 + $0x1], 0 }
  0x1b   :  { %43 = vsyncpa [#allocation24], 0 }
  0x1c   :  { %45 = vsyncpa [#allocation24 + $0x1], 0 }
  0x1d   :  { %46 = vsyncpa [#allocation27], 0 }
  0x1e   :  { %48 = vsyncpa [#allocation27 + $0x1], 0  ;;  %s8188_s24 = smov 0   ;;  %s8190_s25 = smov 0  }
  0x1f   :  { %s8192_s26 = smov 0   ;;  %s8194_s27 = smov 0  }
  0x20 LB: > { %9434 = sst [smem:[#allocation39_spill]] %s8059_s24  ;;  %s8209_s28 = sadd.s32 4294967295, %s8071_s27   ;;  %s8071_s27 = sphi %s8194_s27, %s9496_s27   ;;  %s8067_s26 = sphi %s8192_s26, %s9498_s26   ;;  %s8063_s25 = sphi %s8190_s25, %s9500_s25   ;;  %s8059_s24 = sphi %s8188_s24, %s9499_s24  }
  0x21   : > { %9435 = sst [smem:[#allocation40_spill]] %s8067_s26  ;;  %s9389_s29 = sadd.s32 4294967294, %s8071_s27  }
  0x22   : > { %9436 = sst [smem:[#allocation41_spill]] %s8209_s28  ;;  %p74_p0 = scmp.ne.s32.totalorder %s8063_s25, %s8059_s24 }
  0x23   : > { %p9394_p1 = scmp.eq.s32.totalorder %s8209_s28, 0  ;;  %p422_p3 = scmp.eq.s32.totalorder %s9389_s29, 1 }
  0x24   : > { %p5560_p5 = scmp.ge.s32.totalorder %s8071_s27, 1  ;;  %p507_p7 = scmp.lt.s32.totalorder %s8071_s27, 3 }
  0x25   : > { %p8220_p4 = por %p9394_p1, %p74_p0  ;;  %p8225_p6 = por %p422_p3, %p74_p0 }
  0x26   : > { %p8230_p8 = pnand %p5560_p5, %p507_p7  ;;  %s8073_s19 = smov [#allocation16]  }
  0x27   : > { %s9437_s0 = scalar_select %p8220_p4, 1, 0 }
  0x28   : > { %s9439_s30 = scalar_select %p8225_p6, 1, 0 }
  0x29   : > { %9438 = sst [smem:[#allocation42_spill]] %s9437_s0  ;;  %s519_s1 = sshll.u32 %s8073_s19, 4  ;;  %s8234_s1 = int_to_ptr.vmem [resolvable:$true] %s519_s1 }
  0x2a   : > { %9440 = sst [smem:[#allocation43_spill]] %s9439_s30  ;;  %p6753_p9 = pneg %p8230_p8 }
  0x2b   : > { %s9441_s18 = scalar_select %p8230_p8, 1, 0 }
  0x2c   : > { %p8241_p11 = pnand %p6753_p9, %p9394_p1  ;;  %s8074_s21 = smov [#allocation17]  }
  0x2d   : > { %s532_s22 = sshll.u32 %s8074_s21, 4  ;;  %s9443_s10 = sld [smem:[#allocation53_spill]]  ;;  %s8245_s22 = int_to_ptr.vmem [resolvable:$true] %s532_s22 }
  0x2e   : > { %s9442_s20 = scalar_select %p8241_p11, 1, 0 }
  0x2f   : > { %p8255_p13 = pneg %p8241_p11 }
  0x31   : > { %s9444_s16 = scalar_select %p8255_p13, 1, 0 }
  0x33   : > { %s7533_s30 = scalar_lea.hbm %s9443_s10, 4096 }
  0x34   : > { %p7534_p12 = scmp.ne.s32.totalorder %s9443_s10, %s7533_s30  ;;  %p7540_p5 = scmp.lt.u32.totalorder %s7533_s30, %s9443_s10 }
  0x36   : > { %p7536_p0 = pnand %p8255_p13, %p7534_p12 }
  0x38   : > { %p7537_p3 = pneg %p7536_p0 }
  0x3a   : > { %p7542_p7 = pnand %p7540_p5, %p7537_p3 }
  0x3c   : > { %7545 = shalt.err (!%p7542_p7)
}
  0x3d   : > { %s7546_s24 = scalar_lea.vmem %s8234_s1, 4096  ;;  %p7554_p2 = scmp.lt.s32.totalorder %s8234_s1, %s8234_s1 }
  0x3e   : > { %p7547_p9 = scmp.ne.s32.totalorder %s8234_s1, %s7546_s24  ;;  %p7555_p6 = scmp.lt.s32.totalorder %s7546_s24, %s7546_s24 }
  0x40   : > { %p7549_p10 = pnand %p7547_p9, %p8255_p13  ;;  %p7556_p12 = por %p7555_p6, %p7554_p2 }
  0x42   : > { %p7550_p1 = pneg %p7549_p10 }
  0x44   : > { %p7557_p0 = pnand %p7556_p12, %p7550_p1 }
  0x46   : > { %7560 = shalt.err (!%p7557_p0)
}
  0x47   : > { %s8075_s29 = smov 256   ;;  %s8076_s15 = smov 16  }
  0x48   : > { %6756 = dma.hbm_to_vmem [thread:$0]  (!%p8241_p11), %s9443_s10, 4096, %s8234_s1, [#allocation15], %s8075_s29, %s8075_s29, %s8076_s15  }
  0x49   : > { %s9445_s11 = sld [smem:[#allocation54_spill]] }
  0x4f   : > { %s7561_s17 = scalar_lea.hbm %s9445_s11, 9216 }
  0x50   : > { %p7562_p2 = scmp.ne.s32.totalorder %s9445_s11, %s7561_s17  ;;  %p7568_p10 = scmp.lt.u32.totalorder %s7561_s17, %s9445_s11 }
  0x52   : > { %p7564_p1 = pnand %p7562_p2, %p8255_p13 }
  0x54   : > { %p7565_p6 = pneg %p7564_p1 }
  0x56   : > { %p7570_p3 = pnand %p7568_p10, %p7565_p6 }
  0x58   : > { %7573 = shalt.err (!%p7570_p3)
}
  0x59   : > { %s7574_s1 = scalar_lea.vmem %s8245_s22, 9216  ;;  %p7582_p12 = scmp.lt.s32.totalorder %s8245_s22, %s8245_s22 }
  0x5a   : > { %p7575_p5 = scmp.ne.s32.totalorder %s8245_s22, %s7574_s1  ;;  %p7583_p0 = scmp.lt.s32.totalorder %s7574_s1, %s7574_s1 }
  0x5c   : > { %p7577_p7 = pnand %p7575_p5, %p8255_p13  ;;  %p7584_p2 = por %p7583_p0, %p7582_p12 }
  0x5e   : > { %p7578_p9 = pneg %p7577_p7 }
  0x60   : > { %p7585_p1 = pnand %p7584_p2, %p7578_p9 }
  0x62   : > { %7588 = shalt.err (!%p7585_p1)
}
  0x63   : > { %s9397_s9 = smov 192   ;;  %s9398_s6 = smov 12  }
  0x64   : > { %6759 = dma.hbm_to_vmem [thread:$0]  (!%p8241_p11), %s9445_s11, 9216, %s8245_s22, [#allocation18], %s9397_s9, %s9397_s9, %s9398_s6  }
  0x65   : > { %s8303_s29 = sadd.s32 1, %s8071_s27   ;;  %s61_s30 = sadd.s32 1, %s8067_s26 }
  0x66   : > { %9446 = sst [smem:[#allocation44_spill]] %s8303_s29  ;;  %s58_s15 = ssub.s32 %s8071_s27, %s8303_s29 }
  0x67   : > { %p59_p6 = scmp.eq.s32.totalorder %s58_s15, 0  ;;  %p68_p10 = scmp.ne.s32.totalorder %s8067_s26, %s8063_s25 }
  0x68   : > { %p69_p3 = scmp.eq.s32.totalorder %s8071_s27, 0  ;;  %p9448_p7 = scmp.eq.s32.totalorder %s8209_s28, 1 }
  0x69   : > { %s8312_s23 = scalar_select %p59_p6, %s8067_s26, %s61_s30  }
  0x6a   : > { %p70_p5 = por %p69_p3, %p68_p10  ;;  %p8316_p9 = por %p9448_p7, %p68_p10 }
  0x6b   : > { %9447 = sst [smem:[#allocation45_spill]] %s8312_s23  ;;  %p6808_p12 = scmp.lt.s32.totalorder %s8071_s27, 2 }
  0x6c   : > { %s9449_s19 = scalar_select %p8316_p9, 1, 0 }
  0x6d   : > { %s8322_s21 = sand.u32 1, %s8067_s26   ;;  %s8328_s24 = sshll.u32 %s8071_s27, 6 }
  0x6e   : > { %9450 = sst [smem:[#allocation46_spill]] %s9449_s19  ;;  %s8325_s22 = sshll.u32 %s8322_s21, 2 }
  0x6f   : > { %p8330_p0 = pnand %p6808_p12, %p70_p5  ;;  %s8335_s14 = sand.u32 1, %s8071_s27  }
  0x70   : > { %s9452_s30 = sld [smem:[#allocation48_spill]]  ;;  %s594_s6 = scalar_lea.vmem [#allocation5], %s8325_s22 }
  0x71   : > { %s9451_s1 = scalar_select %p8330_p0, 1, 0 }
  0x72   : > { %s601_s10 = sshll.u32 %s594_s6, 4  ;;  %p8351_p1 = pneg %p8330_p0  ;;  %s8344_s10 = int_to_ptr.vmem [resolvable:$true] %s601_s10 }
  0x74   : > { %s9453_s26 = scalar_select %p8351_p1, 1, 0 }
  0x76   : > { %s8341_s9 = scalar_lea.hbm %s9452_s30, %s8328_s24  ;;  %s7594_s29 = scalar_lea.hbm %s9452_s30, 128 }
  0x77   : > { %s7589_s23 = scalar_lea.hbm %s8341_s9, 64  ;;  %p7595_p3 = scmp.lt.u32.totalorder %s8341_s9, %s9452_s30 }
  0x78   : > { %p7590_p2 = scmp.ne.s32.totalorder %s8341_s9, %s7589_s23  ;;  %p7596_p5 = scmp.lt.u32.totalorder %s7594_s29, %s7589_s23 }
  0x79   : > { %p7598_p12 = scmp.lt.u32.totalorder %s7589_s23, %s8341_s9 }
  0x7a   : > { %p7592_p6 = pnand %p8351_p1, %p7590_p2  ;;  %p7597_p7 = por %p7596_p5, %p7595_p3 }
  0x7c   : > { %p7593_p10 = pneg %p7592_p6  ;;  %p7599_p9 = por %p7598_p12, %p7597_p7 }
  0x7e   : > { %p7600_p4 = pnand %p7599_p9, %p7593_p10 }
  0x80   : > { %7603 = shalt.err (!%p7600_p4)
}
  0x81   : > { %s7604_s11 = scalar_lea.vmem %s8344_s10, 64  ;;  %s8079_s17 = smov [#allocation5]  }
  0x82   : > { %p7605_p2 = scmp.ne.s32.totalorder %s8344_s10, %s7604_s11  ;;  %s7609_s15 = sshll.u32 %s8079_s17, 4  ;;  %s7610_s15 = int_to_ptr.vmem [resolvable:$false] %s7609_s15 }
  0x83   : > { %s7611_s19 = scalar_lea.vmem %s7610_s15, 128  ;;  %p7612_p11 = scmp.lt.s32.totalorder %s8344_s10, %s7610_s15 }
  0x84   : > { %p7607_p6 = pnand %p7605_p2, %p8351_p1  ;;  %p7613_p13 = scmp.lt.s32.totalorder %s7611_s19, %s7604_s11 }
  0x86   : > { %p7608_p8 = pneg %p7607_p6  ;;  %p7614_p3 = por %p7613_p13, %p7612_p11 }
  0x88   : > { %p7615_p5 = pnand %p7614_p3, %p7608_p8 }
  0x8a   : > { %7618 = shalt.err (!%p7615_p5)
}
  0x8b   : > { %s9454_s29 = scalar_lea.sflag [#allocation6], %s8335_s14  ;;  %s9455_s3 = sld [smem:[#allocation49_spill]] }
  0x8c   : > { %6772 = dma.hbm_to_vmem [thread:$0]  (!%p8330_p0), %s8341_s9, 64, %s8344_s10, %s9454_s29  }
  0x8d   : > { %s630_s11 = scalar_lea.vmem [#allocation8], %s8325_s22 }
  0x8e   : > { %s637_s15 = sshll.u32 %s630_s11, 4  ;;  %s638_s15 = int_to_ptr.vmem [resolvable:$true] %s637_s15 }
  0x91   : > { %s8380_s17 = scalar_lea.hbm %s9455_s3, %s8328_s24  ;;  %s7624_s9 = scalar_lea.hbm %s9455_s3, 128 }
  0x92   : > { %s7619_s30 = scalar_lea.hbm %s8380_s17, 64  ;;  %p7625_p13 = scmp.lt.u32.totalorder %s8380_s17, %s9455_s3 }
  0x93   : > { %p7620_p4 = scmp.ne.s32.totalorder %s8380_s17, %s7619_s30  ;;  %p7626_p9 = scmp.lt.u32.totalorder %s7624_s9, %s7619_s30 }
  0x94   : > { %p7628_p7 = scmp.lt.u32.totalorder %s7619_s30, %s8380_s17 }
  0x95   : > { %p7622_p8 = pnand %p7620_p4, %p8351_p1  ;;  %p7627_p10 = por %p7626_p9, %p7625_p13 }
  0x97   : > { %p7623_p11 = pneg %p7622_p8  ;;  %p7629_p12 = por %p7628_p7, %p7627_p10 }
  0x99   : > { %p7630_p2 = pnand %p7629_p12, %p7623_p11 }
  0x9b   : > { %7633 = shalt.err (!%p7630_p2)
}
  0x9c   : > { %s7634_s6 = scalar_lea.vmem %s638_s15, 64  ;;  %s8080_s11 = smov [#allocation8]  }
  0x9d   : > { %p7635_p6 = scmp.ne.s32.totalorder %s638_s15, %s7634_s6  ;;  %s7639_s19 = sshll.u32 %s8080_s11, 4  ;;  %s7640_s19 = int_to_ptr.vmem [resolvable:$false] %s7639_s19 }
  0x9e   : > { %s7641_s28 = scalar_lea.vmem %s7640_s19, 128  ;;  %p7642_p4 = scmp.lt.s32.totalorder %s638_s15, %s7640_s19 }
  0x9f   : > { %p7637_p3 = pnand %p7635_p6, %p8351_p1  ;;  %p7643_p8 = scmp.lt.s32.totalorder %s7641_s28, %s7634_s6 }
  0xa1   : > { %p7638_p5 = pneg %p7637_p3  ;;  %p7644_p0 = por %p7643_p8, %p7642_p4 }
  0xa3   : > { %p7645_p9 = pnand %p7644_p0, %p7638_p5 }
  0xa5   : > { %7648 = shalt.err (!%p7645_p9)
}
  0xa6   : > { %p9456_p13 = scmp.ne.s32.totalorder %s9451_s1, 0  ;;  %s9457_s30 = scalar_lea.sflag [#allocation9], %s8335_s14 }
  0xa7   : > { %s9458_s5 = sld [smem:[#allocation50_spill]]  ;;  %s666_s19 = scalar_lea.vmem [#allocation11], %s8325_s22 }
  0xa8   : > { %6778 = dma.hbm_to_vmem [thread:$0]  (!%p9456_p13), %s8380_s17, 64, %s638_s15, %s9457_s30  }
  0xa9   : > { %s673_s23 = sshll.u32 %s666_s19, 4  ;;  %s8081_s6 = smov [#allocation19]   ;;  %s8410_s23 = int_to_ptr.vmem [resolvable:$true] %s673_s23 }
  0xaa   : > { %s8412_s11 = sshll.u32 %s8081_s6, 4  ;;  %s9417_s28 = scalar_lea.sflag [#allocation12], %s8335_s14  ;;  %s546_s11 = int_to_ptr.vmem [resolvable:$true] %s8412_s11 }
  0xad   : > { %s8407_s29 = scalar_lea.hbm %s9458_s5, %s8328_s24  ;;  %s7654_s30 = scalar_lea.hbm %s9458_s5, 128 }
  0xae   : > { %s7649_s3 = scalar_lea.hbm %s8407_s29, 64  ;;  %p7655_p7 = scmp.lt.u32.totalorder %s8407_s29, %s9458_s5 }
  0xaf   : > { %p7650_p0 = scmp.ne.s32.totalorder %s8407_s29, %s7649_s3  ;;  %p7656_p12 = scmp.lt.u32.totalorder %s7654_s30, %s7649_s3 }
  0xb0   : > { %p7658_p6 = scmp.lt.u32.totalorder %s7649_s3, %s8407_s29 }
  0xb1   : > { %p7652_p11 = pnand %p7650_p0, %p8351_p1  ;;  %p7657_p2 = por %p7656_p12, %p7655_p7 }
  0xb3   : > { %p7653_p10 = pneg %p7652_p11  ;;  %p7659_p3 = por %p7658_p6, %p7657_p2 }
  0xb5   : > { %p7660_p5 = pnand %p7659_p3, %p7653_p10 }
  0xb7   : > { %7663 = shalt.err (!%p7660_p5)
}
  0xb8   : > { %s7664_s19 = scalar_lea.vmem %s8410_s23, 64  ;;  %s8082_s6 = smov [#allocation11]  }
  0xb9   : > { %p7665_p4 = scmp.ne.s32.totalorder %s8410_s23, %s7664_s19  ;;  %s7669_s17 = sshll.u32 %s8082_s6, 4  ;;  %s7670_s17 = int_to_ptr.vmem [resolvable:$false] %s7669_s17 }
  0xba   : > { %s7671_s15 = scalar_lea.vmem %s7670_s17, 128  ;;  %p7672_p0 = scmp.lt.s32.totalorder %s8410_s23, %s7670_s17 }
  0xbb   : > { %p7667_p8 = pnand %p7665_p4, %p8351_p1  ;;  %p7673_p11 = scmp.lt.s32.totalorder %s7671_s15, %s7664_s19 }
  0xbd   : > { %p7668_p9 = pneg %p7667_p8  ;;  %p7674_p7 = por %p7673_p11, %p7672_p0 }
  0xbf   : > { %p7675_p12 = pnand %p7674_p7, %p7668_p9 }
  0xc1   : > { %7678 = shalt.err (!%p7675_p12)
}
  0xc2   : > { %6784 = dma.hbm_to_vmem [thread:$0]  (!%p9456_p13), %s8407_s29, 64, %s8410_s23, %s9417_s28  }
  0xc3   : > { %s7679_s10 = scalar_lea.hbm %s9381_s12, 12288  ;;  %p9459_p2 = scmp.ne.s32.totalorder %s9444_s16, 0 }
  0xc4   : > { %p7680_p10 = scmp.ne.s32.totalorder %s9381_s12, %s7679_s10  ;;  %p7686_p5 = scmp.lt.u32.totalorder %s7679_s10, %s9381_s12 }
  0xc6   : > { %p7682_p6 = pnand %p7680_p10, %p9459_p2 }
  0xc8   : > { %p7683_p3 = pneg %p7682_p6 }
  0xca   : > { %p7688_p4 = pnand %p7686_p5, %p7683_p3 }
  0xcc   : > { %7691 = shalt.err (!%p7688_p4)
}
  0xcd   : > { %s7692_s15 = scalar_lea.vmem %s546_s11, 12288  ;;  %p7700_p11 = scmp.lt.s32.totalorder %s546_s11, %s546_s11 }
  0xce   : > { %p7693_p8 = scmp.ne.s32.totalorder %s546_s11, %s7692_s15  ;;  %p7701_p7 = scmp.lt.s32.totalorder %s7692_s15, %s7692_s15 }
  0xd0   : > { %p7695_p9 = pnand %p7693_p8, %p9459_p2  ;;  %p7702_p12 = por %p7701_p7, %p7700_p11 }
  0xd2   : > { %p7696_p0 = pneg %p7695_p9 }
  0xd4   : > { %p7703_p13 = pnand %p7702_p12, %p7696_p0 }
  0xd6   : > { %7706 = shalt.err (!%p7703_p13)
}
  0xd7   : > { %p9460_p10 = scmp.ne.s32.totalorder %s9442_s20, 0  ;;  %s9461_s29 = smov 12  }
  0xd8   : > { %s9462_s23 = smov 192   ;;  %s8083_s10 = smov [#allocation20]  }
  0xd9   : > { %6762 = dma.hbm_to_vmem [thread:$0]  (!%p9460_p10), %s9381_s12, 12288, %s546_s11, [#allocation18], %s9462_s23, %s9462_s23, %s9461_s29  }
  0xda   : > { %s558_s9 = sshll.u32 %s8083_s10, 4  ;;  %s7707_s17 = scalar_lea.hbm %s9382_s13, 5120  ;;  %s559_s9 = int_to_ptr.vmem [resolvable:$true] %s558_s9 }
  0xdb   : > { %p7708_p13 = scmp.ne.s32.totalorder %s9382_s13, %s7707_s17  ;;  %p7714_p5 = scmp.lt.u32.totalorder %s7707_s17, %s9382_s13 }
  0xdd   : > { %p7710_p6 = pnand %p7708_p13, %p9459_p2 }
  0xdf   : > { %p7711_p3 = pneg %p7710_p6 }
  0xe1   : > { %p7716_p4 = pnand %p7714_p5, %p7711_p3 }
  0xe3   : > { %7719 = shalt.err (!%p7716_p4)
}
  0xe4   : > { %s7720_s11 = scalar_lea.vmem %s559_s9, 5120  ;;  %p7728_p11 = scmp.lt.s32.totalorder %s559_s9, %s559_s9 }
  0xe5   : > { %p7721_p8 = scmp.ne.s32.totalorder %s559_s9, %s7720_s11  ;;  %p7729_p7 = scmp.lt.s32.totalorder %s7720_s11, %s7720_s11 }
  0xe7   : > { %p7723_p9 = pnand %p7721_p8, %p9459_p2  ;;  %p7730_p12 = por %p7729_p7, %p7728_p11 }
  0xe9   : > { %p7724_p0 = pneg %p7723_p9 }
  0xeb   : > { %p7731_p1 = pnand %p7730_p12, %p7724_p0 }
  0xed   : > { %7734 = shalt.err (!%p7731_p1)
}
  0xee   : > { %s8084_s28 = smov 64   ;;  %s8085_s5 = smov 4  }
  0xef   : > { %6765 = dma.hbm_to_vmem [thread:$0]  (!%p9460_p10), %s9382_s13, 5120, %s559_s9, [#allocation21], %s8084_s28, %s8084_s28, %s8085_s5  }
  0xf0   : > { %s9463_s3 = sld [smem:[#allocation47_spill]]  ;;  %s576_s10 = scalar_lea.vmem [#allocation2], %s8325_s22 }
  0xf1   : > { %s583_s6 = sshll.u32 %s576_s10, 4  ;;  %s573_s19 = scalar_lea.sflag [#allocation3], %s8322_s21  ;;  %s584_s6 = int_to_ptr.vmem [resolvable:$true] %s583_s6 }
  0xf2   : > { %p9464_p2 = scmp.ne.s32.totalorder %s9453_s26, 0 }
  0xf6   : > { %s8482_s30 = scalar_lea.hbm %s9463_s3, %s8328_s24  ;;  %s7740_s15 = scalar_lea.hbm %s9463_s3, 128 }
  0xf7   : > { %s7735_s17 = scalar_lea.hbm %s8482_s30, 64  ;;  %p7741_p10 = scmp.lt.u32.totalorder %s8482_s30, %s9463_s3 }
  0xf8   : > { %p7736_p1 = scmp.ne.s32.totalorder %s8482_s30, %s7735_s17  ;;  %p7742_p3 = scmp.lt.u32.totalorder %s7740_s15, %s7735_s17 }
  0xf9   : > { %p7744_p4 = scmp.lt.u32.totalorder %s7735_s17, %s8482_s30 }
  0xfa   : > { %p7738_p13 = pnand %p7736_p1, %p9464_p2  ;;  %p7743_p5 = por %p7742_p3, %p7741_p10 }
  0xfc   : > { %p7739_p6 = pneg %p7738_p13  ;;  %p7745_p8 = por %p7744_p4, %p7743_p5 }
  0xfe   : > { %p7746_p9 = pnand %p7745_p8, %p7739_p6 }
 0x100   : > { %7749 = shalt.err (!%p7746_p9)
}
 0x101   : > { %s7750_s5 = scalar_lea.vmem %s584_s6, 64  ;;  %s8086_s0 = smov [#allocation2]  }
 0x102   : > { %p7751_p0 = scmp.ne.s32.totalorder %s584_s6, %s7750_s5  ;;  %s7755_s29 = sshll.u32 %s8086_s0, 4  ;;  %s7756_s29 = int_to_ptr.vmem [resolvable:$false] %s7755_s29 }
 0x103   : > { %s7757_s16 = scalar_lea.vmem %s7756_s29, 128  ;;  %p7758_p12 = scmp.lt.s32.totalorder %s584_s6, %s7756_s29 }
 0x104   : > { %p7753_p11 = pnand %p7751_p0, %p9464_p2  ;;  %p7759_p1 = scmp.lt.s32.totalorder %s7757_s16, %s7750_s5 }
 0x106   : > { %p7754_p7 = pneg %p7753_p11  ;;  %p7760_p13 = por %p7759_p1, %p7758_p12 }
 0x108   : > { %p7761_p3 = pnand %p7760_p13, %p7754_p7 }
 0x10a   : > { %7764 = shalt.err (!%p7761_p3)
}
 0x10b   : > { %p9465_p10 = scmp.ne.s32.totalorder %s9451_s1, 0  ;;  %s8507_s17 = scalar_lea.hbm %s9371_s2, %s8328_s24 }
 0x10c   : > { %s612_s20 = scalar_lea.vmem [#allocation7], %s8325_s22  ;;  %s7765_s15 = scalar_lea.hbm %s8507_s17, 64 }
 0x10d   : > { %6769 = dma.hbm_to_vmem [thread:$0]  (!%p9465_p10), %s8482_s30, 64, %s584_s6, %s573_s19  }
 0x10e   : > { %s619_s9 = sshll.u32 %s612_s20, 4  ;;  %p7766_p6 = scmp.ne.s32.totalorder %s8507_s17, %s7765_s15  ;;  %s620_s9 = int_to_ptr.vmem [resolvable:$true] %s619_s9 }
 0x10f   : > { %s7770_s30 = scalar_lea.hbm %s9371_s2, 128  ;;  %p7771_p8 = scmp.lt.u32.totalorder %s8507_s17, %s9371_s2 }
 0x110   : > { %p7768_p5 = pnand %p7766_p6, %p9464_p2  ;;  %p7772_p9 = scmp.lt.u32.totalorder %s7770_s30, %s7765_s15 }
 0x111   : > { %p7774_p11 = scmp.lt.u32.totalorder %s7765_s15, %s8507_s17 }
 0x112   : > { %p7769_p4 = pneg %p7768_p5  ;;  %p7773_p0 = por %p7772_p9, %p7771_p8 }
 0x114   : > { %p7775_p7 = por %p7774_p11, %p7773_p0 }
 0x116   : > { %p7776_p12 = pnand %p7775_p7, %p7769_p4 }
 0x118   : > { %7779 = shalt.err (!%p7776_p12)
}
 0x119   : > { %s7780_s5 = scalar_lea.vmem %s620_s9, 64  ;;  %s8087_s0 = smov [#allocation7]  }
 0x11a   : > { %p7781_p1 = scmp.ne.s32.totalorder %s620_s9, %s7780_s5  ;;  %s7785_s29 = sshll.u32 %s8087_s0, 4  ;;  %s7786_s29 = int_to_ptr.vmem [resolvable:$false] %s7785_s29 }
 0x11b   : > { %s7787_s16 = scalar_lea.vmem %s7786_s29, 128  ;;  %p7788_p6 = scmp.lt.s32.totalorder %s620_s9, %s7786_s29 }
 0x11c   : > { %p7783_p13 = pnand %p7781_p1, %p9464_p2  ;;  %p7789_p5 = scmp.lt.s32.totalorder %s7787_s16, %s7780_s5 }
 0x11e   : > { %p7784_p3 = pneg %p7783_p13  ;;  %p7790_p10 = por %p7789_p5, %p7788_p6 }
 0x120   : > { %p7791_p8 = pnand %p7790_p10, %p7784_p3 }
 0x122   : > { %7794 = shalt.err (!%p7791_p8)
}
 0x123   : > { %p9466_p9 = scmp.ne.s32.totalorder %s9451_s1, 0  ;;  %s9467_s23 = scalar_lea.sflag [#allocation6], %s8335_s14 }
 0x124   : > { %s8533_s15 = scalar_lea.hbm %s9373_s4, %s8328_s24  ;;  %s648_s11 = scalar_lea.vmem [#allocation10], %s8325_s22 }
 0x125   : > { %6775 = dma.hbm_to_vmem [thread:$0]  (!%p9466_p9), %s8507_s17, 64, %s620_s9, %s9467_s23  }
 0x126   : > { %s655_s28 = sshll.u32 %s648_s11, 4  ;;  %s5578_s30 = sshll.u32 %s8322_s21, 3  ;;  %s656_s28 = int_to_ptr.vmem [resolvable:$true] %s655_s28 }
 0x127   : > { %s7795_s6 = scalar_lea.hbm %s8533_s15, 64  ;;  %s7800_s9 = scalar_lea.hbm %s9373_s4, 128 }
 0x128   : > { %p7796_p10 = scmp.ne.s32.totalorder %s8533_s15, %s7795_s6  ;;  %p7801_p11 = scmp.lt.u32.totalorder %s8533_s15, %s9373_s4 }
 0x129   : > { %p7802_p7 = scmp.lt.u32.totalorder %s7800_s9, %s7795_s6  ;;  %p7804_p1 = scmp.lt.u32.totalorder %s7795_s6, %s8533_s15 }
 0x12a   : > { %p7798_p4 = pnand %p7796_p10, %p9464_p2 }
 0x12b   : > { %p7803_p12 = por %p7802_p7, %p7801_p11 }
 0x12c   : > { %p7799_p0 = pneg %p7798_p4 }
 0x12d   : > { %p7805_p13 = por %p7804_p1, %p7803_p12 }
 0x12f   : > { %p7806_p3 = pnand %p7805_p13, %p7799_p0 }
 0x131   : > { %7809 = shalt.err (!%p7806_p3)
}
 0x132   : > { %s7810_s22 = scalar_lea.vmem %s656_s28, 64  ;;  %s8088_s0 = smov [#allocation10]  }
 0x133   : > { %p7811_p6 = scmp.ne.s32.totalorder %s656_s28, %s7810_s22  ;;  %s7815_s29 = sshll.u32 %s8088_s0, 4  ;;  %s7816_s29 = int_to_ptr.vmem [resolvable:$false] %s7815_s29 }
 0x134   : > { %s7817_s16 = scalar_lea.vmem %s7816_s29, 128  ;;  %p7818_p10 = scmp.lt.s32.totalorder %s656_s28, %s7816_s29 }
 0x135   : > { %p7813_p5 = pnand %p7811_p6, %p9464_p2  ;;  %p7819_p4 = scmp.lt.s32.totalorder %s7817_s16, %s7810_s22 }
 0x137   : > { %p7814_p8 = pneg %p7813_p5  ;;  %p7820_p9 = por %p7819_p4, %p7818_p10 }
 0x139   : > { %p7821_p7 = pnand %p7820_p9, %p7814_p8 }
 0x13b   : > { %7824 = shalt.err (!%p7821_p7)
}
 0x13c   : > { %p9468_p11 = scmp.ne.s32.totalorder %s9451_s1, 0  ;;  %s9469_s23 = scalar_lea.sflag [#allocation9], %s8335_s14 }
 0x13d   : > { %s5579_s10 = sshll.u32 %s8071_s27, 7  ;;  %s691_s19 = scalar_lea.vmem [#allocation13], %s5578_s30 }
 0x13e   : > { %6781 = dma.hbm_to_vmem [thread:$0]  (!%p9468_p11), %s8533_s15, 64, %s656_s28, %s9469_s23  }
 0x13f   : > { %s8562_s6 = scalar_lea.hbm %s9376_s7, %s5579_s10  ;;  %s698_s17 = sshll.u32 %s691_s19, 4  ;;  %s699_s17 = int_to_ptr.vmem [resolvable:$true] %s698_s17 }
 0x140   : > { %s7825_s9 = scalar_lea.hbm %s8562_s6, 128  ;;  %s7830_s5 = scalar_lea.hbm %s9376_s7, 256 }
 0x141   : > { %p7826_p9 = scmp.ne.s32.totalorder %s8562_s6, %s7825_s9  ;;  %p7831_p1 = scmp.lt.u32.totalorder %s8562_s6, %s9376_s7 }
 0x142   : > { %p7832_p13 = scmp.lt.u32.totalorder %s7830_s5, %s7825_s9  ;;  %p7834_p6 = scmp.lt.u32.totalorder %s7825_s9, %s8562_s6 }
 0x143   : > { %p7828_p0 = pnand %p7826_p9, %p9464_p2 }
 0x144   : > { %p7833_p3 = por %p7832_p13, %p7831_p1 }
 0x145   : > { %p7829_p12 = pneg %p7828_p0 }
 0x146   : > { %p7835_p5 = por %p7834_p6, %p7833_p3 }
 0x148   : > { %p7836_p8 = pnand %p7835_p5, %p7829_p12 }
 0x14a   : > { %7839 = shalt.err (!%p7836_p8)
}
 0x14b   : > { %s7840_s0 = scalar_lea.vmem %s699_s17, 128  ;;  %s8089_s29 = smov [#allocation13]  }
 0x14c   : > { %p7841_p10 = scmp.ne.s32.totalorder %s699_s17, %s7840_s0  ;;  %s7845_s16 = sshll.u32 %s8089_s29, 4  ;;  %s7846_s16 = int_to_ptr.vmem [resolvable:$false] %s7845_s16 }
 0x14d   : > { %s7847_s23 = scalar_lea.vmem %s7846_s16, 256  ;;  %p7848_p9 = scmp.lt.s32.totalorder %s699_s17, %s7846_s16 }
 0x14e   : > { %p7843_p4 = pnand %p7841_p10, %p9464_p2  ;;  %p7849_p0 = scmp.lt.s32.totalorder %s7847_s23, %s7840_s0 }
 0x150   : > { %p7844_p7 = pneg %p7843_p4  ;;  %p7850_p11 = por %p7849_p0, %p7848_p9 }
 0x152   : > { %p7851_p1 = pnand %p7850_p11, %p7844_p7 }
 0x154   : > { %7854 = shalt.err (!%p7851_p1)
}
 0x155   : > { %p9470_p13 = scmp.ne.s32.totalorder %s9451_s1, 0  ;;  %s9471_s20 = scalar_lea.sflag [#allocation12], %s8335_s14 }
 0x156   : > { %s8590_s9 = scalar_lea.hbm %s9377_s8, %s5579_s10  ;;  %s709_s15 = scalar_lea.vmem [#allocation14], %s5578_s30 }
 0x157   : > { %6787 = dma.hbm_to_vmem [thread:$0]  (!%p9470_p13), %s8562_s6, 128, %s699_s17, %s9471_s20  }
 0x158   : > { %s716_s28 = sshll.u32 %s709_s15, 4  ;;  %s706_s5 = scalar_lea.sflag [#allocation15], %s8335_s14  ;;  %s717_s28 = int_to_ptr.vmem [resolvable:$true] %s716_s28 }
 0x159   : > { %s7855_s24 = scalar_lea.hbm %s8590_s9, 128  ;;  %s7860_s22 = scalar_lea.hbm %s9377_s8, 256 }
 0x15a   : > { %p7856_p11 = scmp.ne.s32.totalorder %s8590_s9, %s7855_s24  ;;  %p7861_p6 = scmp.lt.u32.totalorder %s8590_s9, %s9377_s8 }
 0x15b   : > { %p7862_p5 = scmp.lt.u32.totalorder %s7860_s22, %s7855_s24  ;;  %p7864_p10 = scmp.lt.u32.totalorder %s7855_s24, %s8590_s9 }
 0x15c   : > { %p7858_p12 = pnand %p7856_p11, %p9464_p2 }
 0x15d   : > { %p7863_p8 = por %p7862_p5, %p7861_p6 }
 0x15e   : > { %p7859_p3 = pneg %p7858_p12 }
 0x15f   : > { %p7865_p4 = por %p7864_p10, %p7863_p8 }
 0x161   : > { %p7866_p7 = pnand %p7865_p4, %p7859_p3 }
 0x163   : > { %7869 = shalt.err (!%p7866_p7)
}
 0x164   : > { %s7870_s21 = scalar_lea.vmem %s717_s28, 128  ;;  %s8090_s14 = smov [#allocation14]  }
 0x165   : > { %p7871_p9 = scmp.ne.s32.totalorder %s717_s28, %s7870_s21  ;;  %s7875_s30 = sshll.u32 %s8090_s14, 4  ;;  %s7876_s30 = int_to_ptr.vmem [resolvable:$false] %s7875_s30 }
 0x166   : > { %s7877_s29 = scalar_lea.vmem %s7876_s30, 256  ;;  %p7878_p11 = scmp.lt.s32.totalorder %s717_s28, %s7876_s30 }
 0x167   : > { %p7873_p0 = pnand %p7871_p9, %p9464_p2  ;;  %p7879_p12 = scmp.lt.s32.totalorder %s7877_s29, %s7870_s21 }
 0x169   : > { %p7874_p1 = pneg %p7873_p0  ;;  %p7880_p13 = por %p7879_p12, %p7878_p11 }
 0x16b   : > { %p7881_p5 = pnand %p7880_p13, %p7874_p1 }
 0x16d   : > { %7884 = shalt.err (!%p7881_p5)
}
 0x16e   : > { %p9472_p6 = scmp.ne.s32.totalorder %s9451_s1, 0  ;;  %p9473_p3 = scmp.ne.s32.totalorder %s9441_s18, 0 }
 0x16f   : > { %s9474_s26 = sld [smem:[#allocation42_spill]] (!%p9473_p3)  ;;  %s8615_s16 = sand.u32 (!%p9473_p3), 1, %s8063_s25  }
 0x170   : > { %6790 = dma.hbm_to_vmem [thread:$0]  (!%p9472_p6), %s8590_s9, 128, %s717_s28, %s706_s5  }
 0x171   : > { %732 = sbr.rel (%p9473_p3) target bundleno = 3565 (0xded), region = 76  ;;  %s8618_s23 = sshll.u32 (!%p9473_p3), %s8615_s16, 2 }
 0x172   : > { %s735_s20 = scalar_lea.sflag (!%p9473_p3), [#allocation3], %s8615_s16  ;;  %s738_s11 = scalar_lea.vmem (!%p9473_p3), [#allocation2], %s8618_s23 }
 0x175   : > { %p9475_p2 = scmp.ne.s32.totalorder (!%p9473_p3), %s9474_s26, 0 }
 0x178   : > { %8014 = dma.done.wait (%p9475_p2), %s735_s20, 64  }
 0x179   : > { %8016 = vsyncadd (%p9475_p2), %s735_s20, 4294967232  ;;  %s9476_s1 = sld [smem:[#allocation41_spill]]  ;;  %s747_s9 = scalar_lea.vmem [#allocation5], %s8618_s23 }
 0x17f   : > { %s8627_s18 = sand.u32 1, %s9476_s1  }
 0x180   : > { %s744_s19 = scalar_lea.sflag [#allocation6], %s8627_s18 }
 0x181   : > { %8018 = dma.done.wait (%p9475_p2), %s744_s19, 128  }
 0x182   : > { %8020 = vsyncadd (%p9475_p2), %s744_s19, 4294967168  ;;  %s756_s15 = scalar_lea.vmem [#allocation7], %s8618_s23  ;;  %s762_s28 = scalar_lea.sflag [#allocation9], %s8627_s18 }
 0x183   : > { %s765_s5 = scalar_lea.vmem [#allocation8], %s8618_s23 }
 0x184   : > { %8022 = dma.done.wait (%p9475_p2), %s762_s28, 128  }
 0x185   : > { %8024 = vsyncadd (%p9475_p2), %s762_s28, 4294967168  ;;  %s774_s24 = scalar_lea.vmem [#allocation10], %s8618_s23  ;;  %s780_s6 = scalar_lea.sflag [#allocation12], %s8627_s18 }
 0x186   : > { %s783_s17 = scalar_lea.vmem [#allocation11], %s8618_s23 }
 0x187   : > { %8026 = dma.done.wait (%p9475_p2), %s780_s6, 192  }
 0x188   : > { %8028 = vsyncadd (%p9475_p2), %s780_s6, 4294967104  ;;  %s8650_s22 = sshll.u32 %s8615_s16, 3  ;;  %s798_s0 = scalar_lea.sflag [#allocation15], %s8627_s18 }
 0x189   : > { %s792_s10 = scalar_lea.vmem [#allocation13], %s8650_s22  ;;  %s801_s21 = scalar_lea.vmem [#allocation14], %s8650_s22 }
 0x18a   : > { %8030 = dma.done.wait (%p9475_p2), %s798_s0, 128  }
 0x18b   : > { %8032 = vsyncadd (%p9475_p2), %s798_s0, 4294967168  ;;  %p9477_p13 = scmp.eq.s32.totalorder %s9476_s1, 0 }
 0x18d   : > { %8034 = dma.done.wait (%p9477_p13), [#allocation15], 4096   ;;  %p9478_p8 = pmov %p9477_p13 }
 0x18f   : > { %8036 = vsyncadd (%p9478_p8), [#allocation15], 4294963200  ;;  %p9479_p10 = pmov %p9478_p8 }
 0x190   : > { %p9480_p4 = pmov %p9478_p8 }
 0x191   : > { %8038 = dma.done.wait (%p9479_p10), [#allocation18], 21504  }
 0x192   : > { %8040 = vsyncadd (%p9480_p4), [#allocation18], 4294945792  ;;  %p9481_p7 = pmov %p9480_p4 }
 0x193   : > { %p9482_p9 = pmov %p9480_p4 }
 0x194   : > { %8042 = dma.done.wait (%p9481_p7), [#allocation21], 5120  }
 0x195   : > { %8044 = vsyncadd (%p9482_p9), [#allocation21], 4294962176  ;;  %v8091_v0 = vmov 0   ;;  %v6859_v1 = vld [vmem:[#allocation16 + $0x4] ss:$16 sps:$4 sm:$0xff]   ;;  %p926_p0 = scmp.lt.s32.totalorder %s9476_s1, 1 }
 0x196   : > { %1483 = vmatprep.mubr.bf16.mxu0 %v8091_v0  ;;  %1524 = vmatprep.mubr.bf16.mxu1 %v8091_v0  ;;  %v6861_v2 = vld [vmem:[#allocation16] ss:$16 sps:$4 sm:$0xff]   ;;  %v6862_v3 = vld [vmem:[#allocation16 + $0x24] ss:$16 sps:$4 sm:$0xff]   ;;  %s9483_s20 = sld [smem:[#allocation51_spill]]  ;;  %v8092_v61 = vmov 0.0  }
 0x197   : > { %1451 = vmatprep.subr.bf16.mxu0 %v6859_v1  ;;  %v6864_v4 = vld [vmem:[#allocation16 + $0x20] ss:$16 sps:$4 sm:$0xff]   ;;  %v6865_v5 = vld [vmem:[#allocation16 + $0x44] ss:$16 sps:$4 sm:$0xff]   ;;  %s8675_s14 = scalar_select %p926_p0, %s9476_s1, 1  ;;  %vm8093_vm0 = vmmov 0  }
 0x198   : > { %1452 = vmatpush1.bf16.msra.mxu0 %v6861_v2  ;;  %v6867_v6 = vld [vmem:[#allocation16 + $0x40] ss:$16 sps:$4 sm:$0xff]   ;;  %v6868_v7 = vld [vmem:[#allocation16 + $0x64] ss:$16 sps:$4 sm:$0xff]   ;;  %v6888_v21 = vld [vmem:[#allocation17 + $0x1c] ss:$12 sps:$4 sm:$0xff]  }
 0x199   : > { %1453 = vmatprep.subr.bf16.mxu0 %v6862_v3  ;;  %v6870_v8 = vld [vmem:[#allocation16 + $0x60] ss:$16 sps:$4 sm:$0xff]   ;;  %v6871_v9 = vld [vmem:[#allocation16 + $0x84] ss:$16 sps:$4 sm:$0xff]   ;;  %s5599_s30 = sshll.u32 %s8675_s14, 3  ;;  %s9484_s0 = sld [smem:[#allocation52_spill]] }
 0x19a   : > { %v6873_v10 = vld [vmem:[#allocation16 + $0x80] ss:$16 sps:$4 sm:$0xff]   ;;  %v6874_v11 = vld [vmem:[#allocation16 + $0xa4] ss:$16 sps:$4 sm:$0xff]   ;;  %v6894_v25 = vld [vmem:[#allocation17 + $0x4c] ss:$12 sps:$4 sm:$0xff]  }
 0x19b   : > { %v6876_v12 = vld [vmem:[#allocation16 + $0xa0] ss:$16 sps:$4 sm:$0xff]   ;;  %v6877_v13 = vld [vmem:[#allocation16 + $0xc4] ss:$16 sps:$4 sm:$0xff]   ;;  %v6949_v26 = vld [vmem:[#allocation16 + $0xc] ss:$16 sps:$4 sm:$0xff]  }
 0x19c   : > { %1454 = vmatpush1.bf16.msra.mxu0 %v6864_v4  ;;  %v6879_v14 = vld [vmem:[#allocation16 + $0xc0] ss:$16 sps:$4 sm:$0xff]   ;;  %v6880_v15 = vld [vmem:[#allocation16 + $0xe4] ss:$16 sps:$4 sm:$0xff]   ;;  %s8683_s19 = scalar_lea.vmem %s9483_s20, %s5599_s30  ;;  %v6951_v27 = vld [vmem:[#allocation16 + $0x8] ss:$16 sps:$4 sm:$0xff]   ;;  %1492 = vmatprep.subr.bf16.mxu1 %v6949_v26 }
 0x19d   : > { %1455 = vmatprep.subr.bf16.mxu0 %v6865_v5  ;;  %v6882_v16 = vld [vmem:[#allocation16 + $0xe0] ss:$16 sps:$4 sm:$0xff]   ;;  %v6886_v22 = vld [vmem:[#allocation17 + $0x18] ss:$12 sps:$4 sm:$0xff]   ;;  %v6892_v28 = vld [vmem:[#allocation17 + $0x48] ss:$12 sps:$4 sm:$0xff]   ;;  %1493 = vmatpush1.bf16.msra.mxu1 %v6951_v27 }
 0x19e   : > { %v935_v17 = vld [vmem:[%s8683_s19] sm:$0xff]  ;;  %v6883_v20 = vld [vmem:[#allocation17] ss:$12 sps:$4 sm:$0xff]   ;;  %v6957_v31 = vld [vmem:[#allocation16 + $0x28] ss:$16 sps:$4 sm:$0xff]   ;;  %vm2171_vm1 = vcmask 1043456  }
 0x19f   : > { %v6885_v18 = vld [vmem:[#allocation17 + $0x4] ss:$12 sps:$4 sm:$0xff]   ;;  %v8686_v19 = vpack.c.bf16 %v935_v17, %v935_v17  ;;  %v6891_v23 = vld [vmem:[#allocation17 + $0x34] ss:$12 sps:$4 sm:$0xff]   ;;  %v6955_v30 = vld [vmem:[#allocation16 + $0x2c] ss:$16 sps:$4 sm:$0xff]   ;;  %s8725_s29 = scalar_lea.vmem %s9484_s0, %s5599_s30 }
 0x1a0   : > { %1456 = vmatpush1.bf16.msra.mxu0 %v6867_v6  ;;  %v6889_v24 = vld [vmem:[#allocation17 + $0x30] ss:$12 sps:$4 sm:$0xff]   ;;  %1494 = vmatprep.subr.bf16.mxu1 %v6955_v30  ;;  %v6895_v32 = vld [vmem:[#allocation17 + $0x60] ss:$12 sps:$4 sm:$0xff]   ;;  %v6963_v35 = vld [vmem:[#allocation16 + $0x48] ss:$16 sps:$4 sm:$0xff]  }
 0x1a1   : > { %1457 = vmatprep.subr.bf16.mxu0 %v6868_v7  ;;  %v6897_v29 = vld [vmem:[#allocation17 + $0x64] ss:$12 sps:$4 sm:$0xff]   ;;  %v6900_v33 = vld [vmem:[#allocation17 + $0x7c] ss:$12 sps:$4 sm:$0xff]   ;;  %1495 = vmatpush1.bf16.msra.mxu1 %v6957_v31  ;;  %v6903_v38 = vld [vmem:[#allocation17 + $0x94] ss:$12 sps:$4 sm:$0xff]  }
 0x1a2   : > { %v6961_v34 = vld [vmem:[#allocation16 + $0x4c] ss:$16 sps:$4 sm:$0xff]   ;;  %v6898_v37 = vld [vmem:[#allocation17 + $0x78] ss:$12 sps:$4 sm:$0xff]   ;;  %v6904_v44 = vld [vmem:[#allocation17 + $0xa8] ss:$12 sps:$4 sm:$0xff]  }
 0x1a3   : > { %1496 = vmatprep.subr.bf16.mxu1 %v6961_v34  ;;  %v6964_v36 = vld [vmem:[#allocation16 + $0x6c] ss:$16 sps:$4 sm:$0xff]   ;;  %v6966_v39 = vld [vmem:[#allocation16 + $0x68] ss:$16 sps:$4 sm:$0xff]   ;;  %v6909_v47 = vld [vmem:[#allocation17 + $0xc4] ss:$12 sps:$4 sm:$0xff]  }
 0x1a4   : > { %1458 = vmatpush1.bf16.msra.mxu0 %v6870_v8  ;;  %v6967_v40 = vld [vmem:[#allocation16 + $0x8c] ss:$16 sps:$4 sm:$0xff]   ;;  %v6969_v43 = vld [vmem:[#allocation16 + $0x88] ss:$16 sps:$4 sm:$0xff]   ;;  %v6915_v56 = vld [vmem:[#allocation17 + $0xf4] ss:$12 sps:$4 sm:$0xff]  }
 0x1a5   : > { %1459 = vmatprep.subr.bf16.mxu0 %v6871_v9  ;;  %1497 = vmatpush1.bf16.msra.mxu1 %v6963_v35  ;;  %v6901_v41 = vld [vmem:[#allocation17 + $0x90] ss:$12 sps:$4 sm:$0xff]   ;;  %v6906_v42 = vld [vmem:[#allocation17 + $0xac] ss:$12 sps:$4 sm:$0xff]   ;;  %v6979_v60 = vld [vmem:[#allocation17 + $0x8] ss:$12 sps:$4 sm:$0xff]  }
 0x1a6   : > { %1498 = vmatprep.subr.bf16.mxu1 %v6964_v36  ;;  %v6970_v45 = vld [vmem:[#allocation16 + $0xac] ss:$16 sps:$4 sm:$0xff]   ;;  %v6972_v48 = vld [vmem:[#allocation16 + $0xa8] ss:$16 sps:$4 sm:$0xff]   ;;  %v6921_v63 = vld [vmem:[#allocation17 + $0x124] ss:$12 sps:$4 sm:$0xff]  }
 0x1a7   : > { %v936_v46 = vld [vmem:[%s792_s10] sm:$0xff]  ;;  %v6913_v58 = vld [vmem:[#allocation17 + $0xf0] ss:$12 sps:$4 sm:$0xff]   ;;  %vm2167_vm2 = vcmask 64512   ;;  %s904_s23 = scalar_lea.vmem [#allocation22], %s8650_s22  ;;  %s5115_s30 = scalar_lea.sflag [#allocation4], %s8615_s16 }
 0x1a8   : > { %1460 = vmatpush1.bf16.msra.mxu0 %v6873_v10  ;;  %v6973_v49 = vld [vmem:[#allocation16 + $0xcc] ss:$16 sps:$4 sm:$0xff]   ;;  %v8692_v50 = vpack.c.bf16 %v936_v46, %v936_v46  ;;  %v6975_v53 = vld [vmem:[#allocation16 + $0xc8] ss:$16 sps:$4 sm:$0xff]   ;;  %v6927_v6 = vld [vmem:[#allocation17 + $0x154] ss:$12 sps:$4 sm:$0xff]  }
 0x1a9   : > { %1461 = vmatprep.subr.bf16.mxu0 %v6874_v11  ;;  %1499 = vmatpush1.bf16.msra.mxu1 %v6966_v39  ;;  %v6907_v51 = vld [vmem:[#allocation17 + $0xc0] ss:$12 sps:$4 sm:$0xff]   ;;  %v6912_v52 = vld [vmem:[#allocation17 + $0xdc] ss:$12 sps:$4 sm:$0xff]   ;;  %v6910_v55 = vld [vmem:[#allocation17 + $0xd8] ss:$12 sps:$4 sm:$0xff]  }
 0x1aa   : > { %1500 = vmatprep.subr.bf16.mxu1 %v6967_v40  ;;  %v6976_v54 = vld [vmem:[#allocation16 + $0xec] ss:$16 sps:$4 sm:$0xff]   ;;  %v6978_v57 = vld [vmem:[#allocation16 + $0xe8] ss:$16 sps:$4 sm:$0xff]   ;;  %v6945_v26 = vld [vmem:[#allocation17 + $0x1e4] ss:$12 sps:$4 sm:$0xff]  }
 0x1ab   : > { %v6918_v59 = vld [vmem:[#allocation17 + $0x10c] ss:$12 sps:$4 sm:$0xff]   ;;  %v6916_v62 = vld [vmem:[#allocation17 + $0x108] ss:$12 sps:$4 sm:$0xff]   ;;  %v6982_v7 = vld [vmem:[#allocation17 + $0x50] ss:$12 sps:$4 sm:$0xff]  }
 0x1ac   : > { %1462 = vmatpush1.bf16.msra.mxu0 %v6876_v12  ;;  %v6980_v1 = vld [vmem:[#allocation17 + $0x20] ss:$12 sps:$4 sm:$0xff]   ;;  %v6924_v3 = vld [vmem:[#allocation17 + $0x13c] ss:$12 sps:$4 sm:$0xff]   ;;  %v6981_v4 = vld [vmem:[#allocation17 + $0x38] ss:$12 sps:$4 sm:$0xff]  }
 0x1ad   : > { %1463 = vmatprep.subr.bf16.mxu0 %v6877_v13  ;;  %1501 = vmatpush1.bf16.msra.mxu1 %v6969_v43  ;;  %v6919_v2 = vld [vmem:[#allocation17 + $0x120] ss:$12 sps:$4 sm:$0xff]   ;;  %v6922_v5 = vld [vmem:[#allocation17 + $0x138] ss:$12 sps:$4 sm:$0xff]   ;;  %v6925_v8 = vld [vmem:[#allocation17 + $0x150] ss:$12 sps:$4 sm:$0xff]  }
 0x1ae   : > { %1502 = vmatprep.subr.bf16.mxu1 %v6970_v45  ;;  %v6930_v9 = vld [vmem:[#allocation17 + $0x16c] ss:$12 sps:$4 sm:$0xff]   ;;  %v6983_v10 = vld [vmem:[#allocation17 + $0x68] ss:$12 sps:$4 sm:$0xff]   ;;  %v6933_v13 = vld [vmem:[#allocation17 + $0x184] ss:$12 sps:$4 sm:$0xff]  }
 0x1af   : > { %v6928_v11 = vld [vmem:[#allocation17 + $0x168] ss:$12 sps:$4 sm:$0xff]   ;;  %v6988_v27 = vld [vmem:[#allocation17 + $0xe0] ss:$12 sps:$4 sm:$0xff]   ;;  %v6989_v30 = vld [vmem:[#allocation17 + $0xf8] ss:$12 sps:$4 sm:$0xff]  }
 0x1b0   : > { %1464 = vmatpush1.bf16.msra.mxu0 %v6879_v14  ;;  %v937_v12 = vld [vmem:[%s801_s21] sm:$0xff]  ;;  %v6984_v14 = vld [vmem:[#allocation17 + $0x80] ss:$12 sps:$4 sm:$0xff]   ;;  %s5143_s14 = sshll.u32 %s904_s23, 4  ;;  %s8094_s20 = smov [#allocation22]   ;;  %s5144_s14 = int_to_ptr.vmem [resolvable:$true] %s5143_s14 }
 0x1b1   : > { %1465 = vmatprep.subr.bf16.mxu0 %v6880_v15  ;;  %1503 = vmatpush1.bf16.msra.mxu1 %v6972_v48  ;;  %v6931_v15 = vld [vmem:[#allocation17 + $0x180] ss:$12 sps:$4 sm:$0xff]   ;;  %v6936_v17 = vld [vmem:[#allocation17 + $0x19c] ss:$12 sps:$4 sm:$0xff]   ;;  %v6946_v31 = vld [vmem:[#allocation17 + $0x1f8] ss:$12 sps:$4 sm:$0xff]  }
 0x1b2   : > { %1504 = vmatprep.subr.bf16.mxu1 %v6973_v49  ;;  %v6952_v34 = vld [vmem:[#allocation17 + $0x210] ss:$12 sps:$4 sm:$0xff]   ;;  %v6960_v35 = vld [vmem:[#allocation17 + $0x22c] ss:$12 sps:$4 sm:$0xff]   ;;  %v6991_v36 = vld [vmem:[#allocation17 + $0x128] ss:$12 sps:$4 sm:$0xff]  }
 0x1b3   : > { %v6992_v39 = vld [vmem:[#allocation17 + $0x140] ss:$12 sps:$4 sm:$0xff]   ;;  %v6995_v43 = vld [vmem:[#allocation17 + $0x188] ss:$12 sps:$4 sm:$0xff]   ;;  %v6997_v45 = vld [vmem:[#allocation17 + $0x1b8] ss:$12 sps:$4 sm:$0xff]  }
 0x1b4   : > { %1466 = vmatpush1.bf16.msra.mxu0 %v6882_v16  ;;  %v8707_v16 = vpack.c.bf16 %v937_v12, %v937_v12  ;;  %v6998_v46 = vld [vmem:[#allocation17 + $0x1d0] ss:$12 sps:$4 sm:$0xff]   ;;  %v7000_v48 = vld [vmem:[#allocation17 + $0x200] ss:$12 sps:$4 sm:$0xff]   ;;  %v7001_v49 = vld [vmem:[#allocation17 + $0x218] ss:$12 sps:$4 sm:$0xff]  }
 0x1b5   : > { %1662 = vmatprep.subr.bf16.mxu0 %v6885_v18  ;;  %1505 = vmatpush1.bf16.msra.mxu1 %v6975_v53  ;;  %v6985_v18 = vld [vmem:[#allocation17 + $0x98] ss:$12 sps:$4 sm:$0xff]   ;;  %s7885_s26 = scalar_lea.vmem %s5144_s14, 128 }
 0x1b6   : > { %1506 = vmatprep.subr.bf16.mxu1 %v6976_v54  ;;  %p7886_p1 = scmp.ne.s32.totalorder %s5144_s14, %s7885_s26 }
 0x1b7   : > { %1484 = vmatmul.mubr.bf16.vlgmr.msra.gmra.mrb[0].mxu0 %v8686_v19 }
 0x1b8   : > { %1663 = vmatpush1.bf16.msra.mxu0 %v6883_v20  ;;  %1694 = vmatprep.mubr.bf16.mxu0 %v8091_v0  ;;  %v6939_v20 = vld [vmem:[#allocation17 + $0x1b4] ss:$12 sps:$4 sm:$0xff]  }
 0x1b9   : > { %1664 = vmatprep.subr.bf16.mxu0 %v6888_v21  ;;  %1507 = vmatpush1.bf16.msra.mxu1 %v6978_v57  ;;  %v6986_v21 = vld [vmem:[#allocation17 + $0xb0] ss:$12 sps:$4 sm:$0xff]  }
 0x1ba   : > { %6121 = vmatprep.subr.bf16.mxu1 %v8092_v61 }
 0x1bc   : > { %1665 = vmatpush1.bf16.msra.mxu0 %v6886_v22  ;;  %1525 = vmatmul.mubr.bf16.vlgmr.msra.gmra.mrb[0].mxu1 %v8686_v19  ;;  %v6934_v19 = vld [vmem:[#allocation17 + $0x198] ss:$12 sps:$4 sm:$0xff]   ;;  %v6937_v22 = vld [vmem:[#allocation17 + $0x1b0] ss:$12 sps:$4 sm:$0xff]  }
 0x1bd   : > { %1666 = vmatprep.subr.bf16.mxu0 %v6891_v23  ;;  %6122 = vmatpush3.bf16.msra.mxu1 %v6979_v60  ;;  %v6942_v23 = vld [vmem:[#allocation17 + $0x1cc] ss:$12 sps:$4 sm:$0xff]  }
 0x1be   : > { %6123 = vmatprep.subr.bf16.mxu1 %v8092_v61  ;;  %6137 = vmatprep.mubr.msk.bf16.mxu1 %vm8093_vm0, %v8092_v61 }
 0x1c0   : > { %1667 = vmatpush1.bf16.msra.mxu0 %v6889_v24  ;;  %v6987_v24 = vld [vmem:[#allocation17 + $0xc8] ss:$12 sps:$4 sm:$0xff]  }
 0x1c1   : > { %1668 = vmatprep.subr.bf16.mxu0 %v6894_v25  ;;  %6124 = vmatpush3.bf16.msra.mxu1 %v6980_v1  ;;  %v6940_v25 = vld [vmem:[#allocation17 + $0x1c8] ss:$12 sps:$4 sm:$0xff]   ;;  %v941_v1 = vld [vmem:[%s756_s15] sm:$0xf] }
 0x1c2   : > { %6125 = vmatprep.subr.bf16.mxu1 %v8092_v61 }
 0x1c4   : > { %1669 = vmatpush1.bf16.msra.mxu0 %v6892_v28  ;;  %v6943_v28 = vld [vmem:[#allocation17 + $0x1e0] ss:$12 sps:$4 sm:$0xff]  }
 0x1c5   : > { %1670 = vmatprep.subr.bf16.mxu0 %v6897_v29  ;;  %6126 = vmatpush3.bf16.msra.mxu1 %v6981_v4  ;;  %v6948_v29 = vld [vmem:[#allocation17 + $0x1fc] ss:$12 sps:$4 sm:$0xff]  }
 0x1c6   : > { %6127 = vmatprep.subr.bf16.mxu1 %v8092_v61 }
 0x1c8   : > { %1671 = vmatpush1.bf16.msra.mxu0 %v6895_v32  ;;  %v6954_v32 = vld [vmem:[#allocation17 + $0x214] ss:$12 sps:$4 sm:$0xff]  }
 0x1c9   : > { %1672 = vmatprep.subr.bf16.mxu0 %v6900_v33  ;;  %6128 = vmatpush3.bf16.msra.mxu1 %v6982_v7  ;;  %v6990_v33 = vld [vmem:[#allocation17 + $0x110] ss:$12 sps:$4 sm:$0xff]  }
 0x1ca   : > { %6129 = vmatprep.subr.bf16.mxu1 %v8092_v61 }
 0x1cc   : > { %1673 = vmatpush1.bf16.msra.mxu0 %v6898_v37  ;;  %v6958_v37 = vld [vmem:[#allocation17 + $0x228] ss:$12 sps:$4 sm:$0xff]  }
 0x1cd   : > { %1674 = vmatprep.subr.bf16.mxu0 %v6903_v38  ;;  %6130 = vmatpush3.bf16.msra.mxu1 %v6983_v10  ;;  %v938_v38 = vld [vmem:[%s8725_s29] sm:$0xff] }
 0x1ce   : > { %6131 = vmatprep.subr.bf16.mxu1 %v8092_v61  ;;  %v1953_v40 = vpack.c.bf16 %v938_v38, %v938_v38 }
 0x1d0   : > { %1675 = vmatpush1.bf16.msra.mxu0 %v6901_v41  ;;  %v6993_v41 = vld [vmem:[#allocation17 + $0x158] ss:$12 sps:$4 sm:$0xff]  }
 0x1d1   : > { %1676 = vmatprep.subr.bf16.mxu0 %v6906_v42  ;;  %6132 = vmatpush3.bf16.msra.mxu1 %v6984_v14  ;;  %v6994_v42 = vld [vmem:[#allocation17 + $0x170] ss:$12 sps:$4 sm:$0xff]  }
 0x1d2   : > { %6133 = vmatprep.subr.bf16.mxu1 %v8092_v61 }
 0x1d4   : > { %1677 = vmatpush1.bf16.msra.mxu0 %v6904_v44  ;;  %v6996_v44 = vld [vmem:[#allocation17 + $0x1a0] ss:$12 sps:$4 sm:$0xff]  }
 0x1d5   : > { %1872 = vmatprep.subr.bf16.mxu0 %v6909_v47  ;;  %6134 = vmatpush3.bf16.msra.mxu1 %v6985_v18  ;;  %v6999_v47 = vld [vmem:[#allocation17 + $0x1e8] ss:$12 sps:$4 sm:$0xff]  }
 0x1d6   : > { %6135 = vmatprep.subr.bf16.mxu1 %v8092_v61  ;;  %v943_v18 = vld [vmem:[%s774_s24] sm:$0xf] }
 0x1d7   : > { %1695 = vmatmul.mubr.bf16.vlgmr.msra.gmra.mrb[4].mxu0 %v8692_v50 }
 0x1d8   : > { %1873 = vmatpush1.bf16.msra.mxu0 %v6907_v51  ;;  %1904 = vmatprep.mubr.bf16.mxu0 %v8091_v0 }
 0x1d9   : > { %1874 = vmatprep.subr.bf16.mxu0 %v6912_v52  ;;  %6136 = vmatpush3.bf16.msra.mxu1 %v6986_v21  ;;  %v7006_v21 = vld [vmem:[#allocation20 + $0x118] sm:$0xff]  }
 0x1da   : > { %6141 = vmatprep.subr.bf16.mxu1 %v8092_v61 }
 0x1dc   : > { %1875 = vmatpush1.bf16.msra.mxu0 %v6910_v55  ;;  %6138 = vmatmul.mubr.bf16.vlgmr.msra.gmra.mrb[4].mxu1 %v8692_v50  ;;  %v7002_v50 = vld [vmem:[#allocation17 + $0x230] ss:$12 sps:$4 sm:$0xff]  }
 0x1dd   : > { %1876 = vmatprep.subr.bf16.mxu0 %v6915_v56  ;;  %6142 = vmatpush3.bf16.msra.mxu1 %v6987_v24  ;;  %v7009_v24 = vld [vmem:[#allocation20 + $0x130] sm:$0xff]  }
 0x1de   : > { %6143 = vmatprep.subr.bf16.mxu1 %v8092_v61  ;;  %6157 = vmatprep.mubr.msk.bf16.mxu1 %vm8093_vm0, %v8092_v61 }
 0x1e0   : > { %1877 = vmatpush1.bf16.msra.mxu0 %v6913_v58 }
 0x1e1   : > { %1878 = vmatprep.subr.bf16.mxu0 %v6918_v59  ;;  %6144 = vmatpush3.bf16.msra.mxu1 %v6988_v27 }
 0x1e2   : > { %6145 = vmatprep.subr.bf16.mxu1 %v8092_v61 }
 0x1e4   : > { %1879 = vmatpush1.bf16.msra.mxu0 %v6916_v62 }
 0x1e5   : > { %1880 = vmatprep.subr.bf16.mxu0 %v6921_v63  ;;  %6146 = vmatpush3.bf16.msra.mxu1 %v6989_v30 }
 0x1e6   : > { %6147 = vmatprep.subr.bf16.mxu1 %v8092_v61 }
 0x1e8   : > { %1881 = vmatpush1.bf16.msra.mxu0 %v6919_v2 }
 0x1e9   : > { %1882 = vmatprep.subr.bf16.mxu0 %v6924_v3  ;;  %6148 = vmatpush3.bf16.msra.mxu1 %v6990_v33 }
 0x1ea   : > { %6149 = vmatprep.subr.bf16.mxu1 %v8092_v61 }
 0x1ec   : > { %1883 = vmatpush1.bf16.msra.mxu0 %v6922_v5 }
 0x1ed   : > { %1884 = vmatprep.subr.bf16.mxu0 %v6927_v6  ;;  %6150 = vmatpush3.bf16.msra.mxu1 %v6991_v36 }
 0x1ee   : > { %6151 = vmatprep.subr.bf16.mxu1 %v8092_v61 }
 0x1f0   : > { %1885 = vmatpush1.bf16.msra.mxu0 %v6925_v8  ;;  %v940_v8 = vld [vmem:[%s747_s9] sm:$0xf] }
 0x1f1   : > { %1886 = vmatprep.subr.bf16.mxu0 %v6930_v9  ;;  %6152 = vmatpush3.bf16.msra.mxu1 %v6992_v39 }
 0x1f2   : > { %6153 = vmatprep.subr.bf16.mxu1 %v8092_v61 }
 0x1f4   : > { %1887 = vmatpush1.bf16.msra.mxu0 %v6928_v11 }
 0x1f5   : > { %2082 = vmatprep.subr.bf16.mxu0 %v6933_v13  ;;  %6154 = vmatpush3.bf16.msra.mxu1 %v6993_v41 }
 0x1f6   : > { %6155 = vmatprep.subr.bf16.mxu1 %v8092_v61 }
 0x1f7   : > { %1905 = vmatmul.mubr.bf16.vlgmr.msra.gmra.mrb[8].mxu0 %v8707_v16 }
 0x1f8   : > { %2083 = vmatpush1.bf16.msra.mxu0 %v6931_v15  ;;  %2114 = vmatprep.mubr.bf16.mxu0 %v8091_v0  ;;  %v939_v15 = vld [vmem:[%s738_s11] sm:$0xf] }
 0x1f9   : > { %2084 = vmatprep.subr.bf16.mxu0 %v6936_v17  ;;  %6156 = vmatpush3.bf16.msra.mxu1 %v6994_v42  ;;  %v7003_v17 = vld [vmem:[#allocation20 + $0x100] sm:$0xff]  }
 0x1fa   : > { %6161 = vmatprep.subr.bf16.mxu1 %v8092_v61 }
 0x1fc   : > { %2085 = vmatpush1.bf16.msra.mxu0 %v6934_v19  ;;  %6158 = vmatmul.mubr.bf16.vlgmr.msra.gmra.mrb[8].mxu1 %v8707_v16  ;;  %v944_v16 = vld [vmem:[%s783_s17] sm:$0xf]  ;;  %v7004_v19 = vld [vmem:[#allocation20 + $0x108] sm:$0xff]  }
 0x1fd   : > { %2086 = vmatprep.subr.bf16.mxu0 %v6939_v20  ;;  %6162 = vmatpush3.bf16.msra.mxu1 %v6995_v43  ;;  %v7005_v20 = vld [vmem:[#allocation20 + $0x110] sm:$0xff]  }
 0x1fe   : > { %6177 = vmatprep.mubr.msk.bf16.mxu1 %vm8093_vm0, %v8092_v61  ;;  %6163 = vmatprep.subr.bf16.mxu1 %v8092_v61 }
 0x200   : > { %2087 = vmatpush1.bf16.msra.mxu0 %v6937_v22  ;;  %v7007_v22 = vld [vmem:[#allocation20 + $0x120] sm:$0xff]  }
 0x201   : > { %2088 = vmatprep.subr.bf16.mxu0 %v6942_v23  ;;  %6164 = vmatpush3.bf16.msra.mxu1 %v6996_v44  ;;  %v7008_v23 = vld [vmem:[#allocation20 + $0x128] sm:$0xff]  }
 0x202   : > { %6165 = vmatprep.subr.bf16.mxu1 %v8092_v61 }
 0x204   : > { %2089 = vmatpush1.bf16.msra.mxu0 %v6940_v25  ;;  %v7010_v25 = vld [vmem:[#allocation20 + $0x138] sm:$0xff]  }
 0x205   : > { %2090 = vmatprep.subr.bf16.mxu0 %v6945_v26  ;;  %6166 = vmatpush3.bf16.msra.mxu1 %v6997_v45 }
 0x206   : > { %6167 = vmatprep.subr.bf16.mxu1 %v8092_v61 }
 0x208   : > { %2091 = vmatpush1.bf16.msra.mxu0 %v6943_v28 }
 0x209   : > { %2092 = vmatprep.subr.bf16.mxu0 %v6948_v29  ;;  %6168 = vmatpush3.bf16.msra.mxu1 %v6998_v46 }
 0x20a   : > { %6169 = vmatprep.subr.bf16.mxu1 %v8092_v61 }
 0x20c   : > { %2093 = vmatpush1.bf16.msra.mxu0 %v6946_v31 }
 0x20d   : > { %2094 = vmatprep.subr.bf16.mxu0 %v6954_v32  ;;  %6170 = vmatpush3.bf16.msra.mxu1 %v6999_v47 }
 0x20e   : > { %6171 = vmatprep.subr.bf16.mxu1 %v8092_v61 }
 0x210   : > { %2095 = vmatpush1.bf16.msra.mxu0 %v6952_v34 }
 0x211   : > { %2096 = vmatprep.subr.bf16.mxu0 %v6960_v35  ;;  %6172 = vmatpush3.bf16.msra.mxu1 %v7000_v48 }
 0x212   : > { %6173 = vmatprep.subr.bf16.mxu1 %v8092_v61 }
 0x214   : > { %2097 = vmatpush1.bf16.msra.mxu0 %v6958_v37 }
 0x215   : > { %6181 = vmatprep.subr.bf16.mxu0 %v8092_v61  ;;  %6174 = vmatpush3.bf16.msra.mxu1 %v7001_v49 }
 0x216   : > { %6175 = vmatprep.subr.bf16.mxu1 %v8092_v61 }
 0x217   : > { %2115 = vmatmul.mubr.bf16.vlgmr.msra.gmra.mrb[12].mxu0 %v1953_v40 }
 0x218   : > { %6183 = vmatprep.mubr.msk.bf16.mxu0 %vm8093_vm0, %v8092_v61 }
 0x219   : > { %6176 = vmatpush3.bf16.msra.mxu1 %v7002_v50 }
 0x21a   : > { %6211 = vmatprep.subr.bf16.mxu1 %v8092_v61 }
 0x21c   : > { %6178 = vmatmul.mubr.bf16.vlgmr.msra.gmra.mrb[12].mxu1 %v1953_v40 }
 0x21d   : > { %6213 = vmatprep.mubr.msk.bf16.mxu1 %vm8093_vm0, %v8092_v61 }
 0x28a   : > { %v1485_v51 = vpop.f32.mrb[0].mxu0 }
 0x28b   : > { %v2163_v52 = vpack.c.bf16 %v1485_v51, %v1485_v51  ;;  %v8749_v53 = vpop.f32.mrb[1].mxu0 }
 0x28c   : > { %v1489_v54 = vpop.f32.mrb[2].mxu0 }
 0x28d   : > { %v2320_v55 = vsel %vm2171_vm1, %v2163_v52, 0  ;;  %v1490_v56 = vpop.f32.mrb[3].mxu0 }
 0x28e   : > { %6212 = vmatpush3.bf16.msra.mxu1 %v2320_v55  ;;  %v7013_v56 = vld [vmem:[#allocation19 + $0x4] ss:$12 sps:$4 sm:$0xff]  }
 0x28f   : > { %2707 = vmatprep.subr.bf16.mxu1 %v7013_v56 }
 0x2aa   : > { %v1696_v57 = vpop.f32.mrb[4].mxu0 }
 0x2ab   : > { %v2164_v58 = vpack.c.bf16 %v1696_v57, %v1696_v57  ;;  %v8752_v59 = vpop.f32.mrb[5].mxu0  ;;  %v7011_v57 = vld [vmem:[#allocation19] ss:$12 sps:$4 sm:$0xff]  }
 0x2ac   : > { %v1700_v60 = vpop.f32.mrb[6].mxu0 }
 0x2ad   : > { %v2173_v62 = vsel %vm2171_vm1, %v2164_v58, 0  ;;  %v1701_v63 = vpop.f32.mrb[7].mxu0  ;;  %v7014_v58 = vld [vmem:[#allocation19 + $0x8] ss:$12 sps:$4 sm:$0xff]  }
 0x2ae   : > { %6182 = vmatpush3.bf16.msra.mxu0 %v2173_v62  ;;  %v7017_v60 = vld [vmem:[#allocation19 + $0x1c] ss:$12 sps:$4 sm:$0xff]   ;;  %v7015_v62 = vld [vmem:[#allocation19 + $0x18] ss:$12 sps:$4 sm:$0xff]   ;;  %v7018_v63 = vld [vmem:[#allocation19 + $0x20] ss:$12 sps:$4 sm:$0xff]  }
 0x2af   : > { %6187 = vmatprep.subr.bf16.mxu0 %v8092_v61 }
 0x2b1   : > { %6184 = vmatmul.mubr.msk.bf16.vlgmr.msra.gmra.mrb[16].mxu0 %vm2167_vm2, %v941_v1  ;;  %v7021_v1 = vld [vmem:[#allocation19 + $0x34] ss:$12 sps:$4 sm:$0xff]  }
 0x2b2   : > { %6189 = vmatprep.mubr.msk.bf16.mxu0 %vm8093_vm0, %v8092_v61 }
 0x2ca   : > { %v1906_v2 = vpop.f32.mrb[8].mxu0 }
 0x2cb   : > { %v2165_v3 = vpack.c.bf16 %v1906_v2, %v1906_v2  ;;  %v8761_v4 = vpop.f32.mrb[9].mxu0  ;;  %v7019_v2 = vld [vmem:[#allocation19 + $0x30] ss:$12 sps:$4 sm:$0xff]  }
 0x2cc   : > { %v1910_v5 = vpop.f32.mrb[10].mxu0 }
 0x2cd   : > { %v2222_v6 = vsel %vm2171_vm1, %v2165_v3, 0  ;;  %v1911_v7 = vpop.f32.mrb[11].mxu0  ;;  %v7022_v3 = vld [vmem:[#allocation19 + $0x38] ss:$12 sps:$4 sm:$0xff]  }
 0x2ce   : > { %6188 = vmatpush3.bf16.msra.mxu0 %v2222_v6  ;;  %v7025_v5 = vld [vmem:[#allocation19 + $0x4c] ss:$12 sps:$4 sm:$0xff]   ;;  %v7023_v6 = vld [vmem:[#allocation19 + $0x48] ss:$12 sps:$4 sm:$0xff]   ;;  %v7026_v7 = vld [vmem:[#allocation19 + $0x50] ss:$12 sps:$4 sm:$0xff]  }
 0x2cf   : > { %6193 = vmatprep.subr.bf16.mxu0 %v8092_v61 }
 0x2d1   : > { %6190 = vmatmul.mubr.msk.bf16.vlgmr.msra.gmra.mrb[20].mxu0 %vm2167_vm2, %v940_v8  ;;  %v7029_v8 = vld [vmem:[#allocation19 + $0x64] ss:$12 sps:$4 sm:$0xff]  }
 0x2d2   : > { %6195 = vmatprep.mubr.msk.bf16.mxu0 %vm8093_vm0, %v8092_v61 }
 0x2ea   : > { %v2116_v9 = vpop.f32.mrb[12].mxu0 }
 0x2eb   : > { %v2166_v10 = vpack.c.bf16 %v2116_v9, %v2116_v9  ;;  %v8770_v11 = vpop.f32.mrb[13].mxu0  ;;  %v7027_v9 = vld [vmem:[#allocation19 + $0x60] ss:$12 sps:$4 sm:$0xff]  }
 0x2ec   : > { %v2120_v12 = vpop.f32.mrb[14].mxu0 }
 0x2ed   : > { %v2271_v13 = vsel %vm2171_vm1, %v2166_v10, 0  ;;  %v2121_v14 = vpop.f32.mrb[15].mxu0  ;;  %v7030_v10 = vld [vmem:[#allocation19 + $0x68] ss:$12 sps:$4 sm:$0xff]   ;;  %v7031_v12 = vld [vmem:[#allocation19 + $0x78] ss:$12 sps:$4 sm:$0xff]  }
 0x2ee   : > { %6194 = vmatpush3.bf16.msra.mxu0 %v2271_v13  ;;  %v7033_v13 = vld [vmem:[#allocation19 + $0x7c] ss:$12 sps:$4 sm:$0xff]   ;;  %v7034_v14 = vld [vmem:[#allocation19 + $0x80] ss:$12 sps:$4 sm:$0xff]  }
 0x2ef   : > { %6199 = vmatprep.subr.bf16.mxu0 %v8092_v61 }
 0x2f1   : > { %6196 = vmatmul.mubr.msk.bf16.vlgmr.msra.gmra.mrb[24].mxu0 %vm2167_vm2, %v939_v15  ;;  %v7037_v15 = vld [vmem:[#allocation19 + $0x94] ss:$12 sps:$4 sm:$0xff]  }
 0x2f2   : > { %6200 = vmatpush3.bf16.msra.mxu0 %v2320_v55  ;;  %6201 = vmatprep.mubr.msk.bf16.mxu0 %vm8093_vm0, %v8092_v61 }
 0x2f3   : > { %6205 = vmatprep.subr.bf16.mxu0 %v8092_v61 }
 0x2f9   : > { %6202 = vmatmul.mubr.msk.bf16.vlgmr.msra.gmra.mrb[28].mxu0 %vm2167_vm2, %v944_v16  ;;  %v7035_v16 = vld [vmem:[#allocation19 + $0x90] ss:$12 sps:$4 sm:$0xff]  }
 0x2fa   : > { %6206 = vmatpush3.bf16.msra.mxu0 %v2320_v55  ;;  %6207 = vmatprep.mubr.msk.bf16.mxu0 %vm8093_vm0, %v8092_v61  ;;  %v942_v55 = vld [vmem:[%s765_s5] sm:$0xf] }
 0x2fb   : > { %6217 = vmatprep.subr.bf16.mxu0 %v7003_v17  ;;  %6214 = vmatmul.mubr.msk.bf16.vlgmr.msra.gmra.mrb[16].mxu1 %vm2167_vm2, %v942_v55 }
 0x2fc   : > { %2739 = vmatprep.mubr.bf16.mxu1 %v8091_v0  ;;  %2708 = vmatpush1.bf16.msra.mxu1 %v7011_v57 }
 0x2fd   : > { %2709 = vmatprep.subr.bf16.mxu1 %v7017_v60 }
 0x300   : > { %2710 = vmatpush1.bf16.msra.mxu1 %v7015_v62 }
 0x301   : > { %6208 = vmatmul.mubr.msk.bf16.vlgmr.msra.gmra.mrb[32].mxu0 %vm2167_vm2, %v943_v18  ;;  %2711 = vmatprep.subr.bf16.mxu1 %v7021_v1  ;;  %v7041_v18 = vld [vmem:[#allocation19 + $0xac] ss:$12 sps:$4 sm:$0xff]  }
 0x302   : > { %6218 = vmatpush3.bf16.msra.mxu0 %v7003_v17  ;;  %v7038_v17 = vld [vmem:[#allocation19 + $0x98] ss:$12 sps:$4 sm:$0xff]  }
 0x303   : > { %6219 = vmatprep.subr.bf16.mxu0 %v7004_v19 }
 0x304   : > { %2712 = vmatpush1.bf16.msra.mxu1 %v7019_v2 }
 0x305   : > { %2713 = vmatprep.subr.bf16.mxu1 %v7025_v5 }
 0x306   : > { %6220 = vmatpush3.bf16.msra.mxu0 %v7004_v19  ;;  %v7039_v19 = vld [vmem:[#allocation19 + $0xa8] ss:$12 sps:$4 sm:$0xff]  }
 0x307   : > { %6221 = vmatprep.subr.bf16.mxu0 %v7005_v20 }
 0x308   : > { %2714 = vmatpush1.bf16.msra.mxu1 %v7023_v6  ;;  %v7043_v6 = vld [vmem:[#allocation19 + $0xc0] ss:$12 sps:$4 sm:$0xff]  }
 0x309   : > { %2715 = vmatprep.subr.bf16.mxu1 %v7029_v8  ;;  %v7048_v8 = vld [vmem:[#allocation19 + $0xdc] ss:$12 sps:$4 sm:$0xff]  }
 0x30a   : > { %6222 = vmatpush3.bf16.msra.mxu0 %v7005_v20  ;;  %v7042_v20 = vld [vmem:[#allocation19 + $0xb0] ss:$12 sps:$4 sm:$0xff]  }
 0x30b   : > { %6223 = vmatprep.subr.bf16.mxu0 %v7006_v21 }
 0x30c   : > { %2716 = vmatpush1.bf16.msra.mxu1 %v7027_v9  ;;  %v7075_v9 = vld [vmem:[#allocation20] sm:$0xff]  }
 0x30d   : > { %2717 = vmatprep.subr.bf16.mxu1 %v7033_v13  ;;  %v7057_v13 = vld [vmem:[#allocation19 + $0x124] ss:$12 sps:$4 sm:$0xff]  }
 0x30e   : > { %6224 = vmatpush3.bf16.msra.mxu0 %v7006_v21  ;;  %v7045_v21 = vld [vmem:[#allocation19 + $0xc4] ss:$12 sps:$4 sm:$0xff]  }
 0x30f   : > { %6225 = vmatprep.subr.bf16.mxu0 %v7007_v22 }
 0x310   : > { %2718 = vmatpush1.bf16.msra.mxu1 %v7031_v12  ;;  %v7052_v12 = vld [vmem:[#allocation19 + $0x108] ss:$12 sps:$4 sm:$0xff]  }
 0x311   : > { %2719 = vmatprep.subr.bf16.mxu1 %v7037_v15  ;;  %v7060_v15 = vld [vmem:[#allocation19 + $0x13c] ss:$12 sps:$4 sm:$0xff]  }
 0x312   : > { %6226 = vmatpush3.bf16.msra.mxu0 %v7007_v22  ;;  %v8817_v22 = vpop.f32.mrb[4].mxu1 }
 0x313   : > { %6227 = vmatprep.subr.bf16.mxu0 %v7008_v23 }
 0x314   : > { %2720 = vmatpush1.bf16.msra.mxu1 %v7035_v16  ;;  %v7058_v16 = vld [vmem:[#allocation19 + $0x138] ss:$12 sps:$4 sm:$0xff]  }
 0x315   : > { %2721 = vmatprep.subr.bf16.mxu1 %v7041_v18  ;;  %v7061_v18 = vld [vmem:[#allocation19 + $0x150] ss:$12 sps:$4 sm:$0xff]  }
 0x316   : > { %6228 = vmatpush3.bf16.msra.mxu0 %v7008_v23  ;;  %v6139_v23 = vpop.f32.mrb[5].mxu1 }
 0x317   : > { %6229 = vmatprep.subr.bf16.mxu0 %v7009_v24 }
 0x318   : > { %2722 = vmatpush1.bf16.msra.mxu1 %v7039_v19  ;;  %v7066_v19 = vld [vmem:[#allocation19 + $0x16c] ss:$12 sps:$4 sm:$0xff]  }
 0x319   : > { %3027 = vmatprep.subr.bf16.mxu1 %v7045_v21  ;;  %v7064_v21 = vld [vmem:[#allocation19 + $0x168] ss:$12 sps:$4 sm:$0xff]  }
 0x31a   : > { %6230 = vmatpush3.bf16.msra.mxu0 %v7009_v24  ;;  %v1740_v24 = vpop.f32.mrb[6].mxu1 }
 0x31b   : > { %6231 = vmatprep.subr.bf16.mxu0 %v7010_v25  ;;  %v7067_v24 = vld [vmem:[#allocation19 + $0xc8] ss:$12 sps:$4 sm:$0xff]  }
 0x31e   : > { %6232 = vmatpush3.bf16.msra.mxu0 %v7010_v25  ;;  %v6140_v25 = vpop.f32.mrb[7].mxu1 }
 0x31f   : > { %6237 = vmatprep.subr.bf16.mxu0 %v8092_v61 }
 0x384   : > { %v2209_v26 = vpop.f32.mrb[16].mxu0 }
 0x385   : > { %v6185_v27 = vpop.f32.mrb[17].mxu0  ;;  %v2216_v30 = vmul.f32 0.01, %v2209_v26  ;;  %vm2215_vm3 = vcmp.ge.f32.partialorder %v2209_v26, 0.0 }
 0x386   : > { %v2212_v28 = vpop.f32.mrb[18].mxu0 }
 0x387   : > { %v6186_v29 = vpop.f32.mrb[19].mxu0  ;;  %v8789_v32 = vsel %vm2215_vm3, %v2209_v26, %v2216_v30  ;;  %v8819_v26 = vpop.f32.mrb[8].mxu1 }
 0x388   : > { %v6159_v27 = vpop.f32.mrb[9].mxu1 }
 0x389   : > { %v1950_v28 = vpop.f32.mrb[10].mxu1  ;;  %v7068_v27 = vld [vmem:[#allocation19 + $0xe0] ss:$12 sps:$4 sm:$0xff]  }
 0x38a   : > { %v6160_v29 = vpop.f32.mrb[11].mxu1  ;;  %v7069_v28 = vld [vmem:[#allocation19 + $0xf8] ss:$12 sps:$4 sm:$0xff]  }
 0x38b   : > { %v8821_v30 = vpop.f32.mrb[12].mxu1  ;;  %v7070_v29 = vld [vmem:[#allocation19 + $0x110] ss:$12 sps:$4 sm:$0xff]  }
 0x3a4   : > { %v2258_v31 = vpop.f32.mrb[20].mxu0 }
 0x3a5   : > { %vm2264_vm4 = vcmp.ge.f32.partialorder %v2258_v31, 0.0  ;;  %v2265_v33 = vmul.f32 0.01, %v2258_v31  ;;  %v6191_v34 = vpop.f32.mrb[21].mxu0 }
 0x3a6   : > { %v2261_v35 = vpop.f32.mrb[22].mxu0 }
 0x3a7   : > { %v8791_v36 = vsel %vm2264_vm4, %v2258_v31, %v2265_v33  ;;  %v6192_v37 = vpop.f32.mrb[23].mxu0  ;;  %v6179_v31 = vpop.f32.mrb[13].mxu1 }
 0x3a8   : > { %v2457_v38 = vpack.c.bf16 %v8791_v36, %v8789_v32  ;;  %v2160_v33 = vpop.f32.mrb[14].mxu1  ;;  %v7072_v31 = vld [vmem:[#allocation19 + $0x140] ss:$12 sps:$4 sm:$0xff]  }
 0x3a9   : > { %v6180_v34 = vpop.f32.mrb[15].mxu1 }
 0x3aa   : > { %6233 = vmatprep.mubr.bf16.mxu0 %v2457_v38 }
 0x3c4   : > { %v2307_v39 = vpop.f32.mrb[24].mxu0 }
 0x3c5   : > { %vm2313_vm5 = vcmp.ge.f32.partialorder %v2307_v39, 0.0  ;;  %v2314_v40 = vmul.f32 0.01, %v2307_v39  ;;  %v6197_v41 = vpop.f32.mrb[25].mxu0 }
 0x3c6   : > { %v2310_v42 = vpop.f32.mrb[26].mxu0 }
 0x3c7   : > { %v8795_v43 = vsel %vm2313_vm5, %v2307_v39, %v2314_v40  ;;  %v6198_v44 = vpop.f32.mrb[27].mxu0 }
 0x3c8   : > { %v2458_v45 = vpack.c.bf16 %v8795_v43, %v8795_v43 }
 0x3ca   : > { %6234 = vmatmul.mubr.bf16.vlgmr.msra.gmra.mrb[36].mxu0 %v2458_v45 }
 0x3cb   : > { %6253 = vmatprep.mubr.msk.bf16.mxu0 %vm8093_vm0, %v8092_v61  ;;  %6238 = vmatpush3.bf16.msra.mxu0 %v7014_v58 }
 0x3cc   : > { %v8801_v46 = vpop.f32.mrb[28].mxu0  ;;  %6239 = vmatprep.subr.bf16.mxu0 %v8092_v61 }
 0x3cd   : > { %v6203_v47 = vpop.f32.mrb[29].mxu0  ;;  %vm2362_vm6 = vcmp.ge.f32.partialorder %v8801_v46, 0.0 }
 0x3ce   : > { %v2359_v48 = vpop.f32.mrb[30].mxu0  ;;  %v8843_v33 = vpop.f32.mrb[16].mxu1 }
 0x3cf   : > { %v6204_v49 = vpop.f32.mrb[31].mxu0  ;;  %6240 = vmatpush3.bf16.msra.mxu0 %v7018_v63  ;;  %v6215_v34 = vpop.f32.mrb[17].mxu1  ;;  %vm2454_vm8 = vcmp.ge.f32.partialorder %v8843_v33, 0.0 }
 0x3d0   : > { %6241 = vmatprep.subr.bf16.mxu0 %v8092_v61 }
 0x3d3   : > { %6242 = vmatpush3.bf16.msra.mxu0 %v7022_v3 }
 0x3d4   : > { %v8803_v50 = vpop.f32.mrb[32].mxu0  ;;  %6243 = vmatprep.subr.bf16.mxu0 %v8092_v61 }
 0x3d5   : > { %v6209_v51 = vpop.f32.mrb[33].mxu0  ;;  %v2409_v34 = vmul.f32 0.01, %v8803_v50  ;;  %vm2408_vm7 = vcmp.ge.f32.partialorder %v8803_v50, 0.0 }
 0x3d6   : > { %v2405_v52 = vpop.f32.mrb[34].mxu0 }
 0x3d7   : > { %v6210_v54 = vpop.f32.mrb[35].mxu0  ;;  %6244 = vmatpush3.bf16.msra.mxu0 %v7026_v7 }
 0x3d8   : > { %6245 = vmatprep.subr.bf16.mxu0 %v8092_v61 }
 0x3db   : > { %6246 = vmatpush3.bf16.msra.mxu0 %v7030_v10  ;;  %v7054_v10 = vld [vmem:[#allocation19 + $0x10c] ss:$12 sps:$4 sm:$0xff]  }
 0x3dc   : > { %6247 = vmatprep.subr.bf16.mxu0 %v8092_v61 }
 0x3df   : > { %6248 = vmatpush3.bf16.msra.mxu0 %v7034_v14  ;;  %v7055_v14 = vld [vmem:[#allocation19 + $0x120] ss:$12 sps:$4 sm:$0xff]  }
 0x3e0   : > { %6249 = vmatprep.subr.bf16.mxu0 %v8092_v61 }
 0x3e3   : > { %6250 = vmatpush3.bf16.msra.mxu0 %v7038_v17  ;;  %v7063_v17 = vld [vmem:[#allocation19 + $0x154] ss:$12 sps:$4 sm:$0xff]  }
 0x3e4   : > { %6251 = vmatprep.subr.bf16.mxu0 %v8092_v61 }
 0x3e7   : > { %6252 = vmatpush3.bf16.msra.mxu0 %v7042_v20  ;;  %v2363_v20 = vmul.f32 0.01, %v8801_v46 }
 0x3e8   : > { %6257 = vmatprep.subr.bf16.mxu0 %v8092_v61 }
 0x3e9   : > { %v2364_v23 = vsel %vm2362_vm6, %v8801_v46, %v2363_v20  ;;  %v7071_v46 = vld [vmem:[#allocation19 + $0x128] ss:$12 sps:$4 sm:$0xff]   ;;  %v7091_v20 = vld [vmem:[#allocation19 + $0x1b0] ss:$12 sps:$4 sm:$0xff]  }
 0x3ea   : > { %v2898_v25 = vpack.c.bf16 %v2364_v23, %v2364_v23  ;;  %v7095_v23 = vld [vmem:[#allocation19 + $0x1c8] ss:$12 sps:$4 sm:$0xff]  }
 0x49d   : > { %v6235_v35 = vpop.f32.mrb[36].mxu0 }
 0x49e   : > { %v2557_v37 = vadd.f32 %v6235_v35, %v8749_v53  ;;  %v2541_v38 = vpop.f32.mrb[37].mxu0  ;;  %v2451_v35 = vpop.f32.mrb[18].mxu1 }
 0x49f   : > { %v2555_v39 = vadd.f32 %v2541_v38, %v8749_v53  ;;  %v6236_v40 = vpop.f32.mrb[38].mxu0  ;;  %v7073_v38 = vld [vmem:[#allocation19 + $0x158] ss:$12 sps:$4 sm:$0xff]   ;;  %v7111_v35 = vld [vmem:[#allocation19 + $0x228] ss:$12 sps:$4 sm:$0xff]  }
 0x4a0   : > { %v2544_v41 = vpop.f32.mrb[39].mxu0  ;;  %v7076_v40 = vld [vmem:[#allocation20 + $0x8] sm:$0xff]  }
 0x4a1   : > { %v2556_v42 = vadd.f32 %v2544_v41, %v8749_v53  ;;  %v7077_v41 = vld [vmem:[#allocation20 + $0x10] sm:$0xff]  }
 0x4a3   : > { %v2558_v44 = vmax.f32 %v2555_v39, %v2556_v42 }
 0x4a5   : > { %v2559_v45 = vmax.f32 %v2558_v44, %v2557_v37  ;;  %v7079_v44 = vld [vmem:[#allocation20 + $0x20] sm:$0xff]  }
 0x4a7   : > { %v2560_v47 = vsub.f32 %v2555_v39, %v2559_v45  ;;  %v2563_v48 = vsub.f32 %v2556_v42, %v2559_v45  ;;  %v2566_v49 = vsub.f32 %v2557_v37, %v2559_v45  ;;  %v6216_v37 = vpop.f32.mrb[19].mxu1  ;;  %v7074_v39 = vld [vmem:[#allocation19 + $0x170] ss:$12 sps:$4 sm:$0xff]   ;;  %v7080_v45 = vld [vmem:[#allocation20 + $0x28] sm:$0xff]  }
 0x4a8   : > { %v7078_v42 = vld [vmem:[#allocation20 + $0x18] sm:$0xff]   ;;  %v2410_v37 = vsel %vm2408_vm7, %v8803_v50, %v2409_v34  ;;  %v7167_v34 = vld [vmem:[#allocation20 + $0xe0] sm:$0xff]  }
 0x4a9   : > { %v2561_v51 = vmul.f32 1.442695, %v2560_v47  ;;  %v2564_v52 = vmul.f32 1.442695, %v2563_v48  ;;  %v2567_v54 = vmul.f32 1.442695, %v2566_v49 }
 0x4aa   : > { %v7081_v47 = vld [vmem:[#allocation20 + $0x30] sm:$0xff]   ;;  %v7082_v48 = vld [vmem:[#allocation20 + $0x38] sm:$0xff]  }
 0x4ab   : > { %7171 = vpow2.f32 %v2561_v51  ;;  %v7085_v49 = vld [vmem:[#allocation19 + $0x184] ss:$12 sps:$4 sm:$0xff]  }
 0x4ac   : > { %7173 = vpow2.f32 %v2564_v52  ;;  %v7086_v51 = vld [vmem:[#allocation20 + $0x40] sm:$0xff]   ;;  %v7090_v52 = vld [vmem:[#allocation20 + $0x48] sm:$0xff]  }
 0x4ad   : > { %7175 = vpow2.f32 %v2567_v54  ;;  %v7094_v54 = vld [vmem:[#allocation20 + $0x50] sm:$0xff]   ;;  %v7120_v50 = vld [vmem:[#allocation19 + $0x258] ss:$12 sps:$4 sm:$0xff]  }
 0x4b5   : > { %v7172_v55 = vpop.eup %7171 }
 0x4b6   : > { %v7174_v56 = vpop.eup %7173  ;;  %v2572_v57 = vmul.f32 %v7172_v55, %v8789_v32  ;;  %v7046_v32 = vld [vmem:[#allocation19 + $0xd8] ss:$12 sps:$4 sm:$0xff]  }
 0x4b7   : > { %v7176_v58 = vpop.eup %7175  ;;  %v2569_v60 = vadd.f32 %v7174_v56, %v7172_v55  ;;  %v2573_v62 = vmul.f32 %v7174_v56, %v8791_v36  ;;  %v7051_v36 = vld [vmem:[#allocation19 + $0xf4] ss:$12 sps:$4 sm:$0xff]   ;;  %v7098_v55 = vld [vmem:[#allocation20 + $0x58] sm:$0xff]  }
 0x4b8   : > { %v2575_v1 = vmul.f32 %v7176_v58, %v8795_v43  ;;  %v7049_v43 = vld [vmem:[#allocation19 + $0xf0] ss:$12 sps:$4 sm:$0xff]   ;;  %v7102_v56 = vld [vmem:[#allocation20 + $0x60] sm:$0xff]  }
 0x4b9   : > { %v2570_v53 = vadd.f32 %v7176_v58, %v2569_v60  ;;  %v2574_v63 = vadd.f32 %v2573_v62, %v2572_v57  ;;  %v7106_v57 = vld [vmem:[#allocation20 + $0x68] sm:$0xff]   ;;  %v7110_v58 = vld [vmem:[#allocation20 + $0x70] sm:$0xff]   ;;  %v7114_v60 = vld [vmem:[#allocation20 + $0x78] sm:$0xff]  }
 0x4ba   : > { %v7118_v62 = vld [vmem:[#allocation19 + $0x244] ss:$12 sps:$4 sm:$0xff]  }
 0x4bb   : > { %7177 = vrcp.f32 %v2570_v53  ;;  %v2576_v2 = vadd.f32 %v2575_v1, %v2574_v63 }
 0x4c5   : > { %v7178_v3 = vpop.eup %7177 }
 0x4c6   : > { %v2577_v5 = vmul.f32 %v7178_v3, %v2576_v2 }
 0x4c8   : > { %v2578_v7 = vpack.c.bf16 %v2577_v5, %v2577_v5 }
 0x4ca   : > { %2740 = vmatmul.mubr.bf16.vlgmr.msra.gmra.mrb[0].mxu1 %v2578_v7  ;;  %6254 = vmatmul.mubr.bf16.vlgmr.msra.gmra.mrb[40].mxu0 %v2578_v7 }
 0x4cb   : > { %3028 = vmatpush1.bf16.msra.mxu1 %v7043_v6  ;;  %3059 = vmatprep.mubr.bf16.mxu1 %v8091_v0 }
 0x4cc   : > { %3029 = vmatprep.subr.bf16.mxu1 %v7048_v8  ;;  %6258 = vmatpush3.bf16.msra.mxu0 %v7075_v9  ;;  %v8867_v8 = vld [vmem:[%s8683_s19] sm:$0xff]  ;;  %s7889_s19 = sshll.u32 %s8094_s20, 4  ;;  %s7890_s19 = int_to_ptr.vmem [resolvable:$false] %s7889_s19 }
 0x4cd   : > { %6259 = vmatprep.subr.bf16.mxu0 %v8092_v61  ;;  %6273 = vmatprep.mubr.msk.bf16.mxu0 %vm8093_vm0, %v8092_v61  ;;  %p7892_p6 = scmp.lt.s32.totalorder %s5144_s14, %s7890_s19 }
 0x4cf   : > { %3030 = vmatpush1.bf16.msra.mxu1 %v7046_v32  ;;  %v7083_v32 = vld [vmem:[#allocation19 + $0x180] ss:$12 sps:$4 sm:$0xff]  }
 0x4d0   : > { %3031 = vmatprep.subr.bf16.mxu1 %v7051_v36  ;;  %6260 = vmatpush3.bf16.msra.mxu0 %v7076_v40  ;;  %v8878_v40 = vpack.c.bf16 %v2410_v37, %v2410_v37  ;;  %v7169_v37 = vld [vmem:[#allocation20 + $0xf0] sm:$0xff]  }
 0x4d1   : > { %6261 = vmatprep.subr.bf16.mxu0 %v8092_v61 }
 0x4d3   : > { %3032 = vmatpush1.bf16.msra.mxu1 %v7049_v43  ;;  %v7089_v43 = vld [vmem:[#allocation19 + $0x19c] ss:$12 sps:$4 sm:$0xff]  }
 0x4d4   : > { %3033 = vmatprep.subr.bf16.mxu1 %v7054_v10  ;;  %6262 = vmatpush3.bf16.msra.mxu0 %v7077_v41  ;;  %v8883_v41 = vld [vmem:[%s792_s10] sm:$0xff]  ;;  %s9486_s10 = sld [smem:[#allocation55_spill]] }
 0x4d5   : > { %6263 = vmatprep.subr.bf16.mxu0 %v8092_v61 }
 0x4d7   : > { %3034 = vmatpush1.bf16.msra.mxu1 %v7052_v12  ;;  %v7087_v12 = vld [vmem:[#allocation19 + $0x198] ss:$12 sps:$4 sm:$0xff]  }
 0x4d8   : > { %3035 = vmatprep.subr.bf16.mxu1 %v7057_v13  ;;  %6264 = vmatpush3.bf16.msra.mxu0 %v7078_v42 }
 0x4d9   : > { %6265 = vmatprep.subr.bf16.mxu0 %v8092_v61 }
 0x4db   : > { %3036 = vmatpush1.bf16.msra.mxu1 %v7055_v14 }
 0x4dc   : > { %3037 = vmatprep.subr.bf16.mxu1 %v7060_v15  ;;  %6266 = vmatpush3.bf16.msra.mxu0 %v7079_v44  ;;  %v7093_v15 = vld [vmem:[#allocation19 + $0x1b4] ss:$12 sps:$4 sm:$0xff]  }
 0x4dd   : > { %6267 = vmatprep.subr.bf16.mxu0 %v8092_v61  ;;  %v7116_v44 = vld [vmem:[#allocation19 + $0x240] ss:$12 sps:$4 sm:$0xff]  }
 0x4df   : > { %3038 = vmatpush1.bf16.msra.mxu1 %v7058_v16 }
 0x4e0   : > { %3039 = vmatprep.subr.bf16.mxu1 %v7063_v17  ;;  %6268 = vmatpush3.bf16.msra.mxu0 %v7080_v45 }
 0x4e1   : > { %6269 = vmatprep.subr.bf16.mxu0 %v8092_v61 }
 0x4e3   : > { %3040 = vmatpush1.bf16.msra.mxu1 %v7061_v18 }
 0x4e4   : > { %3041 = vmatprep.subr.bf16.mxu1 %v7066_v19  ;;  %6270 = vmatpush3.bf16.msra.mxu0 %v7081_v47  ;;  %v7122_v47 = vld [vmem:[#allocation19 + $0x25c] ss:$12 sps:$4 sm:$0xff]  }
 0x4e5   : > { %6271 = vmatprep.subr.bf16.mxu0 %v8092_v61 }
 0x4e7   : > { %3042 = vmatpush1.bf16.msra.mxu1 %v7064_v21  ;;  %v7097_v21 = vld [vmem:[#allocation19 + $0x1cc] ss:$12 sps:$4 sm:$0xff]  }
 0x4e8   : > { %6277 = vmatprep.subr.bf16.mxu1 %v8092_v61  ;;  %6272 = vmatpush3.bf16.msra.mxu0 %v7082_v48  ;;  %v7119_v48 = vld [vmem:[#allocation19 + $0x1a0] ss:$12 sps:$4 sm:$0xff]  }
 0x4e9   : > { %3347 = vmatprep.subr.bf16.mxu0 %v7085_v49  ;;  %v7126_v49 = vld [vmem:[#allocation19 + $0x274] ss:$12 sps:$4 sm:$0xff]  }
 0x4ea   : > { %3060 = vmatmul.mubr.bf16.vlgmr.msra.gmra.mrb[20].mxu1 %v2898_v25 }
 0x4eb   : > { %6278 = vmatpush3.bf16.msra.mxu1 %v7067_v24  ;;  %6293 = vmatprep.mubr.msk.bf16.mxu1 %vm8093_vm0, %v8092_v61  ;;  %v7101_v24 = vld [vmem:[#allocation19 + $0x1e4] ss:$12 sps:$4 sm:$0xff]  }
 0x4ec   : > { %6279 = vmatprep.subr.bf16.mxu1 %v8092_v61 }
 0x4ef   : > { %6280 = vmatpush3.bf16.msra.mxu1 %v7068_v27 }
 0x4f0   : > { %6281 = vmatprep.subr.bf16.mxu1 %v8092_v61 }
 0x4f3   : > { %6282 = vmatpush3.bf16.msra.mxu1 %v7069_v28 }
 0x4f4   : > { %6283 = vmatprep.subr.bf16.mxu1 %v8092_v61 }
 0x4f7   : > { %6284 = vmatpush3.bf16.msra.mxu1 %v7070_v29  ;;  %v7109_v29 = vld [vmem:[#allocation19 + $0x214] ss:$12 sps:$4 sm:$0xff]  }
 0x4f8   : > { %6285 = vmatprep.subr.bf16.mxu1 %v8092_v61 }
 0x4fb   : > { %6286 = vmatpush3.bf16.msra.mxu1 %v7071_v46  ;;  %v7107_v46 = vld [vmem:[#allocation19 + $0x210] ss:$12 sps:$4 sm:$0xff]  }
 0x4fc   : > { %6287 = vmatprep.subr.bf16.mxu1 %v8092_v61 }
 0x4ff   : > { %6288 = vmatpush3.bf16.msra.mxu1 %v7072_v31  ;;  %v7113_v31 = vld [vmem:[#allocation19 + $0x22c] ss:$12 sps:$4 sm:$0xff]  }
 0x500   : > { %6289 = vmatprep.subr.bf16.mxu1 %v8092_v61 }
 0x503   : > { %6290 = vmatpush3.bf16.msra.mxu1 %v7073_v38 }
 0x504   : > { %6291 = vmatprep.subr.bf16.mxu1 %v8092_v61 }
 0x507   : > { %6292 = vmatpush3.bf16.msra.mxu1 %v7074_v39  ;;  %v7115_v39 = vld [vmem:[#allocation19 + $0x188] ss:$12 sps:$4 sm:$0xff]  }
 0x508   : > { %6297 = vmatprep.subr.bf16.mxu1 %v8092_v61 }
 0x50a   : > { %6294 = vmatmul.mubr.bf16.vlgmr.msra.gmra.mrb[24].mxu1 %v2898_v25  ;;  %v7105_v25 = vld [vmem:[#allocation19 + $0x1fc] ss:$12 sps:$4 sm:$0xff]  }
 0x50b   : > { %6313 = vmatprep.mubr.msk.bf16.mxu1 %vm8093_vm0, %v8092_v61  ;;  %6298 = vmatpush3.bf16.msra.mxu1 %v7086_v51  ;;  %v7123_v51 = vld [vmem:[#allocation19 + $0x1b8] ss:$12 sps:$4 sm:$0xff]  }
 0x50c   : > { %6299 = vmatprep.subr.bf16.mxu1 %v8092_v61 }
 0x50f   : > { %6300 = vmatpush3.bf16.msra.mxu1 %v7090_v52  ;;  %v7124_v52 = vld [vmem:[#allocation19 + $0x270] ss:$12 sps:$4 sm:$0xff]  }
 0x510   : > { %6301 = vmatprep.subr.bf16.mxu1 %v8092_v61 }
 0x513   : > { %6302 = vmatpush3.bf16.msra.mxu1 %v7094_v54  ;;  %v7130_v54 = vld [vmem:[#allocation19 + $0x28c] ss:$12 sps:$4 sm:$0xff]  }
 0x514   : > { %6303 = vmatprep.subr.bf16.mxu1 %v8092_v61 }
 0x517   : > { %6304 = vmatpush3.bf16.msra.mxu1 %v7098_v55  ;;  %v7127_v55 = vld [vmem:[#allocation19 + $0x1d0] ss:$12 sps:$4 sm:$0xff]  }
 0x518   : > { %6305 = vmatprep.subr.bf16.mxu1 %v8092_v61 }
 0x51b   : > { %6306 = vmatpush3.bf16.msra.mxu1 %v7102_v56  ;;  %v7128_v56 = vld [vmem:[#allocation19 + $0x288] ss:$12 sps:$4 sm:$0xff]  }
 0x51c   : > { %6307 = vmatprep.subr.bf16.mxu1 %v8092_v61 }
 0x51f   : > { %6308 = vmatpush3.bf16.msra.mxu1 %v7106_v57  ;;  %v7134_v57 = vld [vmem:[#allocation19 + $0x2a4] ss:$12 sps:$4 sm:$0xff]  }
 0x520   : > { %6309 = vmatprep.subr.bf16.mxu1 %v8092_v61 }
 0x523   : > { %6310 = vmatpush3.bf16.msra.mxu1 %v7110_v58  ;;  %v7131_v58 = vld [vmem:[#allocation19 + $0x1e8] ss:$12 sps:$4 sm:$0xff]  }
 0x524   : > { %6311 = vmatprep.subr.bf16.mxu1 %v8092_v61 }
 0x527   : > { %6312 = vmatpush3.bf16.msra.mxu1 %v7114_v60  ;;  %v7132_v60 = vld [vmem:[#allocation19 + $0x2a0] ss:$12 sps:$4 sm:$0xff]  }
 0x528   : > { %3667 = vmatprep.subr.bf16.mxu1 %v7118_v62  ;;  %v7138_v62 = vld [vmem:[#allocation19 + $0x2bc] ss:$12 sps:$4 sm:$0xff]  }
 0x59d   : > { %v2741_v53 = vpop.f32.mrb[0].mxu1 }
 0x59e   : > { %v5743_v63 = vmul.f32 -1.442695, %v2741_v53  ;;  %v8864_v1 = vpop.f32.mrb[1].mxu1  ;;  %v7135_v53 = vld [vmem:[#allocation19 + $0x200] ss:$12 sps:$4 sm:$0xff]  }
 0x59f   : > { %v2745_v2 = vpop.f32.mrb[2].mxu1 }
 0x5a0   : > { %7179 = vpow2.f32 %v5743_v63  ;;  %v2746_v3 = vpop.f32.mrb[3].mxu1  ;;  %v7136_v63 = vld [vmem:[#allocation19 + $0x2b8] ss:$12 sps:$4 sm:$0xff]   ;;  %v7142_v2 = vld [vmem:[#allocation19 + $0x2d4] ss:$12 sps:$4 sm:$0xff]  }
 0x5a1   : > { %v7139_v3 = vld [vmem:[#allocation19 + $0x218] ss:$12 sps:$4 sm:$0xff]  }
 0x5aa   : > { %v7180_v5 = vpop.eup %7179 }
 0x5ab   : > { %v2792_v6 = vadd.f32 1.0, %v7180_v5  ;;  %v7140_v5 = vld [vmem:[#allocation19 + $0x2d0] ss:$12 sps:$4 sm:$0xff]  }
 0x5ad   : > { %7181 = vrcp.f32 %v2792_v6  ;;  %v7146_v6 = vld [vmem:[#allocation19 + $0x2ec] ss:$12 sps:$4 sm:$0xff]  }
 0x5b7   : > { %v7182_v7 = vpop.eup %7181 }
 0x5b8   : > { %v2802_v9 = vmul.f32 %v8867_v8, %v7182_v7  ;;  %v2455_v7 = vmul.f32 0.01, %v8843_v33 }
 0x5ba   : > { %v2803_v36 = vpack.c.bf16 %v2802_v9, %v2802_v9  ;;  %v7143_v9 = vld [vmem:[#allocation19 + $0x230] ss:$12 sps:$4 sm:$0xff]  }
 0x5bc   : > { %6274 = vmatmul.mubr.bf16.vlgmr.msra.gmra.mrb[40].mxu0 %v2803_v36  ;;  %v2456_v36 = vsel %vm2454_vm8, %v8843_v33, %v2455_v7  ;;  %v7149_v33 = vld [vmem:[#allocation19 + $0x278] ss:$12 sps:$4 sm:$0xff]  }
 0x5bd   : > { %v3061_v10 = vpop.f32.mrb[20].mxu1  ;;  %3348 = vmatpush1.bf16.msra.mxu0 %v7083_v32  ;;  %3379 = vmatprep.mubr.bf16.mxu0 %v8091_v0  ;;  %v7144_v32 = vld [vmem:[#allocation19 + $0x2e8] ss:$12 sps:$4 sm:$0xff]  }
 0x5be   : > { %v3108_v13 = vadd.f32 %v3061_v10, %v8752_v59  ;;  %v3063_v14 = vpop.f32.mrb[21].mxu1  ;;  %3349 = vmatprep.subr.bf16.mxu0 %v7089_v43  ;;  %v7099_v59 = vld [vmem:[#allocation19 + $0x1e0] ss:$12 sps:$4 sm:$0xff]   ;;  %v7147_v43 = vld [vmem:[#allocation19 + $0x248] ss:$12 sps:$4 sm:$0xff]   ;;  %v3538_v10 = vpack.c.bf16 %v2456_v36, %v2456_v36 }
 0x5bf   : > { %v8873_v16 = vadd.f32 %v3063_v14, %v8817_v22  ;;  %v3065_v17 = vpop.f32.mrb[22].mxu1  ;;  %v7103_v22 = vld [vmem:[#allocation19 + $0x1f8] ss:$12 sps:$4 sm:$0xff]   ;;  %v7151_v14 = vld [vmem:[#allocation19 + $0x2a8] ss:$12 sps:$4 sm:$0xff]  }
 0x5c0   : > { %v5777_v18 = vmul.f32 -1.442695, %v3108_v13  ;;  %v3066_v19 = vpop.f32.mrb[23].mxu1  ;;  %v7150_v13 = vld [vmem:[#allocation19 + $0x290] ss:$12 sps:$4 sm:$0xff]  }
 0x5c1   : > { %3350 = vmatpush1.bf16.msra.mxu0 %v7087_v12  ;;  %v7148_v12 = vld [vmem:[#allocation19 + $0x260] ss:$12 sps:$4 sm:$0xff]   ;;  %v7153_v17 = vld [vmem:[#allocation19 + $0x2d8] ss:$12 sps:$4 sm:$0xff]  }
 0x5c2   : > { %7183 = vpow2.f32 %v5777_v18  ;;  %3351 = vmatprep.subr.bf16.mxu0 %v7093_v15  ;;  %v7152_v15 = vld [vmem:[#allocation19 + $0x2c0] ss:$12 sps:$4 sm:$0xff]   ;;  %v7154_v18 = vld [vmem:[#allocation19 + $0x2f0] ss:$12 sps:$4 sm:$0xff]  }
 0x5c3   : > { %v7155_v19 = vld [vmem:[#allocation20 + $0x80] sm:$0xff]  }
 0x5c5   : > { %3352 = vmatpush1.bf16.msra.mxu0 %v7091_v20  ;;  %v7156_v20 = vld [vmem:[#allocation20 + $0x88] sm:$0xff]  }
 0x5c6   : > { %3353 = vmatprep.subr.bf16.mxu0 %v7097_v21  ;;  %v7157_v21 = vld [vmem:[#allocation20 + $0x90] sm:$0xff]  }
 0x5c9   : > { %3354 = vmatpush1.bf16.msra.mxu0 %v7095_v23  ;;  %v7158_v23 = vld [vmem:[#allocation20 + $0x98] sm:$0xff]  }
 0x5ca   : > { %3355 = vmatprep.subr.bf16.mxu0 %v7101_v24  ;;  %v7159_v24 = vld [vmem:[#allocation20 + $0xa0] sm:$0xff]  }
 0x5cc   : > { %v7184_v27 = vpop.eup %7183 }
 0x5cd   : > { %v3112_v28 = vadd.f32 1.0, %v7184_v27  ;;  %3356 = vmatpush1.bf16.msra.mxu0 %v7099_v59  ;;  %v7160_v59 = vld [vmem:[#allocation20 + $0xa8] sm:$0xff]   ;;  %v7162_v27 = vld [vmem:[#allocation20 + $0xb8] sm:$0xff]  }
 0x5ce   : > { %3357 = vmatprep.subr.bf16.mxu0 %v7105_v25  ;;  %v7161_v25 = vld [vmem:[#allocation20 + $0xb0] sm:$0xff]  }
 0x5cf   : > { %7185 = vrcp.f32 %v3112_v28  ;;  %v7285_v28 = vld [vmem:[#allocation16 + $0x4] ss:$16 sps:$4 sm:$0xff]  }
 0x5d1   : > { %3358 = vmatpush1.bf16.msra.mxu0 %v7103_v22  ;;  %v7163_v22 = vld [vmem:[#allocation20 + $0xc0] sm:$0xff]  }
 0x5d2   : > { %3359 = vmatprep.subr.bf16.mxu0 %v7109_v29  ;;  %v7164_v29 = vld [vmem:[#allocation20 + $0xc8] sm:$0xff]  }
 0x5d5   : > { %3360 = vmatpush1.bf16.msra.mxu0 %v7107_v46  ;;  %v7165_v46 = vld [vmem:[#allocation20 + $0xd0] sm:$0xff]  }
 0x5d6   : > { %3361 = vmatprep.subr.bf16.mxu0 %v7113_v31  ;;  %v7166_v31 = vld [vmem:[#allocation20 + $0xd8] sm:$0xff]  }
 0x5d9   : > { %v7186_v38 = vpop.eup %7185  ;;  %3362 = vmatpush1.bf16.msra.mxu0 %v7111_v35  ;;  %v7168_v35 = vld [vmem:[#allocation20 + $0xe8] sm:$0xff]  }
 0x5da   : > { %6317 = vmatprep.subr.bf16.mxu0 %v8092_v61  ;;  %v3122_v42 = vmul.f32 %v8883_v41, %v7186_v38  ;;  %v7170_v38 = vld [vmem:[#allocation20 + $0xf8] sm:$0xff]  }
 0x5dc   : > { %3380 = vmatmul.mubr.bf16.vlgmr.msra.gmra.mrb[44].mxu0 %v8878_v40  ;;  %v3123_v45 = vpack.c.bf16 %v3122_v42, %v3122_v42 }
 0x5dd   : > { %6318 = vmatpush3.bf16.msra.mxu0 %v7115_v39  ;;  %6333 = vmatprep.mubr.msk.bf16.mxu0 %vm8093_vm0, %v8092_v61  ;;  %v7286_v39 = vld [vmem:[#allocation17 + $0x4] ss:$12 sps:$4 sm:$0xff]  }
 0x5de   : > { %6314 = vmatmul.mubr.bf16.vlgmr.msra.gmra.mrb[24].mxu1 %v3123_v45  ;;  %6319 = vmatprep.subr.bf16.mxu0 %v8092_v61 }
 0x5df   : > { %3668 = vmatpush1.bf16.msra.mxu1 %v7116_v44  ;;  %3699 = vmatprep.mubr.bf16.mxu1 %v8091_v0 }
 0x5e0   : > { %3669 = vmatprep.subr.bf16.mxu1 %v7122_v47 }
 0x5e1   : > { %6320 = vmatpush3.bf16.msra.mxu0 %v7119_v48 }
 0x5e2   : > { %6321 = vmatprep.subr.bf16.mxu0 %v8092_v61 }
 0x5e3   : > { %3670 = vmatpush1.bf16.msra.mxu1 %v7120_v50 }
 0x5e4   : > { %3671 = vmatprep.subr.bf16.mxu1 %v7126_v49 }
 0x5e5   : > { %6322 = vmatpush3.bf16.msra.mxu0 %v7123_v51 }
 0x5e6   : > { %6323 = vmatprep.subr.bf16.mxu0 %v8092_v61 }
 0x5e7   : > { %3672 = vmatpush1.bf16.msra.mxu1 %v7124_v52 }
 0x5e8   : > { %3673 = vmatprep.subr.bf16.mxu1 %v7130_v54  ;;  %v5778_v54 = vmul.f32 -1.442695, %v8873_v16 }
 0x5e9   : > { %6324 = vmatpush3.bf16.msra.mxu0 %v7127_v55 }
 0x5ea   : > { %6325 = vmatprep.subr.bf16.mxu0 %v8092_v61 }
 0x5eb   : > { %3674 = vmatpush1.bf16.msra.mxu1 %v7128_v56 }
 0x5ec   : > { %3675 = vmatprep.subr.bf16.mxu1 %v7134_v57 }
 0x5ed   : > { %6326 = vmatpush3.bf16.msra.mxu0 %v7131_v58 }
 0x5ee   : > { %6327 = vmatprep.subr.bf16.mxu0 %v8092_v61 }
 0x5ef   : > { %3676 = vmatpush1.bf16.msra.mxu1 %v7132_v60 }
 0x5f0   : > { %3677 = vmatprep.subr.bf16.mxu1 %v7138_v62 }
 0x5f1   : > { %6328 = vmatpush3.bf16.msra.mxu0 %v7135_v53 }
 0x5f2   : > { %6329 = vmatprep.subr.bf16.mxu0 %v8092_v61 }
 0x5f3   : > { %3678 = vmatpush1.bf16.msra.mxu1 %v7136_v63 }
 0x5f4   : > { %3679 = vmatprep.subr.bf16.mxu1 %v7142_v2 }
 0x5f5   : > { %6330 = vmatpush3.bf16.msra.mxu0 %v7139_v3 }
 0x5f6   : > { %6331 = vmatprep.subr.bf16.mxu0 %v8092_v61 }
 0x5f7   : > { %3680 = vmatpush1.bf16.msra.mxu1 %v7140_v5 }
 0x5f8   : > { %3681 = vmatprep.subr.bf16.mxu1 %v7146_v6 }
 0x5f9   : > { %6332 = vmatpush3.bf16.msra.mxu0 %v7143_v9 }
 0x5fa   : > { %6337 = vmatprep.subr.bf16.mxu0 %v8092_v61 }
 0x5fb   : > { %3682 = vmatpush1.bf16.msra.mxu1 %v7144_v32 }
 0x5fc   : > { %6334 = vmatmul.mubr.bf16.vlgmr.msra.gmra.mrb[48].mxu0 %v8878_v40  ;;  %6357 = vmatprep.subr.bf16.mxu1 %v8092_v61  ;;  %v5744_v40 = vmul.f32 -1.442695, %v8864_v1 }
 0x5fd   : > { %6353 = vmatprep.mubr.msk.bf16.mxu0 %vm8093_vm0, %v8092_v61  ;;  %6338 = vmatpush3.bf16.msra.mxu0 %v7155_v19 }
 0x5fe   : > { %3700 = vmatmul.mubr.bf16.vlgmr.msra.gmra.mrb[28].mxu1 %v3538_v10  ;;  %6339 = vmatprep.subr.bf16.mxu0 %v8092_v61  ;;  %7187 = vpow2.f32 %v5744_v40  ;;  %v7300_v40 = vld [vmem:[#allocation16 + $0xc0] ss:$16 sps:$4 sm:$0xff]  }
 0x5ff   : > { %6358 = vmatpush3.bf16.msra.mxu1 %v7147_v43  ;;  %6373 = vmatprep.mubr.msk.bf16.mxu1 %vm8093_vm0, %v8092_v61 }
 0x600   : > { %6359 = vmatprep.subr.bf16.mxu1 %v8092_v61 }
 0x601   : > { %6340 = vmatpush3.bf16.msra.mxu0 %v7156_v20  ;;  %v7288_v20 = vld [vmem:[#allocation16] ss:$16 sps:$4 sm:$0xff]  }
 0x602   : > { %6341 = vmatprep.subr.bf16.mxu0 %v8092_v61 }
 0x603   : > { %6360 = vmatpush3.bf16.msra.mxu1 %v7148_v12 }
 0x604   : > { %6361 = vmatprep.subr.bf16.mxu1 %v8092_v61 }
 0x605   : > { %6342 = vmatpush3.bf16.msra.mxu0 %v7157_v21 }
 0x606   : > { %6343 = vmatprep.subr.bf16.mxu0 %v8092_v61 }
 0x607   : > { %6362 = vmatpush3.bf16.msra.mxu1 %v7149_v33 }
 0x608   : > { %6363 = vmatprep.subr.bf16.mxu1 %v8092_v61  ;;  %v7188_v42 = vpop.eup %7187 }
 0x609   : > { %6344 = vmatpush3.bf16.msra.mxu0 %v7158_v23  ;;  %v2799_v47 = vadd.f32 1.0, %v7188_v42  ;;  %v7301_v42 = vld [vmem:[#allocation16 + $0xe4] ss:$16 sps:$4 sm:$0xff]  }
 0x60a   : > { %6345 = vmatprep.subr.bf16.mxu0 %v8092_v61 }
 0x60b   : > { %6364 = vmatpush3.bf16.msra.mxu1 %v7150_v13 }
 0x60c   : > { %6365 = vmatprep.subr.bf16.mxu1 %v8092_v61 }
 0x60d   : > { %6346 = vmatpush3.bf16.msra.mxu0 %v7159_v24 }
 0x60e   : > { %6347 = vmatprep.subr.bf16.mxu0 %v8092_v61 }
 0x60f   : > { %6366 = vmatpush3.bf16.msra.mxu1 %v7151_v14 }
 0x610   : > { %6367 = vmatprep.subr.bf16.mxu1 %v8092_v61 }
 0x611   : > { %6348 = vmatpush3.bf16.msra.mxu0 %v7160_v59 }
 0x612   : > { %6349 = vmatprep.subr.bf16.mxu0 %v8092_v61 }
 0x613   : > { %6368 = vmatpush3.bf16.msra.mxu1 %v7152_v15  ;;  %v8945_v15 = vld [vmem:[%s801_s21] sm:$0xff] }
 0x614   : > { %6369 = vmatprep.subr.bf16.mxu1 %v8092_v61 }
 0x615   : > { %6350 = vmatpush3.bf16.msra.mxu0 %v7161_v25 }
 0x616   : > { %6351 = vmatprep.subr.bf16.mxu0 %v8092_v61 }
 0x617   : > { %6370 = vmatpush3.bf16.msra.mxu1 %v7153_v17 }
 0x618   : > { %6371 = vmatprep.subr.bf16.mxu1 %v8092_v61 }
 0x619   : > { %6352 = vmatpush3.bf16.msra.mxu0 %v7162_v27 }
 0x61a   : > { %3859 = vmatprep.subr.bf16.mxu0 %v7285_v28  ;;  %v7290_v28 = vld [vmem:[#allocation16 + $0x20] ss:$16 sps:$4 sm:$0xff]  }
 0x61b   : > { %6372 = vmatpush3.bf16.msra.mxu1 %v7154_v18 }
 0x61c   : > { %6377 = vmatprep.subr.bf16.mxu1 %v8092_v61 }
 0x61e   : > { %6374 = vmatmul.mubr.bf16.vlgmr.msra.gmra.mrb[32].mxu1 %v3538_v10 }
 0x61f   : > { %6393 = vmatprep.mubr.msk.bf16.mxu1 %vm8093_vm0, %v8092_v61  ;;  %6378 = vmatpush3.bf16.msra.mxu1 %v7163_v22  ;;  %v7291_v22 = vld [vmem:[#allocation16 + $0x44] ss:$16 sps:$4 sm:$0xff]  }
 0x620   : > { %6379 = vmatprep.subr.bf16.mxu1 %v8092_v61 }
 0x623   : > { %6380 = vmatpush3.bf16.msra.mxu1 %v7164_v29  ;;  %v7292_v29 = vld [vmem:[#allocation16 + $0x40] ss:$16 sps:$4 sm:$0xff]  }
 0x624   : > { %6381 = vmatprep.subr.bf16.mxu1 %v8092_v61 }
 0x627   : > { %6382 = vmatpush3.bf16.msra.mxu1 %v7165_v46  ;;  %v7293_v46 = vld [vmem:[#allocation16 + $0x64] ss:$16 sps:$4 sm:$0xff]  }
 0x628   : > { %6383 = vmatprep.subr.bf16.mxu1 %v8092_v61 }
 0x62b   : > { %6384 = vmatpush3.bf16.msra.mxu1 %v7166_v31  ;;  %v7294_v31 = vld [vmem:[#allocation16 + $0x60] ss:$16 sps:$4 sm:$0xff]  }
 0x62c   : > { %6385 = vmatprep.subr.bf16.mxu1 %v8092_v61 }
 0x62f   : > { %6386 = vmatpush3.bf16.msra.mxu1 %v7167_v34 }
 0x630   : > { %6387 = vmatprep.subr.bf16.mxu1 %v8092_v61 }
 0x633   : > { %6388 = vmatpush3.bf16.msra.mxu1 %v7168_v35 }
 0x634   : > { %6389 = vmatprep.subr.bf16.mxu1 %v8092_v61 }
 0x637   : > { %6390 = vmatpush3.bf16.msra.mxu1 %v7169_v37  ;;  %v7297_v37 = vld [vmem:[#allocation16 + $0xa4] ss:$16 sps:$4 sm:$0xff]  }
 0x638   : > { %6391 = vmatprep.subr.bf16.mxu1 %v8092_v61 }
 0x63b   : > { %6392 = vmatpush3.bf16.msra.mxu1 %v7170_v38  ;;  %v7298_v38 = vld [vmem:[#allocation16 + $0xa0] ss:$16 sps:$4 sm:$0xff]  }
 0x63c   : > { %3942 = vmatprep.subr.bf16.mxu1 %v7286_v39  ;;  %v7299_v39 = vld [vmem:[#allocation16 + $0xc4] ss:$16 sps:$4 sm:$0xff]  }
 0x68f   : > { %v2886_v44 = vpop.f32.mrb[40].mxu0 }
 0x690   : > { %7189 = vtanh.f32 %v2886_v44  ;;  %v6275_v45 = vpop.f32.mrb[41].mxu0 }
 0x691   : > { %v2889_v48 = vpop.f32.mrb[42].mxu0  ;;  %7191 = vrcp.f32 %v2799_v47  ;;  %v7302_v45 = vld [vmem:[#allocation16 + $0xe0] ss:$16 sps:$4 sm:$0xff]  }
 0x692   : > { %v6276_v50 = vpop.f32.mrb[43].mxu0  ;;  %v7303_v48 = vld [vmem:[#allocation16 + $0xc] ss:$16 sps:$4 sm:$0xff]  }
 0x693   : > { %v8958_v50 = vld [vmem:[%s8725_s29] sm:$0xff] }
 0x69a   : > { %v7190_v49 = vpop.eup %7189 }
 0x69b   : > { %7193 = vtanh.f32 %v7190_v49  ;;  %v7192_v51 = vpop.eup %7191 }
 0x69c   : > { %v2893_v52 = vsub.f32 1.0, %v7192_v51  ;;  %7195 = vpow2.f32 %v5778_v54  ;;  %v7306_v54 = vld [vmem:[#allocation16 + $0x2c] ss:$16 sps:$4 sm:$0xff]  }
 0x69e   : > { %v2894_v56 = vmul.f32 %v8867_v8, %v2893_v52  ;;  %v7305_v52 = vld [vmem:[#allocation16 + $0x8] ss:$16 sps:$4 sm:$0xff]  }
 0x6a5   : > { %v7194_v55 = vpop.eup %7193 }
 0x6a6   : > { %v2896_v1 = vmul.f32 %v7194_v55, %v7192_v51  ;;  %v7196_v60 = vpop.eup %7195  ;;  %v7307_v55 = vld [vmem:[#allocation17] ss:$12 sps:$4 sm:$0xff]  }
 0x6a7   : > { %v3119_v7 = vadd.f32 1.0, %v7196_v60  ;;  %v7311_v60 = vld [vmem:[#allocation17 + $0x18] ss:$12 sps:$4 sm:$0xff]  }
 0x6a8   : > { %v8934_v57 = vadd.f32 %v2896_v1, %v2894_v56  ;;  %v7308_v56 = vld [vmem:[#allocation17 + $0x1c] ss:$12 sps:$4 sm:$0xff]  }
 0x6a9   : > { %v7309_v1 = vld [vmem:[#allocation16 + $0x28] ss:$16 sps:$4 sm:$0xff]  }
 0x6aa   : > { %v8955_v47 = vpack.c.bf16 %v8934_v57, %v8934_v57 }
 0x6af   : > { %v3381_v58 = vpop.f32.mrb[44].mxu0 }
 0x6b0   : > { %v3428_v62 = vadd.f32 %v3381_v58, %v8761_v4  ;;  %v3383_v53 = vpop.f32.mrb[45].mxu0  ;;  %v7310_v58 = vld [vmem:[#allocation16 + $0x4c] ss:$16 sps:$4 sm:$0xff]  }
 0x6b1   : > { %v8938_v63 = vadd.f32 %v3383_v53, %v8819_v26  ;;  %v3206_v2 = vpop.f32.mrb[24].mxu1  ;;  %v3385_v3 = vpop.f32.mrb[46].mxu0  ;;  %v7313_v53 = vld [vmem:[#allocation16 + $0x48] ss:$16 sps:$4 sm:$0xff]  }
 0x6b2   : > { %v5811_v5 = vmul.f32 -1.442695, %v3428_v62  ;;  %7197 = vtanh.f32 %v3206_v2  ;;  %v6315_v16 = vpop.f32.mrb[25].mxu1  ;;  %v3386_v6 = vpop.f32.mrb[47].mxu0  ;;  %v7312_v62 = vld [vmem:[#allocation17 + $0x34] ss:$12 sps:$4 sm:$0xff]  }
 0x6b3   : > { %v3209_v9 = vpop.f32.mrb[26].mxu1  ;;  %v7314_v2 = vld [vmem:[#allocation16 + $0x6c] ss:$16 sps:$4 sm:$0xff]   ;;  %v7317_v16 = vld [vmem:[#allocation16 + $0x68] ss:$16 sps:$4 sm:$0xff]  }
 0x6b4   : > { %7199 = vpow2.f32 %v5811_v5  ;;  %v6316_v8 = vpop.f32.mrb[27].mxu1  ;;  %v7315_v3 = vld [vmem:[#allocation17 + $0x30] ss:$12 sps:$4 sm:$0xff]   ;;  %v7316_v5 = vld [vmem:[#allocation17 + $0x4c] ss:$12 sps:$4 sm:$0xff]  }
 0x6b5   : > { %7201 = vrcp.f32 %v3119_v7  ;;  %v7318_v6 = vld [vmem:[#allocation16 + $0x8c] ss:$16 sps:$4 sm:$0xff]   ;;  %v7319_v7 = vld [vmem:[#allocation17 + $0x48] ss:$12 sps:$4 sm:$0xff]   ;;  %v7320_v9 = vld [vmem:[#allocation17 + $0x64] ss:$12 sps:$4 sm:$0xff]  }
 0x6b6   : > { %v7321_v8 = vld [vmem:[#allocation16 + $0x88] ss:$16 sps:$4 sm:$0xff]  }
 0x6bc   : > { %v7198_v32 = vpop.eup %7197 }
 0x6bd   : > { %7203 = vtanh.f32 %v7198_v32  ;;  %v7322_v32 = vld [vmem:[#allocation16 + $0xac] ss:$16 sps:$4 sm:$0xff]  }
 0x6be   : > { %v7200_v36 = vpop.eup %7199 }
 0x6bf   : > { %v3432_v4 = vadd.f32 1.0, %v7200_v36  ;;  %v7202_v43 = vpop.eup %7201  ;;  %v7323_v36 = vld [vmem:[#allocation17 + $0x60] ss:$12 sps:$4 sm:$0xff]  }
 0x6c0   : > { %v3213_v26 = vsub.f32 1.0, %v7202_v43 }
 0x6c1   : > { %7205 = vrcp.f32 %v3432_v4  ;;  %v7324_v4 = vld [vmem:[#allocation17 + $0x7c] ss:$12 sps:$4 sm:$0xff]  }
 0x6c2   : > { %v3214_v12 = vmul.f32 %v8883_v41, %v3213_v26  ;;  %v7289_v41 = vld [vmem:[#allocation16 + $0x24] ss:$16 sps:$4 sm:$0xff]   ;;  %v7326_v26 = vld [vmem:[#allocation16 + $0xcc] ss:$16 sps:$4 sm:$0xff]  }
 0x6c7   : > { %v7204_v10 = vpop.eup %7203 }
 0x6c8   : > { %v3216_v33 = vmul.f32 %v7204_v10, %v7202_v43  ;;  %v7325_v43 = vld [vmem:[#allocation16 + $0xa8] ss:$16 sps:$4 sm:$0xff]  }
 0x6c9   : > { %v7327_v10 = vld [vmem:[#allocation17 + $0x78] ss:$12 sps:$4 sm:$0xff]  }
 0x6ca   : > { %v8941_v13 = vadd.f32 %v3216_v33, %v3214_v12  ;;  %v7328_v12 = vld [vmem:[#allocation17 + $0x94] ss:$12 sps:$4 sm:$0xff]   ;;  %v7329_v33 = vld [vmem:[#allocation16 + $0xc8] ss:$16 sps:$4 sm:$0xff]  }
 0x6cb   : > { %v7206_v14 = vpop.eup %7205 }
 0x6cc   : > { %v3442_v17 = vmul.f32 %v8945_v15, %v7206_v14  ;;  %v7330_v14 = vld [vmem:[#allocation16 + $0xec] ss:$16 sps:$4 sm:$0xff]  }
 0x6ce   : > { %v3443_v18 = vpack.c.bf16 %v3442_v17, %v3442_v17  ;;  %v7331_v17 = vld [vmem:[#allocation17 + $0x90] ss:$12 sps:$4 sm:$0xff]  }
 0x6d0   : > { %6354 = vmatmul.mubr.bf16.vlgmr.msra.gmra.mrb[48].mxu0 %v3443_v18  ;;  %v7332_v18 = vld [vmem:[#allocation17 + $0xac] ss:$12 sps:$4 sm:$0xff]  }
 0x6d1   : > { %v3701_v19 = vpop.f32.mrb[28].mxu1  ;;  %3860 = vmatpush1.bf16.msra.mxu0 %v7288_v20  ;;  %3891 = vmatprep.mubr.bf16.mxu0 %v8091_v0  ;;  %v7334_v20 = vld [vmem:[#allocation17 + $0xa8] ss:$12 sps:$4 sm:$0xff]  }
 0x6d2   : > { %v3748_v21 = vadd.f32 %v3701_v19, %v8770_v11  ;;  %v3703_v23 = vpop.f32.mrb[29].mxu1  ;;  %3861 = vmatprep.subr.bf16.mxu0 %v7289_v41  ;;  %v7295_v11 = vld [vmem:[#allocation16 + $0x84] ss:$16 sps:$4 sm:$0xff]   ;;  %v7333_v19 = vld [vmem:[#allocation16 + $0xe8] ss:$16 sps:$4 sm:$0xff]  }
 0x6d3   : > { %v8951_v24 = vadd.f32 %v3703_v23, %v8821_v30  ;;  %v3705_v59 = vpop.f32.mrb[30].mxu1  ;;  %v7296_v30 = vld [vmem:[#allocation16 + $0x80] ss:$16 sps:$4 sm:$0xff]   ;;  %v7336_v41 = vld [vmem:[#allocation17 + $0x8] ss:$12 sps:$4 sm:$0xff]  }
 0x6d4   : > { %v5845_v25 = vmul.f32 -1.442695, %v3748_v21  ;;  %v3706_v27 = vpop.f32.mrb[31].mxu1  ;;  %v3941_v21 = vpack.c.bf16 %v8941_v13, %v8941_v13  ;;  %v7335_v23 = vld [vmem:[#allocation17 + $0xc4] ss:$12 sps:$4 sm:$0xff]  }
 0x6d5   : > { %3862 = vmatpush1.bf16.msra.mxu0 %v7290_v28  ;;  %v7337_v59 = vld [vmem:[#allocation17 + $0xc0] ss:$12 sps:$4 sm:$0xff]   ;;  %v7340_v28 = vld [vmem:[#allocation17 + $0xd8] ss:$12 sps:$4 sm:$0xff]  }
 0x6d6   : > { %7207 = vpow2.f32 %v5845_v25  ;;  %3863 = vmatprep.subr.bf16.mxu0 %v7291_v22  ;;  %v7338_v25 = vld [vmem:[#allocation17 + $0xdc] ss:$12 sps:$4 sm:$0xff]   ;;  %v7339_v27 = vld [vmem:[#allocation17 + $0x20] ss:$12 sps:$4 sm:$0xff]  }
 0x6d7   : > { %v7341_v22 = vld [vmem:[#allocation17 + $0xf4] ss:$12 sps:$4 sm:$0xff]  }
 0x6d9   : > { %3864 = vmatpush1.bf16.msra.mxu0 %v7292_v29  ;;  %v7342_v29 = vld [vmem:[#allocation17 + $0x38] ss:$12 sps:$4 sm:$0xff]  }
 0x6da   : > { %3865 = vmatprep.subr.bf16.mxu0 %v7293_v46  ;;  %v7343_v46 = vld [vmem:[#allocation17 + $0xf0] ss:$12 sps:$4 sm:$0xff]  }
 0x6dd   : > { %3866 = vmatpush1.bf16.msra.mxu0 %v7294_v31  ;;  %v7344_v31 = vld [vmem:[#allocation17 + $0x10c] ss:$12 sps:$4 sm:$0xff]  }
 0x6de   : > { %3867 = vmatprep.subr.bf16.mxu0 %v7295_v11  ;;  %v7345_v11 = vld [vmem:[#allocation17 + $0x50] ss:$12 sps:$4 sm:$0xff]  }
 0x6e0   : > { %v7208_v34 = vpop.eup %7207 }
 0x6e1   : > { %v3752_v35 = vadd.f32 1.0, %v7208_v34  ;;  %3868 = vmatpush1.bf16.msra.mxu0 %v7296_v30  ;;  %v7346_v34 = vld [vmem:[#allocation17 + $0x108] ss:$12 sps:$4 sm:$0xff]  }
 0x6e2   : > { %3869 = vmatprep.subr.bf16.mxu0 %v7297_v37  ;;  %v7348_v30 = vld [vmem:[#allocation17 + $0x68] ss:$12 sps:$4 sm:$0xff]   ;;  %v7349_v37 = vld [vmem:[#allocation17 + $0x120] ss:$12 sps:$4 sm:$0xff]  }
 0x6e3   : > { %7209 = vrcp.f32 %v3752_v35  ;;  %v7347_v35 = vld [vmem:[#allocation17 + $0x124] ss:$12 sps:$4 sm:$0xff]  }
 0x6e5   : > { %3870 = vmatpush1.bf16.msra.mxu0 %v7298_v38  ;;  %v7350_v38 = vld [vmem:[#allocation17 + $0x13c] ss:$12 sps:$4 sm:$0xff]  }
 0x6e6   : > { %3871 = vmatprep.subr.bf16.mxu0 %v7299_v39  ;;  %v7351_v39 = vld [vmem:[#allocation17 + $0x80] ss:$12 sps:$4 sm:$0xff]  }
 0x6e9   : > { %3872 = vmatpush1.bf16.msra.mxu0 %v7300_v40  ;;  %v7352_v40 = vld [vmem:[#allocation17 + $0x138] ss:$12 sps:$4 sm:$0xff]  }
 0x6ea   : > { %3873 = vmatprep.subr.bf16.mxu0 %v7301_v42  ;;  %v7353_v42 = vld [vmem:[#allocation17 + $0x154] ss:$12 sps:$4 sm:$0xff]  }
 0x6ed   : > { %v7210_v44 = vpop.eup %7209  ;;  %3874 = vmatpush1.bf16.msra.mxu0 %v7302_v45  ;;  %v7355_v45 = vld [vmem:[#allocation17 + $0x150] ss:$12 sps:$4 sm:$0xff]  }
 0x6ee   : > { %3900 = vmatprep.subr.bf16.mxu0 %v7303_v48  ;;  %v3762_v49 = vmul.f32 %v8958_v50, %v7210_v44  ;;  %v7354_v44 = vld [vmem:[#allocation17 + $0x98] ss:$12 sps:$4 sm:$0xff]   ;;  %v7357_v48 = vld [vmem:[#allocation17 + $0xb0] ss:$12 sps:$4 sm:$0xff]  }
 0x6f0   : > { %3892 = vmatmul.mubr.bf16.vlgmr.msra.gmra.mrb[52].mxu0 %v8955_v47  ;;  %v3763_v51 = vpack.c.bf16 %v3762_v49, %v3762_v49  ;;  %v7358_v49 = vld [vmem:[#allocation17 + $0x168] ss:$12 sps:$4 sm:$0xff]  }
 0x6f1   : > { %3901 = vmatpush1.bf16.msra.mxu0 %v7305_v52  ;;  %3932 = vmatprep.mubr.bf16.mxu0 %v8091_v0  ;;  %v7360_v52 = vld [vmem:[#allocation17 + $0xc8] ss:$12 sps:$4 sm:$0xff]  }
 0x6f2   : > { %6394 = vmatmul.mubr.bf16.vlgmr.msra.gmra.mrb[32].mxu1 %v3763_v51  ;;  %3902 = vmatprep.subr.bf16.mxu0 %v7306_v54  ;;  %v7359_v51 = vld [vmem:[#allocation17 + $0x184] ss:$12 sps:$4 sm:$0xff]   ;;  %v7361_v54 = vld [vmem:[#allocation17 + $0xe0] ss:$12 sps:$4 sm:$0xff]  }
 0x6f3   : > { %3943 = vmatpush1.bf16.msra.mxu1 %v7307_v55  ;;  %3974 = vmatprep.mubr.bf16.mxu1 %v8091_v0  ;;  %v7362_v55 = vld [vmem:[#allocation17 + $0xf8] ss:$12 sps:$4 sm:$0xff]  }
 0x6f4   : > { %3944 = vmatprep.subr.bf16.mxu1 %v7308_v56  ;;  %v7363_v56 = vld [vmem:[#allocation17 + $0x110] ss:$12 sps:$4 sm:$0xff]  }
 0x6f5   : > { %3903 = vmatpush1.bf16.msra.mxu0 %v7309_v1  ;;  %v7364_v1 = vld [vmem:[#allocation17 + $0x128] ss:$12 sps:$4 sm:$0xff]  }
 0x6f6   : > { %3904 = vmatprep.subr.bf16.mxu0 %v7310_v58  ;;  %v7365_v58 = vld [vmem:[#allocation17 + $0x140] ss:$12 sps:$4 sm:$0xff]  }
 0x6f7   : > { %3945 = vmatpush1.bf16.msra.mxu1 %v7311_v60  ;;  %v7366_v60 = vld [vmem:[#allocation17 + $0x158] ss:$12 sps:$4 sm:$0xff]  }
 0x6f8   : > { %3946 = vmatprep.subr.bf16.mxu1 %v7312_v62  ;;  %v7367_v62 = vld [vmem:[#allocation17 + $0x170] ss:$12 sps:$4 sm:$0xff]  }
 0x6f9   : > { %3905 = vmatpush1.bf16.msra.mxu0 %v7313_v53  ;;  %v5812_v53 = vmul.f32 -1.442695, %v8938_v63 }
 0x6fa   : > { %3906 = vmatprep.subr.bf16.mxu0 %v7314_v2 }
 0x6fb   : > { %3947 = vmatpush1.bf16.msra.mxu1 %v7315_v3  ;;  %7211 = vpow2.f32 %v5812_v53 }
 0x6fc   : > { %3948 = vmatprep.subr.bf16.mxu1 %v7316_v5 }
 0x6fd   : > { %3907 = vmatpush1.bf16.msra.mxu0 %v7317_v16 }
 0x6fe   : > { %3908 = vmatprep.subr.bf16.mxu0 %v7318_v6 }
 0x6ff   : > { %3949 = vmatpush1.bf16.msra.mxu1 %v7319_v7 }
 0x700   : > { %3950 = vmatprep.subr.bf16.mxu1 %v7320_v9 }
 0x701   : > { %3909 = vmatpush1.bf16.msra.mxu0 %v7321_v8 }
 0x702   : > { %3910 = vmatprep.subr.bf16.mxu0 %v7322_v32 }
 0x703   : > { %3951 = vmatpush1.bf16.msra.mxu1 %v7323_v36  ;;  %v5846_v36 = vmul.f32 -1.442695, %v8951_v24 }
 0x704   : > { %3952 = vmatprep.subr.bf16.mxu1 %v7324_v4 }
 0x705   : > { %3911 = vmatpush1.bf16.msra.mxu0 %v7325_v43  ;;  %v7212_v2 = vpop.eup %7211 }
 0x706   : > { %3912 = vmatprep.subr.bf16.mxu0 %v7326_v26  ;;  %v3439_v16 = vadd.f32 1.0, %v7212_v2 }
 0x707   : > { %3953 = vmatpush1.bf16.msra.mxu1 %v7327_v10 }
 0x708   : > { %3954 = vmatprep.subr.bf16.mxu1 %v7328_v12  ;;  %v7368_v12 = vld [vmem:[#allocation17 + $0x188] ss:$12 sps:$4 sm:$0xff]  }
 0x709   : > { %3913 = vmatpush1.bf16.msra.mxu0 %v7329_v33  ;;  %v7369_v33 = vld [vmem:[#allocation17 + $0x180] ss:$12 sps:$4 sm:$0xff]  }
 0x70a   : > { %3914 = vmatprep.subr.bf16.mxu0 %v7330_v14  ;;  %v7370_v14 = vld [vmem:[#allocation17 + $0x19c] ss:$12 sps:$4 sm:$0xff]  }
 0x70b   : > { %3955 = vmatpush1.bf16.msra.mxu1 %v7331_v17 }
 0x70c   : > { %3956 = vmatprep.subr.bf16.mxu1 %v7332_v18 }
 0x70d   : > { %3915 = vmatpush1.bf16.msra.mxu0 %v7333_v19 }
 0x70e   : > { %6397 = vmatprep.subr.bf16.mxu0 %v8092_v61 }
 0x70f   : > { %3957 = vmatpush1.bf16.msra.mxu1 %v7334_v20  ;;  %v7371_v20 = vld [vmem:[#allocation17 + $0x1a0] ss:$12 sps:$4 sm:$0xff]  }
 0x710   : > { %3933 = vmatmul.mubr.bf16.vlgmr.msra.gmra.mrb[56].mxu0 %v8955_v47  ;;  %4024 = vmatprep.subr.bf16.mxu1 %v7335_v23  ;;  %v7356_v47 = vld [vmem:[#allocation17 + $0x16c] ss:$12 sps:$4 sm:$0xff]  }
 0x711   : > { %6398 = vmatpush3.bf16.msra.mxu0 %v7336_v41  ;;  %6413 = vmatprep.mubr.msk.bf16.mxu0 %vm8093_vm0, %v8092_v61 }
 0x712   : > { %3975 = vmatmul.mubr.bf16.vlgmr.msra.gmra.mrb[36].mxu1 %v3941_v21  ;;  %6399 = vmatprep.subr.bf16.mxu0 %v8092_v61 }
 0x713   : > { %4025 = vmatpush1.bf16.msra.mxu1 %v7337_v59  ;;  %4056 = vmatprep.mubr.bf16.mxu1 %v8091_v0  ;;  %v7373_v59 = vld [vmem:[#allocation17 + $0x1b4] ss:$12 sps:$4 sm:$0xff]  }
 0x714   : > { %4026 = vmatprep.subr.bf16.mxu1 %v7338_v25 }
 0x715   : > { %6400 = vmatpush3.bf16.msra.mxu0 %v7339_v27 }
 0x716   : > { %6401 = vmatprep.subr.bf16.mxu0 %v8092_v61 }
 0x717   : > { %4027 = vmatpush1.bf16.msra.mxu1 %v7340_v28 }
 0x718   : > { %4028 = vmatprep.subr.bf16.mxu1 %v7341_v22  ;;  %v7374_v22 = vld [vmem:[#allocation17 + $0x1b8] ss:$12 sps:$4 sm:$0xff]  }
 0x719   : > { %6402 = vmatpush3.bf16.msra.mxu0 %v7342_v29  ;;  %v7375_v29 = vld [vmem:[#allocation17 + $0x1b0] ss:$12 sps:$4 sm:$0xff]  }
 0x71a   : > { %6403 = vmatprep.subr.bf16.mxu0 %v8092_v61 }
 0x71b   : > { %4029 = vmatpush1.bf16.msra.mxu1 %v7343_v46  ;;  %v7376_v46 = vld [vmem:[#allocation17 + $0x1cc] ss:$12 sps:$4 sm:$0xff]  }
 0x71c   : > { %4030 = vmatprep.subr.bf16.mxu1 %v7344_v31  ;;  %v7377_v31 = vld [vmem:[#allocation17 + $0x1d0] ss:$12 sps:$4 sm:$0xff]  }
 0x71d   : > { %6404 = vmatpush3.bf16.msra.mxu0 %v7345_v11  ;;  %v7378_v11 = vld [vmem:[#allocation17 + $0x1c8] ss:$12 sps:$4 sm:$0xff]  }
 0x71e   : > { %6405 = vmatprep.subr.bf16.mxu0 %v8092_v61 }
 0x71f   : > { %4031 = vmatpush1.bf16.msra.mxu1 %v7346_v34  ;;  %v7379_v34 = vld [vmem:[#allocation17 + $0x1e4] ss:$12 sps:$4 sm:$0xff]  }
 0x720   : > { %4032 = vmatprep.subr.bf16.mxu1 %v7347_v35 }
 0x721   : > { %6406 = vmatpush3.bf16.msra.mxu0 %v7348_v30  ;;  %v7380_v30 = vld [vmem:[#allocation17 + $0x1e8] ss:$12 sps:$4 sm:$0xff]  }
 0x722   : > { %6407 = vmatprep.subr.bf16.mxu0 %v8092_v61 }
 0x723   : > { %4033 = vmatpush1.bf16.msra.mxu1 %v7349_v37  ;;  %v7381_v37 = vld [vmem:[#allocation17 + $0x1e0] ss:$12 sps:$4 sm:$0xff]  }
 0x724   : > { %4034 = vmatprep.subr.bf16.mxu1 %v7350_v38  ;;  %v7382_v38 = vld [vmem:[#allocation17 + $0x1fc] ss:$12 sps:$4 sm:$0xff]  }
 0x725   : > { %6408 = vmatpush3.bf16.msra.mxu0 %v7351_v39 }
 0x726   : > { %6409 = vmatprep.subr.bf16.mxu0 %v8092_v61 }
 0x727   : > { %4035 = vmatpush1.bf16.msra.mxu1 %v7352_v40  ;;  %v7383_v40 = vld [vmem:[#allocation17 + $0x200] ss:$12 sps:$4 sm:$0xff]  }
 0x728   : > { %4036 = vmatprep.subr.bf16.mxu1 %v7353_v42  ;;  %v7384_v42 = vld [vmem:[#allocation17 + $0x1f8] ss:$12 sps:$4 sm:$0xff]  }
 0x729   : > { %6410 = vmatpush3.bf16.msra.mxu0 %v7354_v44  ;;  %v7385_v44 = vld [vmem:[#allocation17 + $0x214] ss:$12 sps:$4 sm:$0xff]  }
 0x72a   : > { %6411 = vmatprep.subr.bf16.mxu0 %v8092_v61 }
 0x72b   : > { %4037 = vmatpush1.bf16.msra.mxu1 %v7355_v45 }
 0x72c   : > { %4038 = vmatprep.subr.bf16.mxu1 %v7356_v47  ;;  %v7386_v47 = vld [vmem:[#allocation17 + $0x218] ss:$12 sps:$4 sm:$0xff]  }
 0x72d   : > { %6412 = vmatpush3.bf16.msra.mxu0 %v7357_v48  ;;  %v7387_v48 = vld [vmem:[#allocation17 + $0x210] ss:$12 sps:$4 sm:$0xff]  }
 0x72e   : > { %6417 = vmatprep.subr.bf16.mxu0 %v8092_v61 }
 0x72f   : > { %4039 = vmatpush1.bf16.msra.mxu1 %v7358_v49  ;;  %v7388_v49 = vld [vmem:[#allocation17 + $0x22c] ss:$12 sps:$4 sm:$0xff]  }
 0x730   : > { %6414 = vmatmul.mubr.bf16.vlgmr.msra.gmra.mrb[60].mxu0 %v3941_v21  ;;  %4106 = vmatprep.subr.bf16.mxu1 %v7359_v51  ;;  %v7372_v21 = vld [vmem:[#allocation17 + $0x198] ss:$12 sps:$4 sm:$0xff]  }
 0x731   : > { %6418 = vmatpush3.bf16.msra.mxu0 %v7360_v52  ;;  %6433 = vmatprep.mubr.msk.bf16.mxu0 %vm8093_vm0, %v8092_v61 }
 0x732   : > { %6419 = vmatprep.subr.bf16.mxu0 %v8092_v61 }
 0x735   : > { %6420 = vmatpush3.bf16.msra.mxu0 %v7361_v54 }
 0x736   : > { %6421 = vmatprep.subr.bf16.mxu0 %v8092_v61 }
 0x739   : > { %6422 = vmatpush3.bf16.msra.mxu0 %v7362_v55  ;;  %v7389_v55 = vld [vmem:[#allocation17 + $0x230] ss:$12 sps:$4 sm:$0xff]  }
 0x73a   : > { %6423 = vmatprep.subr.bf16.mxu0 %v8092_v61 }
 0x73d   : > { %6424 = vmatpush3.bf16.msra.mxu0 %v7363_v56  ;;  %v7390_v56 = vld [vmem:[#allocation17 + $0x228] ss:$12 sps:$4 sm:$0xff]  }
 0x73e   : > { %6425 = vmatprep.subr.bf16.mxu0 %v8092_v61 }
 0x741   : > { %6426 = vmatpush3.bf16.msra.mxu0 %v7364_v1 }
 0x742   : > { %6427 = vmatprep.subr.bf16.mxu0 %v8092_v61 }
 0x745   : > { %6428 = vmatpush3.bf16.msra.mxu0 %v7365_v58 }
 0x746   : > { %6429 = vmatprep.subr.bf16.mxu0 %v8092_v61 }
 0x749   : > { %6430 = vmatpush3.bf16.msra.mxu0 %v7366_v60 }
 0x74a   : > { %6431 = vmatprep.subr.bf16.mxu0 %v8092_v61 }
 0x74d   : > { %6432 = vmatpush3.bf16.msra.mxu0 %v7367_v62 }
 0x74e   : > { %6437 = vmatprep.subr.bf16.mxu0 %v8092_v61 }
 0x7a3   : > { %v3526_v3 = vpop.f32.mrb[48].mxu0 }
 0x7a4   : > { %7213 = vtanh.f32 %v3526_v3  ;;  %v6355_v5 = vpop.f32.mrb[49].mxu0 }
 0x7a5   : > { %v3529_v6 = vpop.f32.mrb[50].mxu0  ;;  %7215 = vrcp.f32 %v3439_v16 }
 0x7a6   : > { %v6356_v7 = vpop.f32.mrb[51].mxu0 }
 0x7a7   : > { %v7392_v7 = vld [vmem:[%s774_s24] sm:$0xf] }
 0x7ae   : > { %v7214_v9 = vpop.eup %7213 }
 0x7af   : > { %7217 = vtanh.f32 %v7214_v9  ;;  %v7216_v8 = vpop.eup %7215  ;;  %v7393_v9 = vld [vmem:[%s756_s15] sm:$0xf]  ;;  %s9485_s15 = sld [smem:[#allocation46_spill]] }
 0x7b0   : > { %v3533_v32 = vsub.f32 1.0, %v7216_v8  ;;  %7219 = vpow2.f32 %v5846_v36  ;;  %v7396_v36 = vld [vmem:[#allocation20 + $0x118] sm:$0xff]  }
 0x7b2   : > { %v3534_v43 = vmul.f32 %v8945_v15, %v3533_v32  ;;  %v7395_v32 = vld [vmem:[#allocation20 + $0x110] sm:$0xff]  }
 0x7b5   : > { %p9487_p11 = scmp.ne.s32.totalorder %s9485_s15, 0 }
 0x7b7   : > { %p7887_p12 = pnand %p7886_p1, %p9487_p11 }
 0x7b9   : > { %v7218_v4 = vpop.eup %7217  ;;  %p7888_p5 = pneg %p7887_p12 }
 0x7ba   : > { %v3536_v63 = vmul.f32 %v7218_v4, %v7216_v8  ;;  %v7220_v15 = vpop.eup %7219  ;;  %v7394_v8 = vld [vmem:[#allocation20 + $0x108] sm:$0xff]   ;;  %v7397_v4 = vld [vmem:[#allocation20 + $0x120] sm:$0xff]  }
 0x7bb   : > { %v3759_v25 = vadd.f32 1.0, %v7220_v15  ;;  %v7401_v15 = vld [vmem:[#allocation19 + $0x4] ss:$12 sps:$4 sm:$0xff]  }
 0x7bc   : > { %v8992_v26 = vadd.f32 %v3536_v63, %v3534_v43  ;;  %v7398_v43 = vld [vmem:[#allocation20 + $0x128] sm:$0xff]   ;;  %v7399_v63 = vld [vmem:[#allocation20 + $0x130] sm:$0xff]  }
 0x7be   : > { %v4023_v10 = vpack.c.bf16 %v8992_v26, %v8992_v26 }
 0x7c0   : > { %4057 = vmatmul.mubr.bf16.vlgmr.msra.gmra.mrb[40].mxu1 %v4023_v10  ;;  %6434 = vmatmul.mubr.bf16.vlgmr.msra.gmra.mrb[64].mxu0 %v4023_v10 }
 0x7c1   : > { %6438 = vmatpush3.bf16.msra.mxu0 %v7368_v12  ;;  %4107 = vmatpush1.bf16.msra.mxu1 %v7369_v33  ;;  %v7400_v33 = vld [vmem:[#allocation20 + $0x138] sm:$0xff]  }
 0x7c2   : > { %6439 = vmatprep.subr.bf16.mxu0 %v8092_v61  ;;  %4108 = vmatprep.subr.bf16.mxu1 %v7370_v14 }
 0x7c3   : > { %v8997_v24 = vpop.f32.mrb[52].mxu0  ;;  %4138 = vmatprep.mubr.bf16.mxu1 %v8091_v0  ;;  %6453 = vmatprep.mubr.msk.bf16.mxu0 %vm8093_vm0, %v8092_v61 }
 0x7c4   : > { %v9002_v17 = vpop.f32.mrb[53].mxu0  ;;  %v4187_v1 = vpack.c.bf16 %v8997_v24, %v8997_v24 }
 0x7c5   : > { %v3846_v18 = vpop.f32.mrb[32].mxu1  ;;  %v3897_v19 = vpop.f32.mrb[54].mxu0  ;;  %6440 = vmatpush3.bf16.msra.mxu0 %v7371_v20  ;;  %4109 = vmatpush1.bf16.msra.mxu1 %v7372_v21 }
 0x7c6   : > { %7221 = vtanh.f32 %v3846_v18  ;;  %v6395_v23 = vpop.f32.mrb[33].mxu1  ;;  %v3898_v41 = vpop.f32.mrb[55].mxu0  ;;  %6441 = vmatprep.subr.bf16.mxu0 %v8092_v61  ;;  %4110 = vmatprep.subr.bf16.mxu1 %v7373_v59  ;;  %v9020_v62 = vsel %vm2171_vm1, %v4187_v1, 0  ;;  %v7411_v1 = vld [vmem:[#allocation19 + $0x80] ss:$12 sps:$4 sm:$0xff]  }
 0x7c7   : > { %v3849_v27 = vpop.f32.mrb[34].mxu1  ;;  %7223 = vrcp.f32 %v3759_v25 }
 0x7c8   : > { %v6396_v28 = vpop.f32.mrb[35].mxu1 }
 0x7c9   : > { %6442 = vmatpush3.bf16.msra.mxu0 %v7374_v22  ;;  %4111 = vmatpush1.bf16.msra.mxu1 %v7375_v29  ;;  %v7402_v22 = vld [vmem:[%s747_s9] sm:$0xf]  ;;  %s925_s9 = scalar_lea.vmem [#allocation26], %s8650_s22 }
 0x7ca   : > { %6443 = vmatprep.subr.bf16.mxu0 %v8092_v61  ;;  %4112 = vmatprep.subr.bf16.mxu1 %v7376_v46 }
 0x7cd   : > { %6444 = vmatpush3.bf16.msra.mxu0 %v7377_v31  ;;  %4113 = vmatpush1.bf16.msra.mxu1 %v7378_v11 }
 0x7ce   : > { %6445 = vmatprep.subr.bf16.mxu0 %v8092_v61  ;;  %4114 = vmatprep.subr.bf16.mxu1 %v7379_v34 }
 0x7d0   : > { %v7222_v35 = vpop.eup %7221 }
 0x7d1   : > { %7225 = vtanh.f32 %v7222_v35  ;;  %6446 = vmatpush3.bf16.msra.mxu0 %v7380_v30  ;;  %4115 = vmatpush1.bf16.msra.mxu1 %v7381_v37  ;;  %v7224_v39 = vpop.eup %7223 }
 0x7d2   : > { %6447 = vmatprep.subr.bf16.mxu0 %v8092_v61  ;;  %4116 = vmatprep.subr.bf16.mxu1 %v7382_v38  ;;  %v3853_v45 = vsub.f32 1.0, %v7224_v39 }
 0x7d4   : > { %v3854_v52 = vmul.f32 %v8958_v50, %v3853_v45  ;;  %v7391_v50 = vld [vmem:[#allocation20 + $0x100] sm:$0xff]  }
 0x7d5   : > { %6448 = vmatpush3.bf16.msra.mxu0 %v7383_v40  ;;  %4117 = vmatpush1.bf16.msra.mxu1 %v7384_v42  ;;  %v7403_v40 = vld [vmem:[%s738_s11] sm:$0xf]  ;;  %s918_s11 = scalar_lea.vmem [#allocation25], %s8650_s22 }
 0x7d6   : > { %6449 = vmatprep.subr.bf16.mxu0 %v8092_v61  ;;  %4118 = vmatprep.subr.bf16.mxu1 %v7385_v44 }
 0x7d9   : > { %6450 = vmatpush3.bf16.msra.mxu0 %v7386_v47  ;;  %4119 = vmatpush1.bf16.msra.mxu1 %v7387_v48  ;;  %v7404_v48 = vld [vmem:[%s783_s17] sm:$0xf] }
 0x7da   : > { %6451 = vmatprep.subr.bf16.mxu0 %v8092_v61  ;;  %4120 = vmatprep.subr.bf16.mxu1 %v7388_v49  ;;  %v7405_v49 = vld [vmem:[%s765_s5] sm:$0xf]  ;;  %s9227_s5 = sshll.u32 %s9476_s1, 7  ;;  %s7891_s1 = scalar_lea.vmem %s7890_s19, 256 }
 0x7db   : > { %v7226_v51 = vpop.eup %7225  ;;  %s9233_s21 = scalar_lea.hbm %s9486_s10, %s9227_s5  ;;  %p7893_p3 = scmp.lt.s32.totalorder %s7891_s1, %s7885_s26 }
 0x7dc   : > { %v3856_v54 = vmul.f32 %v7226_v51, %v7224_v39  ;;  %v7406_v51 = vld [vmem:[#allocation19 + $0x8] ss:$12 sps:$4 sm:$0xff]  }
 0x7dd   : > { %6452 = vmatpush3.bf16.msra.mxu0 %v7389_v55  ;;  %4121 = vmatpush1.bf16.msra.mxu1 %v7390_v56  ;;  %v7409_v55 = vld [vmem:[#allocation19 + $0x50] ss:$12 sps:$4 sm:$0xff]   ;;  %v7410_v56 = vld [vmem:[#allocation19 + $0x68] ss:$12 sps:$4 sm:$0xff]   ;;  %p7894_p2 = por %p7893_p3, %p7892_p6 }
 0x7de   : > { %6481 = vmatprep.subr.bf16.mxu0 %v8092_v61  ;;  %v9014_v58 = vadd.f32 %v3856_v54, %v3854_v52  ;;  %6457 = vmatprep.subr.bf16.mxu1 %v8092_v61  ;;  %v7407_v52 = vld [vmem:[#allocation19 + $0x20] ss:$12 sps:$4 sm:$0xff]   ;;  %v7408_v54 = vld [vmem:[#allocation19 + $0x38] ss:$12 sps:$4 sm:$0xff]  }
 0x7df   : > { %p7895_p13 = pnand %p7894_p2, %p7888_p5 }
 0x7e0   : > { %v4105_v60 = vpack.c.bf16 %v9014_v58, %v9014_v58 }
 0x7e2   : > { %4139 = vmatmul.mubr.bf16.vlgmr.msra.gmra.mrb[44].mxu1 %v4105_v60  ;;  %6454 = vmatmul.mubr.bf16.vlgmr.msra.gmra.mrb[68].mxu0 %v4105_v60  ;;  %v7412_v60 = vld [vmem:[#allocation19 + $0x98] ss:$12 sps:$4 sm:$0xff]  }
 0x7e3   : > { %6482 = vmatpush3.bf16.msra.mxu0 %v9020_v62  ;;  %6459 = vmatprep.mubr.msk.bf16.mxu1 %vm8093_vm0, %v8092_v61 }
 0x7e4   : > { %6483 = vmatprep.mubr.msk.bf16.mxu0 %vm8093_vm0, %v8092_v61  ;;  %6493 = vmatprep.subr.bf16.mxu0 %v7391_v50 }
 0x7e5   : > { %v3976_v53 = vpop.f32.mrb[36].mxu1 }
 0x7e6   : > { %v4188_v2 = vpack.c.bf16 %v3976_v53, %v3976_v53  ;;  %v9027_v3 = vpop.f32.mrb[37].mxu1 }
 0x7e7   : > { %v3980_v5 = vpop.f32.mrb[38].mxu1 }
 0x7e8   : > { %v4192_v16 = vsel %vm2171_vm1, %v4188_v2, 0  ;;  %v3981_v6 = vpop.f32.mrb[39].mxu1 }
 0x7e9   : > { %6458 = vmatpush3.bf16.msra.mxu1 %v4192_v16 }
 0x7ea   : > { %6463 = vmatprep.subr.bf16.mxu1 %v8092_v61  ;;  %6484 = vmatmul.mubr.msk.bf16.vlgmr.msra.gmra.mrb[72].mxu0 %vm2167_vm2, %v7392_v7 }
 0x7eb   : > { %6494 = vmatpush3.bf16.msra.mxu0 %v7391_v50 }
 0x7ec   : > { %6460 = vmatmul.mubr.msk.bf16.vlgmr.msra.gmra.mrb[48].mxu1 %vm2167_vm2, %v7393_v9  ;;  %6495 = vmatprep.subr.bf16.mxu0 %v7394_v8 }
 0x7ed   : > { %6465 = vmatprep.mubr.msk.bf16.mxu1 %vm8093_vm0, %v8092_v61 }
 0x7ef   : > { %6496 = vmatpush3.bf16.msra.mxu0 %v7394_v8 }
 0x7f0   : > { %6497 = vmatprep.subr.bf16.mxu0 %v7395_v32 }
 0x7f3   : > { %6498 = vmatpush3.bf16.msra.mxu0 %v7395_v32 }
 0x7f4   : > { %6499 = vmatprep.subr.bf16.mxu0 %v7396_v36 }
 0x7f7   : > { %6500 = vmatpush3.bf16.msra.mxu0 %v7396_v36 }
 0x7f8   : > { %6501 = vmatprep.subr.bf16.mxu0 %v7397_v4 }
 0x7fb   : > { %6502 = vmatpush3.bf16.msra.mxu0 %v7397_v4 }
 0x7fc   : > { %6503 = vmatprep.subr.bf16.mxu0 %v7398_v43 }
 0x7ff   : > { %6504 = vmatpush3.bf16.msra.mxu0 %v7398_v43 }
 0x800   : > { %6505 = vmatprep.subr.bf16.mxu0 %v7399_v63 }
 0x803   : > { %v9039_v10 = vpop.f32.mrb[60].mxu0  ;;  %6506 = vmatpush3.bf16.msra.mxu0 %v7399_v63 }
 0x804   : > { %v6415_v12 = vpop.f32.mrb[61].mxu0  ;;  %6507 = vmatprep.subr.bf16.mxu0 %v7400_v33 }
 0x805   : > { %v4020_v14 = vpop.f32.mrb[62].mxu0 }
 0x806   : > { %v6416_v24 = vpop.f32.mrb[63].mxu0 }
 0x807   : > { %6508 = vmatpush3.bf16.msra.mxu0 %v7400_v33 }
 0x808   : > { %4535 = vmatprep.subr.bf16.mxu0 %v7401_v15 }
 0x893   : > { %v4058_v18 = vpop.f32.mrb[40].mxu1  ;;  %v9041_v19 = vpop.f32.mrb[64].mxu0 }
 0x894   : > { %v4189_v20 = vpack.c.bf16 %v4058_v18, %v4058_v18  ;;  %v9043_v21 = vpop.f32.mrb[41].mxu1  ;;  %v6435_v23 = vpop.f32.mrb[65].mxu0 }
 0x895   : > { %v4062_v41 = vpop.f32.mrb[42].mxu1  ;;  %v4102_v59 = vpop.f32.mrb[66].mxu0  ;;  %v7415_v23 = vld [vmem:[#allocation19 + $0x1c] ss:$12 sps:$4 sm:$0xff]  }
 0x896   : > { %v4238_v25 = vsel %vm2171_vm1, %v4189_v20, 0  ;;  %v4063_v27 = vpop.f32.mrb[43].mxu1  ;;  %v6436_v28 = vpop.f32.mrb[67].mxu0  ;;  %v7414_v20 = vld [vmem:[#allocation19] ss:$12 sps:$4 sm:$0xff]  }
 0x897   : > { %6464 = vmatpush3.bf16.msra.mxu1 %v4238_v25  ;;  %v7416_v41 = vld [vmem:[#allocation19 + $0x18] ss:$12 sps:$4 sm:$0xff]   ;;  %v7417_v59 = vld [vmem:[#allocation19 + $0x34] ss:$12 sps:$4 sm:$0xff]   ;;  %v7418_v25 = vld [vmem:[#allocation19 + $0x30] ss:$12 sps:$4 sm:$0xff]  }
 0x898   : > { %6469 = vmatprep.subr.bf16.mxu1 %v8092_v61  ;;  %v7419_v27 = vld [vmem:[#allocation19 + $0x4c] ss:$12 sps:$4 sm:$0xff]   ;;  %v7420_v28 = vld [vmem:[#allocation19 + $0x48] ss:$12 sps:$4 sm:$0xff]  }
 0x89a   : > { %6466 = vmatmul.mubr.msk.bf16.vlgmr.msra.gmra.mrb[52].mxu1 %vm2167_vm2, %v7402_v22  ;;  %v7421_v22 = vld [vmem:[#allocation19 + $0x64] ss:$12 sps:$4 sm:$0xff]  }
 0x89b   : > { %6471 = vmatprep.mubr.msk.bf16.mxu1 %vm8093_vm0, %v8092_v61 }
 0x8b5   : > { %v4140_v29 = vpop.f32.mrb[44].mxu1  ;;  %v9052_v46 = vpop.f32.mrb[68].mxu0 }
 0x8b6   : > { %v4190_v31 = vpack.c.bf16 %v4140_v29, %v4140_v29  ;;  %v9054_v11 = vpop.f32.mrb[45].mxu1  ;;  %v6455_v34 = vpop.f32.mrb[69].mxu0  ;;  %v7422_v29 = vld [vmem:[#allocation19 + $0x60] ss:$12 sps:$4 sm:$0xff]  }
 0x8b7   : > { %v4144_v35 = vpop.f32.mrb[46].mxu1  ;;  %v4184_v30 = vpop.f32.mrb[70].mxu0  ;;  %v7424_v34 = vld [vmem:[#allocation19 + $0x78] ss:$12 sps:$4 sm:$0xff]  }
 0x8b8   : > { %v4284_v37 = vsel %vm2171_vm1, %v4190_v31, 0  ;;  %v4145_v38 = vpop.f32.mrb[47].mxu1  ;;  %v6456_v39 = vpop.f32.mrb[71].mxu0  ;;  %v7423_v31 = vld [vmem:[#allocation19 + $0x7c] ss:$12 sps:$4 sm:$0xff]  }
 0x8b9   : > { %6470 = vmatpush3.bf16.msra.mxu1 %v4284_v37  ;;  %v7425_v35 = vld [vmem:[#allocation19 + $0x94] ss:$12 sps:$4 sm:$0xff]   ;;  %v7426_v30 = vld [vmem:[#allocation19 + $0x90] ss:$12 sps:$4 sm:$0xff]   ;;  %v7427_v37 = vld [vmem:[#allocation19 + $0xac] ss:$12 sps:$4 sm:$0xff]  }
 0x8ba   : > { %6475 = vmatprep.subr.bf16.mxu1 %v8092_v61  ;;  %v7428_v38 = vld [vmem:[#allocation19 + $0xa8] ss:$12 sps:$4 sm:$0xff]   ;;  %v7429_v39 = vld [vmem:[#allocation19 + $0xc4] ss:$12 sps:$4 sm:$0xff]  }
 0x8bc   : > { %6472 = vmatmul.mubr.msk.bf16.vlgmr.msra.gmra.mrb[56].mxu1 %vm2167_vm2, %v7403_v40 }
 0x8bd   : > { %6476 = vmatpush3.bf16.msra.mxu1 %v9020_v62  ;;  %6477 = vmatprep.mubr.msk.bf16.mxu1 %vm8093_vm0, %v8092_v61  ;;  %v9085_v50 = vpop.f32.mrb[72].mxu0 }
 0x8be   : > { %6487 = vmatprep.subr.bf16.mxu1 %v8092_v61  ;;  %v6485_v53 = vpop.f32.mrb[73].mxu0  ;;  %vm4415_vm13 = vcmp.ge.f32.partialorder %v9085_v50, 0.0 }
 0x8bf   : > { %v4228_v42 = vpop.f32.mrb[48].mxu1  ;;  %v4412_v2 = vpop.f32.mrb[74].mxu0 }
 0x8c0   : > { %v6461_v44 = vpop.f32.mrb[49].mxu1  ;;  %v6486_v5 = vpop.f32.mrb[75].mxu0  ;;  %v4235_v16 = vmul.f32 0.01, %v4228_v42  ;;  %vm4234_vm9 = vcmp.ge.f32.partialorder %v4228_v42, 0.0 }
 0x8c1   : > { %v4231_v45 = vpop.f32.mrb[50].mxu1 }
 0x8c2   : > { %v6462_v47 = vpop.f32.mrb[51].mxu1  ;;  %v9087_v7 = vsel %vm4234_vm9, %v4228_v42, %v4235_v16 }
 0x8c4   : > { %6478 = vmatmul.mubr.msk.bf16.vlgmr.msra.gmra.mrb[60].mxu1 %vm2167_vm2, %v7404_v48 }
 0x8c5   : > { %6488 = vmatpush3.bf16.msra.mxu1 %v9020_v62  ;;  %6489 = vmatprep.mubr.msk.bf16.mxu1 %vm8093_vm0, %v8092_v61  ;;  %v7413_v62 = vld [vmem:[#allocation19 + $0xb0] ss:$12 sps:$4 sm:$0xff]  }
 0x8c6   : > { %6513 = vmatprep.subr.bf16.mxu1 %v8092_v61 }
 0x8cc   : > { %6490 = vmatmul.mubr.msk.bf16.vlgmr.msra.gmra.mrb[64].mxu1 %vm2167_vm2, %v7405_v49 }
 0x8cd   : > { %6514 = vmatpush3.bf16.msra.mxu1 %v7406_v51  ;;  %6529 = vmatprep.mubr.msk.bf16.mxu1 %vm8093_vm0, %v8092_v61 }
 0x8ce   : > { %6515 = vmatprep.subr.bf16.mxu1 %v8092_v61 }
 0x8d1   : > { %6516 = vmatpush3.bf16.msra.mxu1 %v7407_v52 }
 0x8d2   : > { %6517 = vmatprep.subr.bf16.mxu1 %v8092_v61 }
 0x8d5   : > { %6518 = vmatpush3.bf16.msra.mxu1 %v7408_v54 }
 0x8d6   : > { %6519 = vmatprep.subr.bf16.mxu1 %v8092_v61 }
 0x8d9   : > { %6520 = vmatpush3.bf16.msra.mxu1 %v7409_v55 }
 0x8da   : > { %6521 = vmatprep.subr.bf16.mxu1 %v8092_v61 }
 0x8dd   : > { %6522 = vmatpush3.bf16.msra.mxu1 %v7410_v56 }
 0x8de   : > { %6523 = vmatprep.subr.bf16.mxu1 %v8092_v61 }
 0x8e1   : > { %6524 = vmatpush3.bf16.msra.mxu1 %v7411_v1 }
 0x8e2   : > { %6525 = vmatprep.subr.bf16.mxu1 %v8092_v61 }
 0x8e5   : > { %6526 = vmatpush3.bf16.msra.mxu1 %v7412_v60 }
 0x8e6   : > { %6527 = vmatprep.subr.bf16.mxu1 %v8092_v61 }
 0x8e9   : > { %6528 = vmatpush3.bf16.msra.mxu1 %v7413_v62 }
 0x8ea   : > { %6533 = vmatprep.subr.bf16.mxu1 %v8092_v61 }
 0x96d   : > { %v4274_v6 = vpop.f32.mrb[52].mxu1 }
 0x96e   : > { %vm4280_vm10 = vcmp.ge.f32.partialorder %v4274_v6, 0.0  ;;  %v4281_v9 = vmul.f32 0.01, %v4274_v6  ;;  %v6467_v8 = vpop.f32.mrb[53].mxu1 }
 0x96f   : > { %v4277_v32 = vpop.f32.mrb[54].mxu1 }
 0x970   : > { %v9089_v36 = vsel %vm4280_vm10, %v4274_v6, %v4281_v9  ;;  %v6468_v4 = vpop.f32.mrb[55].mxu1 }
 0x971   : > { %v4461_v43 = vpack.c.bf16 %v9089_v36, %v9087_v7 }
 0x973   : > { %6509 = vmatprep.mubr.bf16.mxu0 %v4461_v43 }
 0x98f   : > { %v4320_v63 = vpop.f32.mrb[56].mxu1 }
 0x990   : > { %vm4326_vm11 = vcmp.ge.f32.partialorder %v4320_v63, 0.0  ;;  %v4327_v12 = vmul.f32 0.01, %v4320_v63  ;;  %v6473_v33 = vpop.f32.mrb[57].mxu1 }
 0x991   : > { %v4323_v14 = vpop.f32.mrb[58].mxu1 }
 0x992   : > { %v9093_v24 = vsel %vm4326_vm11, %v4320_v63, %v4327_v12  ;;  %v6474_v15 = vpop.f32.mrb[59].mxu1 }
 0x993   : > { %v4462_v18 = vpack.c.bf16 %v9093_v24, %v9093_v24 }
 0x995   : > { %6510 = vmatmul.mubr.bf16.vlgmr.msra.gmra.mrb[76].mxu0 %v4462_v18 }
 0x996   : > { %4536 = vmatpush1.bf16.msra.mxu0 %v7414_v20  ;;  %4567 = vmatprep.mubr.bf16.mxu0 %v8091_v0  ;;  %v7430_v20 = vld [vmem:[#allocation19 + $0xc0] ss:$12 sps:$4 sm:$0xff]  }
 0x997   : > { %4537 = vmatprep.subr.bf16.mxu0 %v7415_v23  ;;  %v9098_v40 = vpop.f32.mrb[60].mxu1  ;;  %v7432_v23 = vld [vmem:[#allocation20] sm:$0xff]  }
 0x998   : > { %v6479_v42 = vpop.f32.mrb[61].mxu1  ;;  %vm4372_vm12 = vcmp.ge.f32.partialorder %v9098_v40, 0.0 }
 0x999   : > { %v4369_v44 = vpop.f32.mrb[62].mxu1  ;;  %v7448_v42 = vld [vmem:[#allocation19 + $0x150] ss:$12 sps:$4 sm:$0xff]  }
 0x99a   : > { %4538 = vmatpush1.bf16.msra.mxu0 %v7416_v41  ;;  %v6480_v45 = vpop.f32.mrb[63].mxu1  ;;  %v7435_v41 = vld [vmem:[#allocation20 + $0x8] sm:$0xff]  }
 0x99b   : > { %4539 = vmatprep.subr.bf16.mxu0 %v7417_v59  ;;  %v7436_v59 = vld [vmem:[#allocation19 + $0xf0] ss:$12 sps:$4 sm:$0xff]   ;;  %v7449_v45 = vld [vmem:[#allocation19 + $0x16c] ss:$12 sps:$4 sm:$0xff]  }
 0x99e   : > { %4540 = vmatpush1.bf16.msra.mxu0 %v7418_v25  ;;  %v7437_v25 = vld [vmem:[#allocation19 + $0x10c] ss:$12 sps:$4 sm:$0xff]  }
 0x99f   : > { %4541 = vmatprep.subr.bf16.mxu0 %v7419_v27  ;;  %v7438_v27 = vld [vmem:[#allocation20 + $0x10] sm:$0xff]  }
 0x9a2   : > { %4542 = vmatpush1.bf16.msra.mxu0 %v7420_v28  ;;  %v7439_v28 = vld [vmem:[#allocation19 + $0x108] ss:$12 sps:$4 sm:$0xff]  }
 0x9a3   : > { %4543 = vmatprep.subr.bf16.mxu0 %v7421_v22  ;;  %v7440_v22 = vld [vmem:[#allocation19 + $0x124] ss:$12 sps:$4 sm:$0xff]  }
 0x9a6   : > { %4544 = vmatpush1.bf16.msra.mxu0 %v7422_v29  ;;  %v7441_v29 = vld [vmem:[#allocation20 + $0x18] sm:$0xff]  }
 0x9a7   : > { %4545 = vmatprep.subr.bf16.mxu0 %v7423_v31  ;;  %v7442_v31 = vld [vmem:[#allocation19 + $0x120] ss:$12 sps:$4 sm:$0xff]  }
 0x9aa   : > { %4546 = vmatpush1.bf16.msra.mxu0 %v7424_v34  ;;  %v7443_v34 = vld [vmem:[#allocation19 + $0x13c] ss:$12 sps:$4 sm:$0xff]  }
 0x9ab   : > { %4547 = vmatprep.subr.bf16.mxu0 %v7425_v35  ;;  %v7444_v35 = vld [vmem:[#allocation20 + $0x20] sm:$0xff]  }
 0x9ae   : > { %4548 = vmatpush1.bf16.msra.mxu0 %v7426_v30  ;;  %v7445_v30 = vld [vmem:[#allocation19 + $0x138] ss:$12 sps:$4 sm:$0xff]  }
 0x9af   : > { %4549 = vmatprep.subr.bf16.mxu0 %v7427_v37  ;;  %v4373_v37 = vmul.f32 0.01, %v9098_v40 }
 0x9b1   : > { %v4374_v44 = vsel %vm4372_vm12, %v9098_v40, %v4373_v37  ;;  %v7455_v40 = vld [vmem:[#allocation19 + $0x19c] ss:$12 sps:$4 sm:$0xff]  }
 0x9b2   : > { %4550 = vmatpush1.bf16.msra.mxu0 %v7428_v38  ;;  %v7446_v38 = vld [vmem:[#allocation19 + $0x154] ss:$12 sps:$4 sm:$0xff]  }
 0x9b3   : > { %4679 = vmatprep.subr.bf16.mxu0 %v7429_v39  ;;  %v7447_v39 = vld [vmem:[#allocation20 + $0x28] sm:$0xff]  }
 0xa68   : > { %v6511_v47 = vpop.f32.mrb[76].mxu0 }
 0xa69   : > { %v4513_v48 = vadd.f32 %v6511_v47, %v9002_v17  ;;  %v4497_v49 = vpop.f32.mrb[77].mxu0  ;;  %v7450_v47 = vld [vmem:[#allocation20 + $0x30] sm:$0xff]  }
 0xa6a   : > { %v4511_v51 = vadd.f32 %v4497_v49, %v9002_v17  ;;  %v6512_v52 = vpop.f32.mrb[78].mxu0  ;;  %v7451_v49 = vld [vmem:[#allocation19 + $0x168] ss:$12 sps:$4 sm:$0xff]  }
 0xa6b   : > { %v4500_v54 = vpop.f32.mrb[79].mxu0  ;;  %v7453_v52 = vld [vmem:[#allocation20 + $0x38] sm:$0xff]  }
 0xa6c   : > { %v4512_v55 = vadd.f32 %v4500_v54, %v9002_v17  ;;  %v7454_v54 = vld [vmem:[#allocation19 + $0x180] ss:$12 sps:$4 sm:$0xff]  }
 0xa6e   : > { %v4514_v56 = vmax.f32 %v4511_v51, %v4512_v55 }
 0xa70   : > { %v4515_v1 = vmax.f32 %v4514_v56, %v4513_v48  ;;  %v7457_v56 = vld [vmem:[#allocation19 + $0x1b4] ss:$12 sps:$4 sm:$0xff]  }
 0xa72   : > { %v4516_v60 = vsub.f32 %v4511_v51, %v4515_v1  ;;  %v4519_v62 = vsub.f32 %v4512_v55, %v4515_v1  ;;  %v4522_v53 = vsub.f32 %v4513_v48, %v4515_v1  ;;  %v9119_v48 = vpack.c.bf16 %v4374_v44, %v4374_v44  ;;  %v7452_v51 = vld [vmem:[#allocation19 + $0x184] ss:$12 sps:$4 sm:$0xff]  }
 0xa73   : > { %v7456_v55 = vld [vmem:[#allocation19 + $0x198] ss:$12 sps:$4 sm:$0xff]   ;;  %v7458_v1 = vld [vmem:[#allocation19 + $0x1b0] ss:$12 sps:$4 sm:$0xff]  }
 0xa74   : > { %v4517_v2 = vmul.f32 1.442695, %v4516_v60  ;;  %v4520_v5 = vmul.f32 1.442695, %v4519_v62  ;;  %v4523_v16 = vmul.f32 1.442695, %v4522_v53 }
 0xa75   : > { %v7459_v60 = vld [vmem:[#allocation19 + $0x1cc] ss:$12 sps:$4 sm:$0xff]   ;;  %v7460_v62 = vld [vmem:[#allocation19 + $0x1c8] ss:$12 sps:$4 sm:$0xff]   ;;  %v7461_v53 = vld [vmem:[#allocation19 + $0x1e4] ss:$12 sps:$4 sm:$0xff]  }
 0xa76   : > { %7227 = vpow2.f32 %v4517_v2  ;;  %v7462_v2 = vld [vmem:[#allocation19 + $0x1e0] ss:$12 sps:$4 sm:$0xff]  }
 0xa77   : > { %7229 = vpow2.f32 %v4520_v5  ;;  %v7463_v5 = vld [vmem:[#allocation19 + $0x1fc] ss:$12 sps:$4 sm:$0xff]  }
 0xa78   : > { %7231 = vpow2.f32 %v4523_v16  ;;  %v7464_v16 = vld [vmem:[#allocation19 + $0x1f8] ss:$12 sps:$4 sm:$0xff]  }
 0xa80   : > { %v7228_v6 = vpop.eup %7227 }
 0xa81   : > { %v7230_v9 = vpop.eup %7229  ;;  %v4528_v8 = vmul.f32 %v7228_v6, %v9087_v7  ;;  %v7431_v7 = vld [vmem:[#allocation19 + $0xdc] ss:$12 sps:$4 sm:$0xff]  }
 0xa82   : > { %v7232_v32 = vpop.eup %7231  ;;  %v4525_v4 = vadd.f32 %v7230_v9, %v7228_v6  ;;  %v4529_v43 = vmul.f32 %v7230_v9, %v9089_v36  ;;  %v7433_v36 = vld [vmem:[#allocation19 + $0xd8] ss:$12 sps:$4 sm:$0xff]   ;;  %v7465_v6 = vld [vmem:[#allocation19 + $0x214] ss:$12 sps:$4 sm:$0xff]   ;;  %v4416_v9 = vmul.f32 0.01, %v9085_v50 }
 0xa83   : > { %v4531_v12 = vmul.f32 %v7232_v32, %v9093_v24  ;;  %v7434_v24 = vld [vmem:[#allocation19 + $0xf4] ss:$12 sps:$4 sm:$0xff]  }
 0xa84   : > { %v4526_v17 = vadd.f32 %v7232_v32, %v4525_v4  ;;  %v4530_v63 = vadd.f32 %v4529_v43, %v4528_v8  ;;  %v7466_v8 = vld [vmem:[#allocation19 + $0x210] ss:$12 sps:$4 sm:$0xff]   ;;  %v7467_v32 = vld [vmem:[#allocation19 + $0x22c] ss:$12 sps:$4 sm:$0xff]   ;;  %v4417_v4 = vsel %vm4415_vm13, %v9085_v50, %v4416_v9  ;;  %v7468_v43 = vld [vmem:[#allocation19 + $0x228] ss:$12 sps:$4 sm:$0xff]  }
 0xa85   : > { %v7472_v50 = vld [vmem:[#allocation19 + $0x1d0] ss:$12 sps:$4 sm:$0xff]  }
 0xa86   : > { %7233 = vrcp.f32 %v4526_v17  ;;  %v4532_v33 = vadd.f32 %v4531_v12, %v4530_v63  ;;  %v4822_v17 = vpack.c.bf16 %v4417_v4, %v4417_v4  ;;  %v7469_v63 = vld [vmem:[#allocation19 + $0x188] ss:$12 sps:$4 sm:$0xff]   ;;  %v7470_v12 = vld [vmem:[#allocation19 + $0x1a0] ss:$12 sps:$4 sm:$0xff]  }
 0xa90   : > { %v7234_v14 = vpop.eup %7233 }
 0xa91   : > { %v4533_v15 = vmul.f32 %v7234_v14, %v4532_v33  ;;  %v7471_v33 = vld [vmem:[#allocation19 + $0x1b8] ss:$12 sps:$4 sm:$0xff]   ;;  %v7473_v14 = vld [vmem:[#allocation19 + $0x1e8] ss:$12 sps:$4 sm:$0xff]  }
 0xa93   : > { %v4534_v18 = vpack.c.bf16 %v4533_v15, %v4533_v15  ;;  %v7474_v15 = vld [vmem:[#allocation19 + $0x200] ss:$12 sps:$4 sm:$0xff]  }
 0xa95   : > { %4568 = vmatmul.mubr.bf16.vlgmr.msra.gmra.mrb[56].mxu0 %v4534_v18  ;;  %6530 = vmatmul.mubr.bf16.vlgmr.msra.gmra.mrb[68].mxu1 %v4534_v18  ;;  %v7475_v18 = vld [vmem:[#allocation19 + $0x218] ss:$12 sps:$4 sm:$0xff]  }
 0xa96   : > { %4680 = vmatpush1.bf16.msra.mxu0 %v7430_v20  ;;  %4711 = vmatprep.mubr.bf16.mxu0 %v8091_v0  ;;  %v7476_v20 = vld [vmem:[#allocation19 + $0x230] ss:$12 sps:$4 sm:$0xff]  }
 0xa97   : > { %4681 = vmatprep.subr.bf16.mxu0 %v7431_v7  ;;  %6534 = vmatpush3.bf16.msra.mxu1 %v7432_v23  ;;  %v7477_v7 = vld [vmem:[#allocation20 + $0x80] sm:$0xff]   ;;  %v7478_v23 = vld [vmem:[#allocation20 + $0x88] sm:$0xff]  }
 0xa98   : > { %6535 = vmatprep.subr.bf16.mxu1 %v8092_v61  ;;  %6549 = vmatprep.mubr.msk.bf16.mxu1 %vm8093_vm0, %v8092_v61 }
 0xa9a   : > { %4682 = vmatpush1.bf16.msra.mxu0 %v7433_v36  ;;  %v7479_v36 = vld [vmem:[#allocation20 + $0x90] sm:$0xff]  }
 0xa9b   : > { %4683 = vmatprep.subr.bf16.mxu0 %v7434_v24  ;;  %6536 = vmatpush3.bf16.msra.mxu1 %v7435_v41  ;;  %v7480_v24 = vld [vmem:[#allocation20 + $0x98] sm:$0xff]   ;;  %v7481_v41 = vld [vmem:[#allocation20 + $0xa0] sm:$0xff]  }
 0xa9c   : > { %6537 = vmatprep.subr.bf16.mxu1 %v8092_v61 }
 0xa9e   : > { %4684 = vmatpush1.bf16.msra.mxu0 %v7436_v59  ;;  %v7482_v59 = vld [vmem:[#allocation20 + $0xa8] sm:$0xff]  }
 0xa9f   : > { %4685 = vmatprep.subr.bf16.mxu0 %v7437_v25  ;;  %6538 = vmatpush3.bf16.msra.mxu1 %v7438_v27  ;;  %v7483_v25 = vld [vmem:[#allocation20 + $0xb0] sm:$0xff]   ;;  %v7484_v27 = vld [vmem:[#allocation20 + $0xb8] sm:$0xff]  }
 0xaa0   : > { %6539 = vmatprep.subr.bf16.mxu1 %v8092_v61 }
 0xaa2   : > { %4686 = vmatpush1.bf16.msra.mxu0 %v7439_v28  ;;  %v9147_v28 = vpop.f32.mrb[64].mxu1 }
 0xaa3   : > { %4687 = vmatprep.subr.bf16.mxu0 %v7440_v22  ;;  %6540 = vmatpush3.bf16.msra.mxu1 %v7441_v29  ;;  %v6491_v22 = vpop.f32.mrb[65].mxu1  ;;  %vm4458_vm14 = vcmp.ge.f32.partialorder %v9147_v28, 0.0 }
 0xaa4   : > { %6541 = vmatprep.subr.bf16.mxu1 %v8092_v61  ;;  %v4455_v29 = vpop.f32.mrb[66].mxu1  ;;  %v7503_v22 = vld [vmem:[#allocation19 + $0x25c] ss:$12 sps:$4 sm:$0xff]  }
 0xaa5   : > { %v7504_v29 = vld [vmem:[#allocation19 + $0x258] ss:$12 sps:$4 sm:$0xff]  }
 0xaa6   : > { %4688 = vmatpush1.bf16.msra.mxu0 %v7442_v31  ;;  %v6492_v31 = vpop.f32.mrb[67].mxu1 }
 0xaa7   : > { %4689 = vmatprep.subr.bf16.mxu0 %v7443_v34  ;;  %6542 = vmatpush3.bf16.msra.mxu1 %v7444_v35  ;;  %v7505_v31 = vld [vmem:[#allocation19 + $0x274] ss:$12 sps:$4 sm:$0xff]  }
 0xaa8   : > { %6543 = vmatprep.subr.bf16.mxu1 %v8092_v61 }
 0xaaa   : > { %4690 = vmatpush1.bf16.msra.mxu0 %v7445_v30 }
 0xaab   : > { %4691 = vmatprep.subr.bf16.mxu0 %v7446_v38  ;;  %6544 = vmatpush3.bf16.msra.mxu1 %v7447_v39 }
 0xaac   : > { %6545 = vmatprep.subr.bf16.mxu1 %v8092_v61 }
 0xaae   : > { %4692 = vmatpush1.bf16.msra.mxu0 %v7448_v42 }
 0xaaf   : > { %4693 = vmatprep.subr.bf16.mxu0 %v7449_v45  ;;  %6546 = vmatpush3.bf16.msra.mxu1 %v7450_v47 }
 0xab0   : > { %6547 = vmatprep.subr.bf16.mxu1 %v8092_v61 }
 0xab2   : > { %4694 = vmatpush1.bf16.msra.mxu0 %v7451_v49 }
 0xab3   : > { %4823 = vmatprep.subr.bf16.mxu0 %v7452_v51  ;;  %6548 = vmatpush3.bf16.msra.mxu1 %v7453_v52  ;;  %v7485_v51 = vld [vmem:[#allocation19 + $0xc8] ss:$12 sps:$4 sm:$0xff]  }
 0xab4   : > { %6553 = vmatprep.subr.bf16.mxu1 %v8092_v61 }
 0xab5   : > { %4712 = vmatmul.mubr.bf16.vlgmr.msra.gmra.mrb[80].mxu0 %v9119_v48 }
 0xab6   : > { %4824 = vmatpush1.bf16.msra.mxu0 %v7454_v54  ;;  %4855 = vmatprep.mubr.bf16.mxu0 %v8091_v0 }
 0xab7   : > { %4825 = vmatprep.subr.bf16.mxu0 %v7455_v40 }
 0xaba   : > { %4826 = vmatpush1.bf16.msra.mxu0 %v7456_v55 }
 0xabb   : > { %4827 = vmatprep.subr.bf16.mxu0 %v7457_v56 }
 0xabe   : > { %4828 = vmatpush1.bf16.msra.mxu0 %v7458_v1  ;;  %v7486_v1 = vld [vmem:[#allocation19 + $0xe0] ss:$12 sps:$4 sm:$0xff]  }
 0xabf   : > { %4829 = vmatprep.subr.bf16.mxu0 %v7459_v60  ;;  %v7487_v60 = vld [vmem:[#allocation19 + $0xf8] ss:$12 sps:$4 sm:$0xff]  }
 0xac2   : > { %4830 = vmatpush1.bf16.msra.mxu0 %v7460_v62  ;;  %v7488_v62 = vld [vmem:[#allocation19 + $0x110] ss:$12 sps:$4 sm:$0xff]  }
 0xac3   : > { %4831 = vmatprep.subr.bf16.mxu0 %v7461_v53 }
 0xac6   : > { %4832 = vmatpush1.bf16.msra.mxu0 %v7462_v2  ;;  %v7491_v2 = vld [vmem:[#allocation19 + $0x158] ss:$12 sps:$4 sm:$0xff]  }
 0xac7   : > { %4833 = vmatprep.subr.bf16.mxu0 %v7463_v5  ;;  %v7492_v5 = vld [vmem:[#allocation19 + $0x170] ss:$12 sps:$4 sm:$0xff]  }
 0xaca   : > { %4834 = vmatpush1.bf16.msra.mxu0 %v7464_v16  ;;  %v7493_v16 = vld [vmem:[#allocation20 + $0x40] sm:$0xff]  }
 0xacb   : > { %4835 = vmatprep.subr.bf16.mxu0 %v7465_v6 }
 0xace   : > { %4836 = vmatpush1.bf16.msra.mxu0 %v7466_v8 }
 0xacf   : > { %4837 = vmatprep.subr.bf16.mxu0 %v7467_v32 }
 0xad2   : > { %4838 = vmatpush1.bf16.msra.mxu0 %v7468_v43 }
 0xad3   : > { %6593 = vmatprep.subr.bf16.mxu0 %v8092_v61 }
 0xad5   : > { %4856 = vmatmul.mubr.bf16.vlgmr.msra.gmra.mrb[84].mxu0 %v4822_v17 }
 0xad6   : > { %6594 = vmatpush3.bf16.msra.mxu0 %v7469_v63  ;;  %6609 = vmatprep.mubr.msk.bf16.mxu0 %vm8093_vm0, %v8092_v61  ;;  %v7494_v63 = vld [vmem:[#allocation20 + $0x48] sm:$0xff]  }
 0xad7   : > { %6595 = vmatprep.subr.bf16.mxu0 %v8092_v61 }
 0xada   : > { %6596 = vmatpush3.bf16.msra.mxu0 %v7470_v12 }
 0xadb   : > { %6597 = vmatprep.subr.bf16.mxu0 %v8092_v61 }
 0xade   : > { %6598 = vmatpush3.bf16.msra.mxu0 %v7471_v33  ;;  %v7495_v33 = vld [vmem:[#allocation20 + $0x50] sm:$0xff]  }
 0xadf   : > { %6599 = vmatprep.subr.bf16.mxu0 %v8092_v61 }
 0xae2   : > { %6600 = vmatpush3.bf16.msra.mxu0 %v7472_v50 }
 0xae3   : > { %6601 = vmatprep.subr.bf16.mxu0 %v8092_v61 }
 0xae6   : > { %6602 = vmatpush3.bf16.msra.mxu0 %v7473_v14  ;;  %v7497_v14 = vld [vmem:[#allocation20 + $0x60] sm:$0xff]  }
 0xae7   : > { %6603 = vmatprep.subr.bf16.mxu0 %v8092_v61 }
 0xaea   : > { %6604 = vmatpush3.bf16.msra.mxu0 %v7474_v15  ;;  %v7498_v15 = vld [vmem:[#allocation20 + $0x68] sm:$0xff]  }
 0xaeb   : > { %6605 = vmatprep.subr.bf16.mxu0 %v8092_v61 }
 0xaee   : > { %6606 = vmatpush3.bf16.msra.mxu0 %v7475_v18 }
 0xaef   : > { %6607 = vmatprep.subr.bf16.mxu0 %v8092_v61 }
 0xaf2   : > { %6608 = vmatpush3.bf16.msra.mxu0 %v7476_v20  ;;  %v7499_v20 = vld [vmem:[#allocation20 + $0x70] sm:$0xff]  }
 0xaf3   : > { %6613 = vmatprep.subr.bf16.mxu0 %v8092_v61 }
 0xaf5   : > { %6610 = vmatmul.mubr.bf16.vlgmr.msra.gmra.mrb[88].mxu0 %v4822_v17 }
 0xaf6   : > { %6614 = vmatpush3.bf16.msra.mxu0 %v7477_v7  ;;  %6629 = vmatprep.mubr.msk.bf16.mxu0 %vm8093_vm0, %v8092_v61 }
 0xaf7   : > { %6615 = vmatprep.subr.bf16.mxu0 %v8092_v61 }
 0xafa   : > { %6616 = vmatpush3.bf16.msra.mxu0 %v7478_v23 }
 0xafb   : > { %6617 = vmatprep.subr.bf16.mxu0 %v8092_v61 }
 0xafe   : > { %6618 = vmatpush3.bf16.msra.mxu0 %v7479_v36  ;;  %v7500_v36 = vld [vmem:[#allocation20 + $0x78] sm:$0xff]  }
 0xaff   : > { %6619 = vmatprep.subr.bf16.mxu0 %v8092_v61 }
 0xb02   : > { %6620 = vmatpush3.bf16.msra.mxu0 %v7480_v24 }
 0xb03   : > { %6621 = vmatprep.subr.bf16.mxu0 %v8092_v61 }
 0xb06   : > { %6622 = vmatpush3.bf16.msra.mxu0 %v7481_v41  ;;  %v7501_v41 = vld [vmem:[#allocation19 + $0x244] ss:$12 sps:$4 sm:$0xff]  }
 0xb07   : > { %6623 = vmatprep.subr.bf16.mxu0 %v8092_v61 }
 0xb0a   : > { %6624 = vmatpush3.bf16.msra.mxu0 %v7482_v59 }
 0xb0b   : > { %6625 = vmatprep.subr.bf16.mxu0 %v8092_v61 }
 0xb0e   : > { %6626 = vmatpush3.bf16.msra.mxu0 %v7483_v25 }
 0xb0f   : > { %6627 = vmatprep.subr.bf16.mxu0 %v8092_v61 }
 0xb12   : > { %6628 = vmatpush3.bf16.msra.mxu0 %v7484_v27  ;;  %v7502_v27 = vld [vmem:[#allocation19 + $0x240] ss:$12 sps:$4 sm:$0xff]  }
 0xb68   : > { %v4569_v34 = vpop.f32.mrb[56].mxu0 }
 0xb69   : > { %v5861_v35 = vmul.f32 -1.442695, %v4569_v34  ;;  %v9149_v30 = vpop.f32.mrb[57].mxu0  ;;  %v7506_v34 = vld [vmem:[#allocation19 + $0x270] ss:$12 sps:$4 sm:$0xff]  }
 0xb6a   : > { %v4573_v37 = vpop.f32.mrb[58].mxu0 }
 0xb6b   : > { %7235 = vpow2.f32 %v5861_v35  ;;  %v4574_v38 = vpop.f32.mrb[59].mxu0  ;;  %v7507_v35 = vld [vmem:[#allocation19 + $0x28c] ss:$12 sps:$4 sm:$0xff]   ;;  %v7508_v37 = vld [vmem:[#allocation19 + $0x288] ss:$12 sps:$4 sm:$0xff]  }
 0xb6c   : > { %v7509_v38 = vld [vmem:[#allocation19 + $0x2a4] ss:$12 sps:$4 sm:$0xff]  }
 0xb75   : > { %v7236_v39 = vpop.eup %7235 }
 0xb76   : > { %v4620_v42 = vadd.f32 1.0, %v7236_v39  ;;  %v7510_v39 = vld [vmem:[#allocation19 + $0x2a0] ss:$12 sps:$4 sm:$0xff]  }
 0xb78   : > { %7237 = vrcp.f32 %v4620_v42  ;;  %v7511_v42 = vld [vmem:[#allocation19 + $0x2bc] ss:$12 sps:$4 sm:$0xff]  }
 0xb82   : > { %v7238_v44 = vpop.eup %7237 }
 0xb83   : > { %v4630_v45 = vmul.f32 %v7238_v44, %v8934_v57  ;;  %v7513_v44 = vld [vmem:[#allocation19 + $0x2d4] ss:$12 sps:$4 sm:$0xff]  }
 0xb85   : > { %v4631_v47 = vpack.c.bf16 %v4630_v45, %v4630_v45  ;;  %v4459_v45 = vmul.f32 0.01, %v9147_v28 }
 0xb87   : > { %6550 = vmatmul.mubr.bf16.vlgmr.msra.gmra.mrb[68].mxu1 %v4631_v47  ;;  %v7514_v47 = vld [vmem:[#allocation19 + $0x2d0] ss:$12 sps:$4 sm:$0xff]  }
 0xb88   : > { %v4713_v49 = vpop.f32.mrb[80].mxu0  ;;  %6554 = vmatpush3.bf16.msra.mxu1 %v7485_v51  ;;  %6569 = vmatprep.mubr.msk.bf16.mxu1 %vm8093_vm0, %v8092_v61  ;;  %v4460_v51 = vsel %vm4458_vm14, %v9147_v28, %v4459_v45  ;;  %v7520_v28 = vld [vmem:[#allocation19 + $0x290] ss:$12 sps:$4 sm:$0xff]  }
 0xb89   : > { %v4760_v52 = vadd.f32 %v4713_v49, %v9027_v3  ;;  %v4715_v54 = vpop.f32.mrb[81].mxu0  ;;  %6555 = vmatprep.subr.bf16.mxu1 %v8092_v61  ;;  %v7489_v3 = vld [vmem:[#allocation19 + $0x128] ss:$12 sps:$4 sm:$0xff]   ;;  %v7515_v49 = vld [vmem:[#allocation19 + $0x2ec] ss:$12 sps:$4 sm:$0xff]  }
 0xb8a   : > { %v9157_v40 = vadd.f32 %v4715_v54, %v9039_v10  ;;  %v4717_v55 = vpop.f32.mrb[82].mxu0  ;;  %v7490_v10 = vld [vmem:[#allocation19 + $0x140] ss:$12 sps:$4 sm:$0xff]   ;;  %v4966_v54 = vpack.c.bf16 %v4460_v51, %v4460_v51 }
 0xb8b   : > { %v4718_v56 = vpop.f32.mrb[83].mxu0  ;;  %v5863_v53 = vmul.f32 -1.442695, %v4760_v52  ;;  %v7516_v52 = vld [vmem:[#allocation19 + $0x2e8] ss:$12 sps:$4 sm:$0xff]  }
 0xb8c   : > { %6556 = vmatpush3.bf16.msra.mxu1 %v7486_v1  ;;  %v7517_v55 = vld [vmem:[#allocation19 + $0x248] ss:$12 sps:$4 sm:$0xff]   ;;  %v7518_v56 = vld [vmem:[#allocation19 + $0x260] ss:$12 sps:$4 sm:$0xff]   ;;  %v7519_v1 = vld [vmem:[#allocation19 + $0x278] ss:$12 sps:$4 sm:$0xff]  }
 0xb8d   : > { %6557 = vmatprep.subr.bf16.mxu1 %v8092_v61  ;;  %7239 = vpow2.f32 %v5863_v53  ;;  %v7525_v53 = vld [vmem:[#allocation20 + $0xc0] sm:$0xff]  }
 0xb90   : > { %6558 = vmatpush3.bf16.msra.mxu1 %v7487_v60  ;;  %v7521_v60 = vld [vmem:[#allocation19 + $0x2a8] ss:$12 sps:$4 sm:$0xff]  }
 0xb91   : > { %6559 = vmatprep.subr.bf16.mxu1 %v8092_v61 }
 0xb94   : > { %6560 = vmatpush3.bf16.msra.mxu1 %v7488_v62  ;;  %v7522_v62 = vld [vmem:[#allocation19 + $0x2c0] ss:$12 sps:$4 sm:$0xff]  }
 0xb95   : > { %6561 = vmatprep.subr.bf16.mxu1 %v8092_v61 }
 0xb98   : > { %6562 = vmatpush3.bf16.msra.mxu1 %v7489_v3  ;;  %v7523_v3 = vld [vmem:[#allocation19 + $0x2d8] ss:$12 sps:$4 sm:$0xff]  }
 0xb99   : > { %6563 = vmatprep.subr.bf16.mxu1 %v8092_v61 }
 0xb9c   : > { %6564 = vmatpush3.bf16.msra.mxu1 %v7490_v10  ;;  %v7524_v10 = vld [vmem:[#allocation19 + $0x2f0] ss:$12 sps:$4 sm:$0xff]  }
 0xb9d   : > { %6565 = vmatprep.subr.bf16.mxu1 %v8092_v61 }
 0xba0   : > { %6566 = vmatpush3.bf16.msra.mxu1 %v7491_v2  ;;  %v7526_v2 = vld [vmem:[#allocation20 + $0xc8] sm:$0xff]  }
 0xba1   : > { %6567 = vmatprep.subr.bf16.mxu1 %v8092_v61 }
 0xba4   : > { %6568 = vmatpush3.bf16.msra.mxu1 %v7492_v5  ;;  %v7527_v5 = vld [vmem:[#allocation20 + $0xd0] sm:$0xff]  }
 0xba5   : > { %6573 = vmatprep.subr.bf16.mxu1 %v8092_v61 }
 0xba7   : > { %6570 = vmatmul.mubr.bf16.vlgmr.msra.gmra.mrb[72].mxu1 %v9119_v48  ;;  %v7240_v48 = vpop.eup %7239 }
 0xba8   : > { %6574 = vmatpush3.bf16.msra.mxu1 %v7493_v16  ;;  %v4857_v6 = vpop.f32.mrb[84].mxu0  ;;  %6589 = vmatprep.mubr.msk.bf16.mxu1 %vm8093_vm0, %v8092_v61  ;;  %v4764_v12 = vadd.f32 1.0, %v7240_v48  ;;  %v7528_v16 = vld [vmem:[#allocation20 + $0xd8] sm:$0xff]  }
 0xba9   : > { %v4904_v9 = vadd.f32 %v4857_v6, %v9043_v21  ;;  %v4859_v8 = vpop.f32.mrb[85].mxu0  ;;  %6575 = vmatprep.subr.bf16.mxu1 %v8092_v61  ;;  %v7496_v21 = vld [vmem:[#allocation20 + $0x58] sm:$0xff]   ;;  %v7529_v6 = vld [vmem:[#allocation20 + $0xe0] sm:$0xff]  }
 0xbaa   : > { %v9172_v32 = vadd.f32 %v4859_v8, %v9041_v19  ;;  %v4861_v4 = vpop.f32.mrb[86].mxu0  ;;  %v7531_v8 = vld [vmem:[#allocation20 + $0xf0] sm:$0xff]  }
 0xbab   : > { %v5865_v43 = vmul.f32 -1.442695, %v4904_v9  ;;  %v4862_v17 = vpop.f32.mrb[87].mxu0  ;;  %v7530_v9 = vld [vmem:[#allocation20 + $0xe8] sm:$0xff]   ;;  %v7532_v4 = vld [vmem:[#allocation20 + $0xf8] sm:$0xff]  }
 0xbac   : > { %6576 = vmatpush3.bf16.msra.mxu1 %v7494_v63 }
 0xbad   : > { %7241 = vpow2.f32 %v5865_v43  ;;  %6577 = vmatprep.subr.bf16.mxu1 %v8092_v61  ;;  %v5862_v43 = vmul.f32 -1.442695, %v9149_v30 }
 0xbae   : > { %7243 = vrcp.f32 %v4764_v12 }
 0xbb0   : > { %6578 = vmatpush3.bf16.msra.mxu1 %v7495_v33 }
 0xbb1   : > { %6579 = vmatprep.subr.bf16.mxu1 %v8092_v61 }
 0xbb4   : > { %6580 = vmatpush3.bf16.msra.mxu1 %v7496_v21 }
 0xbb5   : > { %6581 = vmatprep.subr.bf16.mxu1 %v8092_v61 }
 0xbb7   : > { %v7242_v19 = vpop.eup %7241 }
 0xbb8   : > { %v4908_v50 = vadd.f32 1.0, %v7242_v19  ;;  %6582 = vmatpush3.bf16.msra.mxu1 %v7497_v14  ;;  %v7244_v18 = vpop.eup %7243 }
 0xbb9   : > { %6583 = vmatprep.subr.bf16.mxu1 %v8092_v61  ;;  %v4774_v7 = vmul.f32 %v7244_v18, %v8941_v13 }
 0xbba   : > { %7245 = vrcp.f32 %v4908_v50 }
 0xbbb   : > { %v4775_v24 = vpack.c.bf16 %v4774_v7, %v4774_v7  ;;  %7247 = vpow2.f32 %v5862_v43  ;;  %v5866_v7 = vmul.f32 -1.442695, %v9172_v32 }
 0xbbc   : > { %6584 = vmatpush3.bf16.msra.mxu1 %v7498_v15 }
 0xbbd   : > { %6585 = vmatprep.subr.bf16.mxu1 %v8092_v61 }
 0xbc0   : > { %6586 = vmatpush3.bf16.msra.mxu1 %v7499_v20  ;;  %v5864_v20 = vmul.f32 -1.442695, %v9157_v40 }
 0xbc1   : > { %6587 = vmatprep.subr.bf16.mxu1 %v8092_v61 }
 0xbc4   : > { %v7246_v23 = vpop.eup %7245  ;;  %6588 = vmatpush3.bf16.msra.mxu1 %v7500_v36 }
 0xbc5   : > { %4967 = vmatprep.subr.bf16.mxu1 %v7501_v41  ;;  %v4918_v59 = vmul.f32 %v7246_v23, %v8992_v26  ;;  %v7248_v17 = vpop.eup %7247 }
 0xbc6   : > { %v4627_v12 = vadd.f32 1.0, %v7248_v17 }
 0xbc7   : > { %6590 = vmatmul.mubr.bf16.vlgmr.msra.gmra.mrb[72].mxu1 %v4775_v24  ;;  %v4919_v25 = vpack.c.bf16 %v4918_v59, %v4918_v59 }
 0xbc8   : > { %4968 = vmatpush1.bf16.msra.mxu1 %v7502_v27  ;;  %4999 = vmatprep.mubr.bf16.mxu1 %v8091_v0  ;;  %v7512_v0 = vld [vmem:[#allocation19 + $0x2b8] ss:$12 sps:$4 sm:$0xff]  }
 0xbc9   : > { %6630 = vmatmul.mubr.bf16.vlgmr.msra.gmra.mrb[88].mxu0 %v4919_v25  ;;  %4969 = vmatprep.subr.bf16.mxu1 %v7503_v22 }
 0xbcc   : > { %4970 = vmatpush1.bf16.msra.mxu1 %v7504_v29 }
 0xbcd   : > { %4971 = vmatprep.subr.bf16.mxu1 %v7505_v31 }
 0xbd0   : > { %4972 = vmatpush1.bf16.msra.mxu1 %v7506_v34 }
 0xbd1   : > { %4973 = vmatprep.subr.bf16.mxu1 %v7507_v35 }
 0xbd4   : > { %4974 = vmatpush1.bf16.msra.mxu1 %v7508_v37 }
 0xbd5   : > { %4975 = vmatprep.subr.bf16.mxu1 %v7509_v38 }
 0xbd8   : > { %4976 = vmatpush1.bf16.msra.mxu1 %v7510_v39 }
 0xbd9   : > { %4977 = vmatprep.subr.bf16.mxu1 %v7511_v42 }
 0xbdc   : > { %4978 = vmatpush1.bf16.msra.mxu1 %v7512_v0 }
 0xbdd   : > { %4979 = vmatprep.subr.bf16.mxu1 %v7513_v44 }
 0xbe0   : > { %4980 = vmatpush1.bf16.msra.mxu1 %v7514_v47 }
 0xbe1   : > { %4981 = vmatprep.subr.bf16.mxu1 %v7515_v49 }
 0xbe4   : > { %4982 = vmatpush1.bf16.msra.mxu1 %v7516_v52 }
 0xbe5   : > { %6633 = vmatprep.subr.bf16.mxu1 %v8092_v61 }
 0xbe7   : > { %5000 = vmatmul.mubr.bf16.vlgmr.msra.gmra.mrb[76].mxu1 %v4966_v54 }
 0xbe8   : > { %6634 = vmatpush3.bf16.msra.mxu1 %v7517_v55  ;;  %6649 = vmatprep.mubr.msk.bf16.mxu1 %vm8093_vm0, %v8092_v61 }
 0xbe9   : > { %6635 = vmatprep.subr.bf16.mxu1 %v8092_v61 }
 0xbec   : > { %6636 = vmatpush3.bf16.msra.mxu1 %v7518_v56 }
 0xbed   : > { %6637 = vmatprep.subr.bf16.mxu1 %v8092_v61 }
 0xbf0   : > { %6638 = vmatpush3.bf16.msra.mxu1 %v7519_v1 }
 0xbf1   : > { %6639 = vmatprep.subr.bf16.mxu1 %v8092_v61 }
 0xbf4   : > { %6640 = vmatpush3.bf16.msra.mxu1 %v7520_v28 }
 0xbf5   : > { %6641 = vmatprep.subr.bf16.mxu1 %v8092_v61 }
 0xbf8   : > { %6642 = vmatpush3.bf16.msra.mxu1 %v7521_v60 }
 0xbf9   : > { %6643 = vmatprep.subr.bf16.mxu1 %v8092_v61 }
 0xbfc   : > { %6644 = vmatpush3.bf16.msra.mxu1 %v7522_v62 }
 0xbfd   : > { %6645 = vmatprep.subr.bf16.mxu1 %v8092_v61 }
 0xc00   : > { %6646 = vmatpush3.bf16.msra.mxu1 %v7523_v3 }
 0xc01   : > { %6647 = vmatprep.subr.bf16.mxu1 %v8092_v61 }
 0xc04   : > { %6648 = vmatpush3.bf16.msra.mxu1 %v7524_v10 }
 0xc05   : > { %6653 = vmatprep.subr.bf16.mxu1 %v8092_v61 }
 0xc07   : > { %6650 = vmatmul.mubr.bf16.vlgmr.msra.gmra.mrb[80].mxu1 %v4966_v54 }
 0xc08   : > { %6654 = vmatpush3.bf16.msra.mxu1 %v7525_v53  ;;  %6669 = vmatprep.mubr.msk.bf16.mxu1 %vm8093_vm0, %v8092_v61 }
 0xc09   : > { %6655 = vmatprep.subr.bf16.mxu1 %v8092_v61 }
 0xc0c   : > { %6656 = vmatpush3.bf16.msra.mxu1 %v7526_v2 }
 0xc0d   : > { %6657 = vmatprep.subr.bf16.mxu1 %v8092_v61 }
 0xc10   : > { %6658 = vmatpush3.bf16.msra.mxu1 %v7527_v5 }
 0xc11   : > { %6659 = vmatprep.subr.bf16.mxu1 %v8092_v61 }
 0xc14   : > { %6660 = vmatpush3.bf16.msra.mxu1 %v7528_v16 }
 0xc15   : > { %6661 = vmatprep.subr.bf16.mxu1 %v8092_v61 }
 0xc18   : > { %6662 = vmatpush3.bf16.msra.mxu1 %v7529_v6 }
 0xc19   : > { %6663 = vmatprep.subr.bf16.mxu1 %v8092_v61 }
 0xc1c   : > { %6664 = vmatpush3.bf16.msra.mxu1 %v7530_v9 }
 0xc1d   : > { %6665 = vmatprep.subr.bf16.mxu1 %v8092_v61 }
 0xc20   : > { %6666 = vmatpush3.bf16.msra.mxu1 %v7531_v8 }
 0xc21   : > { %6667 = vmatprep.subr.bf16.mxu1 %v8092_v61 }
 0xc24   : > { %6668 = vmatpush3.bf16.msra.mxu1 %v7532_v4 }
 0xc5a   : > { %v4666_v63 = vpop.f32.mrb[68].mxu1 }
 0xc5b   : > { %7249 = vtanh.f32 %v4666_v63  ;;  %v6551_v48 = vpop.f32.mrb[69].mxu1 }
 0xc5c   : > { %v4669_v33 = vpop.f32.mrb[70].mxu1  ;;  %7251 = vrcp.f32 %v4627_v12 }
 0xc5d   : > { %v6552_v21 = vpop.f32.mrb[71].mxu1 }
 0xc65   : > { %v7250_v19 = vpop.eup %7249 }
 0xc66   : > { %7253 = vtanh.f32 %v7250_v19  ;;  %v7252_v50 = vpop.eup %7251 }
 0xc67   : > { %v4673_v14 = vsub.f32 1.0, %v7252_v50  ;;  %7255 = vpow2.f32 %v5864_v20 }
 0xc68   : > { %7257 = vpow2.f32 %v5866_v7 }
 0xc69   : > { %v4674_v15 = vmul.f32 %v4673_v14, %v8934_v57 }
 0xc70   : > { %v7254_v61 = vpop.eup %7253 }
 0xc71   : > { %v4676_v18 = vmul.f32 %v7254_v61, %v7252_v50  ;;  %v7256_v23 = vpop.eup %7255 }
 0xc72   : > { %v7258_v24 = vpop.eup %7257  ;;  %v4771_v59 = vadd.f32 1.0, %v7256_v23 }
 0xc73   : > { %v4677_v30 = vadd.f32 %v4676_v18, %v4674_v15  ;;  %v4915_v29 = vadd.f32 1.0, %v7258_v24 }
 0xc75   : > { %5110 = vst [vmem:[%s904_s23] sm:$0xff] %v4677_v30 }
 0xc9a   : > { %v4810_v36 = vpop.f32.mrb[72].mxu1 }
 0xc9b   : > { %7259 = vtanh.f32 %v4810_v36  ;;  %v6591_v41 = vpop.f32.mrb[73].mxu1 }
 0xc9c   : > { %v4813_v25 = vpop.f32.mrb[74].mxu1  ;;  %v4954_v27 = vpop.f32.mrb[88].mxu0 }
 0xc9d   : > { %7261 = vtanh.f32 %v4954_v27  ;;  %v6592_v57 = vpop.f32.mrb[75].mxu1  ;;  %v6631_v22 = vpop.f32.mrb[89].mxu0 }
 0xc9e   : > { %v4957_v31 = vpop.f32.mrb[90].mxu0  ;;  %7263 = vrcp.f32 %v4771_v59 }
 0xc9f   : > { %v6632_v34 = vpop.f32.mrb[91].mxu0  ;;  %7265 = vrcp.f32 %v4915_v29 }
 0xca5   : > { %v7260_v40 = vpop.eup %7259 }
 0xca6   : > { %7267 = vtanh.f32 %v7260_v40 }
 0xca7   : > { %v7262_v32 = vpop.eup %7261 }
 0xca8   : > { %7269 = vtanh.f32 %v7262_v32  ;;  %v7264_v35 = vpop.eup %7263 }
 0xca9   : > { %v7266_v37 = vpop.eup %7265  ;;  %v4817_v38 = vsub.f32 1.0, %v7264_v35 }
 0xcaa   : > { %v4961_v39 = vsub.f32 1.0, %v7266_v37 }
 0xcab   : > { %v4818_v44 = vmul.f32 %v4817_v38, %v8941_v13 }
 0xcac   : > { %v4962_v49 = vmul.f32 %v4961_v39, %v8992_v26 }
 0xcb0   : > { %v7268_v42 = vpop.eup %7267 }
 0xcb1   : > { %v4820_v0 = vmul.f32 %v7268_v42, %v7264_v35 }
 0xcb2   : > { %v7270_v45 = vpop.eup %7269 }
 0xcb3   : > { %v4821_v47 = vadd.f32 %v4820_v0, %v4818_v44  ;;  %v4964_v51 = vmul.f32 %v7270_v45, %v7266_v37 }
 0xcb5   : > { %5112 = vst [vmem:[%s918_s11] sm:$0xff] %v4821_v47  ;;  %v4965_v52 = vadd.f32 %v4964_v51, %v4962_v49 }
 0xcb7   : > { %5113 = vst [vmem:[%s925_s9] sm:$0xff] %v4965_v52 }
 0xcba   : > { %v5001_v54 = vpop.f32.mrb[76].mxu1 }
 0xcbb   : > { %v5048_v55 = vadd.f32 %v5001_v54, %v9054_v11  ;;  %v5003_v56 = vpop.f32.mrb[77].mxu1 }
 0xcbc   : > { %v9223_v13 = vadd.f32 %v5003_v56, %v9052_v46  ;;  %v5005_v1 = vpop.f32.mrb[78].mxu1 }
 0xcbd   : > { %v5867_v26 = vmul.f32 -1.442695, %v5048_v55  ;;  %v5006_v28 = vpop.f32.mrb[79].mxu1 }
 0xcbf   : > { %7271 = vpow2.f32 %v5867_v26 }
 0xcc9   : > { %v7272_v60 = vpop.eup %7271 }
 0xcca   : > { %v5052_v62 = vadd.f32 1.0, %v7272_v60 }
 0xccc   : > { %7273 = vrcp.f32 %v5052_v62 }
 0xcd6   : > { %v7274_v3 = vpop.eup %7273 }
 0xcd7   : > { %v5062_v10 = vmul.f32 %v7274_v3, %v9014_v58 }
 0xcd9   : > { %v5063_v53 = vpack.c.bf16 %v5062_v10, %v5062_v10 }
 0xcdb   : > { %6670 = vmatmul.mubr.bf16.vlgmr.msra.gmra.mrb[80].mxu1 %v5063_v53 }
 0xcdc   : > { %7898 = shalt.err (!%p7895_p13)
}
 0xcdd   : > { %s7899_s28 = scalar_lea.hbm %s9233_s21, 128  ;;  %s7903_s29 = scalar_lea.hbm %s9486_s10, 256 }
 0xcde   : > { %p7900_p8 = scmp.ne.s32.totalorder %s9233_s21, %s7899_s28  ;;  %p7904_p7 = scmp.lt.u32.totalorder %s9233_s21, %s9486_s10 }
 0xcdf   : > { %p7905_p9 = scmp.lt.u32.totalorder %s7903_s29, %s7899_s28  ;;  %p7907_p1 = scmp.lt.u32.totalorder %s7899_s28, %s9233_s21 }
 0xce0   : > { %p7901_p10 = pnand %p7900_p8, %p9487_p11 }
 0xce1   : > { %p7906_p0 = por %p7905_p9, %p7904_p7 }
 0xce2   : > { %p7902_p4 = pneg %p7901_p10 }
 0xce3   : > { %p7908_p12 = por %p7907_p1, %p7906_p0 }
 0xce5   : > { %p7909_p5 = pnand %p7908_p12, %p7902_p4 }
 0xce7   : > { %7912 = shalt.err (!%p7909_p5)
}
 0xce8   : > { %6745 = dma.vmem_to_hbm [thread:$0]  (%p9487_p11), %s5144_s14, 128, %s9233_s21, %s5115_s30  }
 0xce9   : > { %s9488_s20 = sld [smem:[#allocation58_spill]]  ;;  %s5182_s1 = sshll.u32 %s925_s9, 4  ;;  %s5183_s1 = int_to_ptr.vmem [resolvable:$true] %s5182_s1 }
 0xcea   : > { %s5130_s28 = scalar_lea.sflag [#allocation27], %s8615_s16  ;;  %s7913_s6 = scalar_lea.vmem %s5183_s1, 128 }
 0xceb   : > { %p7914_p6 = scmp.ne.s32.totalorder %s5183_s1, %s7913_s6  ;;  %s8095_s0 = smov [#allocation26]  }
 0xcec   : > { %s7917_s29 = sshll.u32 %s8095_s0, 4  ;;  %s7918_s29 = int_to_ptr.vmem [resolvable:$false] %s7917_s29 }
 0xced   : > { %p7915_p3 = pnand %p7914_p6, %p9487_p11  ;;  %s7919_s23 = scalar_lea.vmem %s7918_s29, 256 }
 0xcee   : > { %p7920_p13 = scmp.lt.s32.totalorder %s5183_s1, %s7918_s29  ;;  %p7921_p8 = scmp.lt.s32.totalorder %s7919_s23, %s7913_s6 }
 0xcef   : > { %s9259_s19 = scalar_lea.hbm %s9488_s20, %s9227_s5  ;;  %p7916_p2 = pneg %p7915_p3 }
 0xcf0   : > { %p7922_p10 = por %p7921_p8, %p7920_p13 }
 0xcf2   : > { %p7923_p4 = pnand %p7922_p10, %p7916_p2 }
 0xcf4   : > { %7926 = shalt.err (!%p7923_p4)
}
 0xcf5   : > { %s7927_s16 = scalar_lea.hbm %s9259_s19, 128  ;;  %s7931_s14 = scalar_lea.hbm %s9488_s20, 256 }
 0xcf6   : > { %p7928_p7 = scmp.ne.s32.totalorder %s9259_s19, %s7927_s16  ;;  %p7932_p1 = scmp.lt.u32.totalorder %s9259_s19, %s9488_s20 }
 0xcf7   : > { %p7933_p12 = scmp.lt.u32.totalorder %s7931_s14, %s7927_s16  ;;  %p7935_p6 = scmp.lt.u32.totalorder %s7927_s16, %s9259_s19 }
 0xcf8   : > { %p7929_p9 = pnand %p7928_p7, %p9487_p11 }
 0xcf9   : > { %p7934_p5 = por %p7933_p12, %p7932_p1 }
 0xcfa   : > { %p7930_p0 = pneg %p7929_p9 }
 0xcfb   : > { %p7936_p3 = por %p7935_p6, %p7934_p5 }
 0xcfd   : > { %p7937_p2 = pnand %p7936_p3, %p7930_p0 }
 0xcff   : > { %7940 = shalt.err (!%p7937_p2)
}
 0xd00   : > { %6748 = dma.vmem_to_hbm [thread:$0]  (%p9487_p11), %s5183_s1, 128, %s9259_s19, %s5130_s28   ;;  %v5868_v46 = vmul.f32 -1.442695, %v9223_v13 }
 0xd01   : > { %s911_s17 = scalar_lea.vmem [#allocation23], %s8650_s22  ;;  %s5169_s19 = sshll.u32 %s918_s11, 4  ;;  %s9300_s19 = int_to_ptr.vmem [resolvable:$true] %s5169_s19 }
 0xd02   : > { %7275 = vpow2.f32 %v5868_v46  ;;  %s5156_s26 = sshll.u32 %s911_s17, 4  ;;  %s9489_s6 = sld [smem:[#allocation56_spill]]  ;;  %s9292_s26 = int_to_ptr.vmem [resolvable:$true] %s5156_s26 }
 0xd03   : > { %s9490_s16 = sld [smem:[#allocation57_spill]]  ;;  %s5120_s22 = scalar_lea.sflag [#allocation24], %s8627_s18 }
 0xd04   : > { %s7941_s11 = scalar_lea.vmem %s9292_s26, 128  ;;  %s8096_s21 = smov [#allocation23]  }
 0xd05   : > { %p7942_p13 = scmp.ne.s32.totalorder %s9292_s26, %s7941_s11  ;;  %s7945_s14 = sshll.u32 %s8096_s21, 4  ;;  %s7946_s14 = int_to_ptr.vmem [resolvable:$false] %s7945_s14 }
 0xd06   : > { %s7947_s30 = scalar_lea.vmem %s7946_s14, 256  ;;  %p7948_p4 = scmp.lt.s32.totalorder %s9292_s26, %s7946_s14 }
 0xd07   : > { %p7943_p8 = pnand %p7942_p13, %p9487_p11  ;;  %p7949_p7 = scmp.lt.s32.totalorder %s7947_s30, %s7941_s11 }
 0xd08   : > { %s9290_s0 = scalar_lea.hbm %s9489_s6, %s9227_s5 }
 0xd09   : > { %s9298_s9 = scalar_lea.hbm %s9490_s16, %s9227_s5  ;;  %p7944_p10 = pneg %p7943_p8 }
 0xd0a   : > { %p7950_p9 = por %p7949_p7, %p7948_p4 }
 0xd0c   : > { %v7276_v11 = vpop.eup %7275  ;;  %p7951_p0 = pnand %p7950_p9, %p7944_p10 }
 0xd0d   : > { %v5059_v16 = vadd.f32 1.0, %v7276_v11 }
 0xdae   : > { %v5098_v2 = vpop.f32.mrb[80].mxu1 }
 0xdaf   : > { %7277 = vtanh.f32 %v5098_v2  ;;  %v6671_v5 = vpop.f32.mrb[81].mxu1 }
 0xdb0   : > { %v5101_v6 = vpop.f32.mrb[82].mxu1  ;;  %7279 = vrcp.f32 %v5059_v16 }
 0xdb1   : > { %v6672_v9 = vpop.f32.mrb[83].mxu1 }
 0xdb9   : > { %v7278_v8 = vpop.eup %7277 }
 0xdba   : > { %7281 = vtanh.f32 %v7278_v8  ;;  %v7280_v4 = vpop.eup %7279 }
 0xdbb   : > { %v5105_v43 = vsub.f32 1.0, %v7280_v4 }
 0xdbd   : > { %v5106_v63 = vmul.f32 %v5105_v43, %v9014_v58 }
 0xdc4   : > { %v7282_v17 = vpop.eup %7281 }
 0xdc5   : > { %v5108_v48 = vmul.f32 %v7282_v17, %v7280_v4 }
 0xdc7   : > { %v5109_v12 = vadd.f32 %v5108_v48, %v5106_v63 }
 0xdc9   : > { %5111 = vst [vmem:[%s911_s17] sm:$0xff] %v5109_v12 }
 0xdca   : > { %7954 = shalt.err (!%p7951_p0)
}
 0xdcb   : > { %s7955_s5 = scalar_lea.hbm %s9290_s0, 128  ;;  %s7959_s1 = scalar_lea.hbm %s9489_s6, 256 }
 0xdcc   : > { %p7956_p1 = scmp.ne.s32.totalorder %s9290_s0, %s7955_s5  ;;  %p7960_p6 = scmp.lt.u32.totalorder %s9290_s0, %s9489_s6 }
 0xdcd   : > { %p7961_p3 = scmp.lt.u32.totalorder %s7959_s1, %s7955_s5  ;;  %p7963_p13 = scmp.lt.u32.totalorder %s7955_s5, %s9290_s0 }
 0xdce   : > { %p7957_p12 = pnand %p7956_p1, %p9487_p11 }
 0xdcf   : > { %p7962_p2 = por %p7961_p3, %p7960_p6 }
 0xdd0   : > { %p7958_p5 = pneg %p7957_p12 }
 0xdd1   : > { %p7964_p8 = por %p7963_p13, %p7962_p2 }
 0xdd3   : > { %p7965_p10 = pnand %p7964_p8, %p7958_p5 }
 0xdd5   : > { %7968 = shalt.err (!%p7965_p10)
}
 0xdd6   : > { %6746 = dma.vmem_to_hbm [thread:$0]  (%p9487_p11), %s9292_s26, 128, %s9290_s0, %s5120_s22  }
 0xdd7   : > { %s7969_s23 = scalar_lea.vmem %s9300_s19, 128  ;;  %s8097_s11 = smov [#allocation25]  }
 0xdd8   : > { %p7970_p4 = scmp.ne.s32.totalorder %s9300_s19, %s7969_s23  ;;  %s7973_s21 = sshll.u32 %s8097_s11, 4  ;;  %s7974_s21 = int_to_ptr.vmem [resolvable:$false] %s7973_s21 }
 0xdd9   : > { %s7975_s14 = scalar_lea.vmem %s7974_s21, 256  ;;  %p7976_p0 = scmp.lt.s32.totalorder %s9300_s19, %s7974_s21 }
 0xdda   : > { %p7971_p7 = pnand %p7970_p4, %p9487_p11  ;;  %p7977_p1 = scmp.lt.s32.totalorder %s7975_s14, %s7969_s23 }
 0xddc   : > { %p7972_p9 = pneg %p7971_p7  ;;  %p7978_p12 = por %p7977_p1, %p7976_p0 }
 0xdde   : > { %p7979_p5 = pnand %p7978_p12, %p7972_p9 }
 0xde0   : > { %7982 = shalt.err (!%p7979_p5)
}
 0xde1   : > { %s7983_s26 = scalar_lea.hbm %s9298_s9, 128  ;;  %s7987_s5 = scalar_lea.hbm %s9490_s16, 256 }
 0xde2   : > { %p7984_p6 = scmp.ne.s32.totalorder %s9298_s9, %s7983_s26  ;;  %p7988_p13 = scmp.lt.u32.totalorder %s9298_s9, %s9490_s16 }
 0xde3   : > { %p7989_p8 = scmp.lt.u32.totalorder %s7987_s5, %s7983_s26  ;;  %p7991_p4 = scmp.lt.u32.totalorder %s7983_s26, %s9298_s9 }
 0xde4   : > { %p7985_p3 = pnand %p7984_p6, %p9487_p11 }
 0xde5   : > { %p7990_p10 = por %p7989_p8, %p7988_p13 }
 0xde6   : > { %p7986_p2 = pneg %p7985_p3 }
 0xde7   : > { %p7992_p7 = por %p7991_p4, %p7990_p10 }
 0xde9   : > { %p7993_p9 = pnand %p7992_p7, %p7986_p2 }
 0xdeb   : > { %7996 = shalt.err (!%p7993_p9)
}
 0xdec   : > { %6747 = dma.vmem_to_hbm [thread:$0]  (%p9487_p11), %s9300_s19, 128, %s9298_s9, %s5120_s22  }
 0xded PF: > { %s9491_s1 = sld [smem:[#allocation39_spill]]  ;;  %s9492_s28 = sld [smem:[#allocation43_spill]] }
 0xdee   : > { %p9494_p1 = scmp.ge.s32.totalorder %s8071_s27, 2 }
 0xdf3   : > { %s5194_s29 = sand.u32 1, %s9491_s1   ;;  %p9493_p0 = scmp.ne.s32.totalorder %s9492_s28, 0 }
 0xdf4   : > { %s5195_s23 = scalar_lea.sflag [#allocation4], %s5194_s29 }
 0xdf5   : > { %p6792_p12 = pnand %p9494_p1, %p9493_p0 }
 0xdf7   : > { %8046 = dma.done.wait (!%p6792_p12), %s5195_s23, 128  }
 0xdf8   : > { %8048 = vsyncadd (!%p6792_p12), %s5195_s23, 4294967168  ;;  %s9495_s11 = sadd.s32 4294967294, %s8071_s27  }
 0xdf9   : > { %s5203_s21 = sand.u32 1, %s9495_s11  }
 0xdfa   : > { %s5204_s15 = scalar_lea.sflag [#allocation24], %s5203_s21 }
 0xdfb   : > { %8050 = dma.done.wait (!%p6792_p12), %s5204_s15, 256  }
 0xdfc   : > { %8052 = vsyncadd (!%p6792_p12), %s5204_s15, 4294967040  ;;  %s5222_s18 = scalar_lea.sflag [#allocation27], %s5194_s29 }
 0xdfd   : > { %8054 = dma.done.wait (!%p6792_p12), %s5222_s18, 128  }
 0xdfe   : > { %8056 = vsyncadd (!%p6792_p12), %s5222_s18, 4294967168  ;;  %s9496_s27 = sld [smem:[#allocation44_spill]]  ;;  %s9497_s19 = sld [smem:[#allocation40_spill]] }
 0xdff   : > { %s9498_s26 = sld [smem:[#allocation45_spill]]  ;;  %s9499_s24 = smov %s8063_s25 }
 0xe04   : > { %p51_p11 = scmp.ge.s32.totalorder %s9496_s27, 4   ;;  %s9500_s25 = smov %s9497_s19 }
 0xe06   :  { %53 = sbr.rel (!%p51_p11) target bundleno = 32 (0x20), region = 286 }
 0xe0d   :  { %5227 = vsyncpa [#allocation3], 1 }
 0xe0e   :  { %5229 = vsyncpa [#allocation3 + $0x1], 1 }
 0xe0f   :  { %5230 = vsyncpa [#allocation6], 1 }
 0xe10   :  { %5232 = vsyncpa [#allocation6 + $0x1], 1 }
 0xe11   :  { %5233 = vsyncpa [#allocation9], 1 }
 0xe12   :  { %5235 = vsyncpa [#allocation9 + $0x1], 1 }
 0xe13   :  { %5236 = vsyncpa [#allocation12], 1 }
 0xe14   :  { %5238 = vsyncpa [#allocation12 + $0x1], 1 }
 0xe15   :  { %5239 = vsyncpa [#allocation15], 1 }
 0xe16   :  { %5241 = vsyncpa [#allocation15 + $0x1], 1 }
 0xe17   :  { %5242 = vsyncpa [#allocation18], 1 }
 0xe18   :  { %5243 = vsyncpa [#allocation21], 1 }
 0xe19   :  { %5244 = vsyncpa [#allocation4], 1 }
 0xe1a   :  { %5246 = vsyncpa [#allocation4 + $0x1], 1 }
 0xe1b   :  { %5247 = vsyncpa [#allocation24], 1 }
 0xe1c   :  { %5249 = vsyncpa [#allocation24 + $0x1], 1 }
 0xe1d   :  { %5250 = vsyncpa [#allocation27], 1 }
 0xe1e   :  { %5252 = vsyncpa [#allocation27 + $0x1], 1 }

</bundles_post_ra>
